<compile_context>
chip_gen: v7x
topology: tpu7x:2x2x1
jax: 0.10.0
libtpu: 0.0.40
codegen_flags: <defaults>
</compile_context>

<pallas_src>
import functools
import math

import jax
import jax.numpy as jnp
from jax import lax
from jax.experimental import pallas as pl
from jax.experimental.pallas import tpu as pltpu

LN_EPS = 1e-5
NEG_INF = -1e30
VMEM_LIMIT = 32 * 1024 * 1024


def _layernorm(x, w, b):
    mu = jnp.mean(x, axis=-1, keepdims=True)
    var = jnp.mean((x - mu) ** 2, axis=-1, keepdims=True)
    return (x - mu) * lax.rsqrt(var + LN_EPS) * w + b


def _gelu_tanh_bf16(x32):
    # GELU, tanh approximation (matches nn.GELU(approximate='tanh')).
    # Polynomial + tanh evaluated in bf16 (halves VALU pressure on v6e/v7x);
    # result stays bf16 and feeds the next MXU matmul directly.
    x = x32.astype(jnp.bfloat16)
    c = math.sqrt(2.0 / math.pi)
    t = jnp.tanh(c * (x + 0.044715 * (x * x * x)))
    return 0.5 * x * (1.0 + t)


def _pick_tile(T, candidates):
    for c in candidates:
        if T % c == 0:
            return c
    return T


# --------------------------- Kernel A: LN1 + QKV -----------------------------
def _qkv_kernel(x_ref, ln1w_ref, ln1b_ref, wqkv_ref, bqkv_ref, qkv_ref, *, n_head):
    x = x_ref[0]                                  # (TR, C) f32
    C = x.shape[-1]
    hd = C // n_head
    scale = 1.0 / math.sqrt(hd)

    h = _layernorm(x, ln1w_ref[...], ln1b_ref[...])
    qkv = jnp.dot(h.astype(jnp.bfloat16), wqkv_ref[...],
                  preferred_element_type=jnp.float32) + bqkv_ref[...]   # (TR, 3C)
    # Fold 1/sqrt(hd) into q once; all three stores are 128-lane aligned.
    qkv_ref[0, :, 0 * C:1 * C] = (qkv[:, 0 * C:1 * C] * scale).astype(jnp.bfloat16)
    qkv_ref[0, :, 1 * C:2 * C] = qkv[:, 1 * C:2 * C].astype(jnp.bfloat16)
    qkv_ref[0, :, 2 * C:3 * C] = qkv[:, 2 * C:3 * C].astype(jnp.bfloat16)


# ------------- Kernel B: causal attention + proj + residual + MLP ------------
def _attn_mlp_kernel(x_ref, q_ref, k_ref, v_ref,
                     wpr_ref, bpr_ref, ln2w_ref, ln2b_ref,
                     wfc_ref, bfc_ref, wp2_ref, bp2_ref,
                     o_ref, *, n_head):
    qi = pl.program_id(1)
    q = q_ref[0]                                  # (TQ, C) bf16, pre-scaled
    TQ, C = q.shape
    hd = C // n_head

    # Additive causal mask for the diagonal key tile only (built once per step).
    rows = lax.broadcasted_iota(jnp.int32, (TQ, TQ), 0)
    cols = lax.broadcasted_iota(jnp.int32, (TQ, TQ), 1)
    diag_mask = jnp.where(rows >= cols, 0.0, NEG_INF).astype(jnp.float32)

    acc = jnp.zeros((TQ, C), jnp.float32)         # projected attention output

    for h in range(n_head):                       # static head loop (6 iters)
        lo = h * hd
        qh = q[:, lo:lo + hd]                     # (TQ, hd) bf16

        def attend(carry, j, masked):
            m, l, o = carry
            off = pl.multiple_of(j * TQ, TQ)
            kh = k_ref[0, pl.ds(off, TQ), lo:lo + hd]       # (TK, hd) bf16
            vh = v_ref[0, pl.ds(off, TQ), lo:lo + hd]       # (TK, hd) bf16
            s = lax.dot_general(qh, kh, (((1,), (1,)), ((), ())),
                                preferred_element_type=jnp.float32)  # (TQ, TK)
            if masked:
                s = s + diag_mask
            m_new = jnp.maximum(m, jnp.max(s, axis=-1, keepdims=True))
            alpha = jnp.exp(m - m_new)
            p = jnp.exp(s - m_new)
            l_new = l * alpha + jnp.sum(p, axis=-1, keepdims=True)
            o_new = o * alpha + jnp.dot(p.astype(jnp.bfloat16), vh,
                                        preferred_element_type=jnp.float32)
            return m_new, l_new, o_new

        carry0 = (jnp.full((TQ, 1), NEG_INF, jnp.float32),
                  jnp.zeros((TQ, 1), jnp.float32),
                  jnp.zeros((TQ, hd), jnp.float32))
        # Sub-diagonal key tiles: no mask needed; trip count qi (causal skip).
        carry = lax.fori_loop(0, qi, lambda j, c: attend(c, j, False), carry0)
        # Diagonal key tile with the triangular mask.
        _, l, o = attend(carry, qi, True)

        # Normalize after the PV matmul (TQ, hd), then fuse the per-head slice
        # of the output projection into a lane-aligned (TQ, C) accumulator.
        y_h = (o * pl.reciprocal(l, approx=True)).astype(jnp.bfloat16)
        acc = acc + jnp.dot(y_h, wpr_ref[lo:lo + hd, :],
                            preferred_element_type=jnp.float32)

    # attention residual
    x1 = x_ref[0] + acc + bpr_ref[...]

    # MLP branch + residual
    h2 = _layernorm(x1, ln2w_ref[...], ln2b_ref[...])
    hfc = jnp.dot(h2.astype(jnp.bfloat16), wfc_ref[...],
                  preferred_element_type=jnp.float32) + bfc_ref[...]   # (TQ, 4C)
    hact = _gelu_tanh_bf16(hfc)                                        # bf16
    m2 = jnp.dot(hact, wp2_ref[...],
                 preferred_element_type=jnp.float32) + bp2_ref[...]    # (TQ, C)
    o_ref[0] = x1 + m2


def block_forward(x, params, n_head):
    """x: (B, T, C) f32.  params: dict of block parameters (see init)."""
    B, T, C = x.shape
    bf16 = jnp.bfloat16

    # Kernel A (LN + one matmul, memory-bound): big row tiles.
    tile_a = _pick_tile(T, (512, 256, 128, 64, 32, 16, 8))
    # Kernel B: (TQ, TQ) score tiles must stay small.
    tq = _pick_tile(T, (128, 64, 32, 16, 8))
    nt_a = T // tile_a
    nt_b = T // tq

    def rep(arr):
        nd = arr.ndim
        return pl.BlockSpec(arr.shape, lambda b, i: (0,) * nd)

    cparams = pltpu.CompilerParams(
        dimension_semantics=("parallel", "parallel"),
        vmem_limit_bytes=VMEM_LIMIT,
    )

    # ---- Kernel A: LN1 + QKV projection (merged (B, T, 3C) bf16 output) -----
    qkv = pl.pallas_call(
        functools.partial(_qkv_kernel, n_head=n_head),
        out_shape=jax.ShapeDtypeStruct((B, T, 3 * C), bf16),
        grid_spec=pltpu.PrefetchScalarGridSpec(
            num_scalar_prefetch=0,
            grid=(B, nt_a),
            in_specs=[
                pl.BlockSpec((1, tile_a, C), lambda b, i: (b, i, 0)),   # x tile
                rep(params['ln1_w']), rep(params['ln1_b']),
                rep(params['w_qkv']), rep(params['b_qkv']),
            ],
            out_specs=pl.BlockSpec((1, tile_a, 3 * C), lambda b, i: (b, i, 0)),
        ),
        compiler_params=cparams,
    )(x, params['ln1_w'], params['ln1_b'], params['w_qkv'], params['b_qkv'])

    # ---- Kernel B: attention + proj + residual + LN2 + MLP + residual -------
    row_tile = pl.BlockSpec((1, tq, C), lambda b, i: (b, i, 0))
    out = pl.pallas_call(
        functools.partial(_attn_mlp_kernel, n_head=n_head),
        out_shape=jax.ShapeDtypeStruct((B, T, C), jnp.float32),
        grid_spec=pltpu.PrefetchScalarGridSpec(
            num_scalar_prefetch=0,
            grid=(B, nt_b),
            in_specs=[
                row_tile,                                            # x (residual)
                pl.BlockSpec((1, tq, C), lambda b, i: (b, i, 0)),    # q tile
                pl.BlockSpec((1, T, C), lambda b, i: (b, 0, 1)),     # full K slab
                pl.BlockSpec((1, T, C), lambda b, i: (b, 0, 2)),     # full V slab
                rep(params['w_proj']), rep(params['b_proj']),
                rep(params['ln2_w']), rep(params['ln2_b']),
                rep(params['w_fc']), rep(params['b_fc']),
                rep(params['w_proj2']), rep(params['b_proj2']),
            ],
            out_specs=row_tile,
        ),
        compiler_params=cparams,
        input_output_aliases={0: 0},      # reuse x's buffer for the output
    )(x, qkv, qkv, qkv,
      params['w_proj'], params['b_proj'],
      params['ln2_w'], params['ln2_b'],
      params['w_fc'], params['b_fc'],
      params['w_proj2'], params['b_proj2'])
    return out


# ------------------------- pure-JAX reference -------------------------------
def block_reference(x, params, n_head):
    B, T, C = x.shape
    hd = C // n_head
    f32 = jnp.float32

    def ln(v, w, b):
        mu = jnp.mean(v, axis=-1, keepdims=True)
        var = jnp.mean((v - mu) ** 2, axis=-1, keepdims=True)
        return (v - mu) / jnp.sqrt(var + LN_EPS) * w + b

    h = ln(x, params['ln1_w'], params['ln1_b'])
    qkv = h @ params['w_qkv'].astype(f32) + params['b_qkv']
    q, k, v = jnp.split(qkv, 3, axis=-1)
    q = q.reshape(B, T, n_head, hd).transpose(0, 2, 1, 3)
    k = k.reshape(B, T, n_head, hd).transpose(0, 2, 1, 3)
    v = v.reshape(B, T, n_head, hd).transpose(0, 2, 1, 3)
    s = jnp.einsum('bhtd,bhsd->bhts', q, k) / math.sqrt(hd)
    mask = jnp.tril(jnp.ones((T, T), dtype=bool))
    s = jnp.where(mask[None, None], s, NEG_INF)
    p = jax.nn.softmax(s, axis=-1)
    y = jnp.einsum('bhts,bhsd->bhtd', p, v)
    y = y.transpose(0, 2, 1, 3).reshape(B, T, C)
    y = y @ params['w_proj'].astype(f32) + params['b_proj']
    x = x + y

    h2 = ln(x, params['ln2_w'], params['ln2_b'])
    hfc = h2 @ params['w_fc'].astype(f32) + params['b_fc']
    c = math.sqrt(2.0 / math.pi)
    hfc = 0.5 * hfc * (1.0 + jnp.tanh(c * (hfc + 0.044715 * hfc ** 3)))
    m = hfc @ params['w_proj2'].astype(f32) + params['b_proj2']
    return x + m


def init_block_params(key, n_embd, n_layer=6):
    """Deterministic init following GPT._init_weights (std=0.02; c_proj
    weights scaled by (2*n_layer)^-0.5; biases zero; LN weight=1, bias=0).
    Linear weights stored transposed as (in, out) in bf16 (MXU operand
    dtype); LN params / biases stay f32."""
    C = n_embd
    std = 0.02
    std_proj = 0.02 * (2 * n_layer) ** -0.5
    k1, k2, k3, k4 = jax.random.split(key, 4)
    bf16 = jnp.bfloat16
    return {
        'ln1_w': jnp.ones((1, C), jnp.float32),
        'ln1_b': jnp.zeros((1, C), jnp.float32),
        'w_qkv': (std * jax.random.normal(k1, (C, 3 * C), jnp.float32)).astype(bf16),
        'b_qkv': jnp.zeros((1, 3 * C), jnp.float32),
        'w_proj': (std_proj * jax.random.normal(k2, (C, C), jnp.float32)).astype(bf16),
        'b_proj': jnp.zeros((1, C), jnp.float32),
        'ln2_w': jnp.ones((1, C), jnp.float32),
        'ln2_b': jnp.zeros((1, C), jnp.float32),
        'w_fc': (std * jax.random.normal(k3, (C, 4 * C), jnp.float32)).astype(bf16),
        'b_fc': jnp.zeros((1, 4 * C), jnp.float32),
        'w_proj2': (std_proj * jax.random.normal(k4, (4 * C, C), jnp.float32)).astype(bf16),
        'b_proj2': jnp.zeros((1, C), jnp.float32),
    }


if __name__ == "__main__":
    # Small config consistent with the module (n_embd=384, n_head=6 from
    # GPTConfig; sequence shortened so the run stays tiny).
    B, T, C, NH = 2, 256, 384, 6

    key = jax.random.PRNGKey(0)
    kx, kp = jax.random.split(key)
    x = jax.random.normal(kx, (B, T, C), jnp.float32)
    params = init_block_params(kp, C)

    out = jax.block_until_ready(block_forward(x, params, NH))
    ref = block_reference(x, params, NH)

    assert out.shape == (B, T, C)
    max_err = float(jnp.max(jnp.abs(out - ref)))
    # bf16 matmul operands + approx reciprocal + bf16 GELU => loose tolerance
    assert jnp.allclose(out, ref, atol=3e-2, rtol=3e-2), max_err

    print("KERNEL_OK")
</pallas_src>

<mosaic_0001>
module attributes {stable_mosaic.version = 11 : i64} {
  func.func @_qkv_kernel(%arg0: i32, %arg1: i32, %arg2: memref<1x256x384xf32, #tpu.memory_space<vmem>>, %arg3: memref<1x384xf32, #tpu.memory_space<vmem>>, %arg4: memref<1x384xf32, #tpu.memory_space<vmem>>, %arg5: memref<384x1152xbf16, #tpu.memory_space<vmem>>, %arg6: memref<1x1152xf32, #tpu.memory_space<vmem>>, %arg7: memref<1x256x1152xbf16, #tpu.memory_space<vmem>>) attributes {dimension_semantics = [#tpu.dimension_semantics<parallel>, #tpu.dimension_semantics<parallel>], iteration_bounds = array<i64: 2, 1>, scalar_prefetch = 0 : i64, scratch_operands = 0 : i64, tpu.core_type = #tpu.core_type<tc>, window_params = [{transform_indices = @transform_0, window_bounds = array<i64: 1, 256, 384>}, {pipeline_mode = #tpu.pipeline_mode<synchronous>, transform_indices = @transform_1, window_bounds = array<i64: 1, 384>}, {pipeline_mode = #tpu.pipeline_mode<synchronous>, transform_indices = @transform_2, window_bounds = array<i64: 1, 384>}, {pipeline_mode = #tpu.pipeline_mode<synchronous>, transform_indices = @transform_3, window_bounds = array<i64: 384, 1152>}, {pipeline_mode = #tpu.pipeline_mode<synchronous>, transform_indices = @transform_4, window_bounds = array<i64: 1, 1152>}, {transform_indices = @transform_5, window_bounds = array<i64: 1, 256, 1152>}]} {
    %c0 = arith.constant 0 : index
    %c0_0 = arith.constant 0 : index
    %c0_1 = arith.constant 0 : index
    %0 = vector.load %arg2[%c0, %c0_0, %c0_1] : memref<1x256x384xf32, #tpu.memory_space<vmem>>, vector<1x256x384xf32>
    %1 = vector.shape_cast %0 : vector<1x256x384xf32> to vector<256x384xf32>
    %c0_2 = arith.constant 0 : index
    %c0_3 = arith.constant 0 : index
    %2 = vector.load %arg3[%c0_2, %c0_3] : memref<1x384xf32, #tpu.memory_space<vmem>>, vector<1x384xf32>
    %c0_4 = arith.constant 0 : index
    %c0_5 = arith.constant 0 : index
    %3 = vector.load %arg4[%c0_4, %c0_5] : memref<1x384xf32, #tpu.memory_space<vmem>>, vector<1x384xf32>
    %cst = arith.constant dense<0.000000e+00> : vector<256xf32>
    %4 = vector.multi_reduction <add>, %1, %cst [1] : vector<256x384xf32> to vector<256xf32>
    %5 = vector.shape_cast %4 : vector<256xf32> to vector<256x1xf32>
    %cst_6 = arith.constant 3.840000e+02 : f32
    %6 = vector.broadcast %cst_6 : f32 to vector<256x1xf32>
    %7 = arith.divf %5, %6 : vector<256x1xf32>
    %8 = vector.broadcast %7 : vector<256x1xf32> to vector<256x384xf32>
    %9 = arith.subf %1, %8 : vector<256x384xf32>
    %10 = arith.mulf %9, %9 : vector<256x384xf32>
    %cst_7 = arith.constant dense<0.000000e+00> : vector<256xf32>
    %11 = vector.multi_reduction <add>, %10, %cst_7 [1] : vector<256x384xf32> to vector<256xf32>
    %12 = vector.shape_cast %11 : vector<256xf32> to vector<256x1xf32>
    %cst_8 = arith.constant 3.840000e+02 : f32
    %13 = vector.broadcast %cst_8 : f32 to vector<256x1xf32>
    %14 = arith.divf %12, %13 : vector<256x1xf32>
    %15 = vector.broadcast %7 : vector<256x1xf32> to vector<256x384xf32>
    %16 = arith.subf %1, %15 : vector<256x384xf32>
    %cst_9 = arith.constant 9.99999974E-6 : f32
    %17 = vector.broadcast %cst_9 : f32 to vector<256x1xf32>
    %18 = arith.addf %14, %17 : vector<256x1xf32>
    %19 = math.rsqrt %18 : vector<256x1xf32>
    %20 = vector.broadcast %19 : vector<256x1xf32> to vector<256x384xf32>
    %21 = arith.mulf %16, %20 : vector<256x384xf32>
    %22 = vector.broadcast %2 : vector<1x384xf32> to vector<256x384xf32>
    %23 = arith.mulf %21, %22 : vector<256x384xf32>
    %24 = vector.broadcast %3 : vector<1x384xf32> to vector<256x384xf32>
    %25 = arith.addf %23, %24 : vector<256x384xf32>
    %26 = arith.truncf %25 : vector<256x384xf32> to vector<256x384xbf16>
    %c0_10 = arith.constant 0 : index
    %c0_11 = arith.constant 0 : index
    %27 = vector.load %arg5[%c0_10, %c0_11] : memref<384x1152xbf16, #tpu.memory_space<vmem>>, vector<384x1152xbf16>
    %cst_12 = arith.constant dense<0.000000e+00> : vector<256x1152xf32>
    %28 = tpu.matmul %26, %27, %cst_12 {dimension_numbers = #tpu.dot_dimension_numbers<[1], [0], [0], [1], [0, 0, 1, 1], [], []>} : vector<256x384xbf16>, vector<384x1152xbf16>, vector<256x1152xf32> -> vector<256x1152xf32>
    %c0_13 = arith.constant 0 : index
    %c0_14 = arith.constant 0 : index
    %29 = vector.load %arg6[%c0_13, %c0_14] : memref<1x1152xf32, #tpu.memory_space<vmem>>, vector<1x1152xf32>
    %30 = vector.broadcast %29 : vector<1x1152xf32> to vector<256x1152xf32>
    %31 = arith.addf %28, %30 : vector<256x1152xf32>
    %32 = vector.extract_strided_slice %31 {offsets = [0, 0], sizes = [256, 384], strides = [1, 1]} : vector<256x1152xf32> to vector<256x384xf32>
    %cst_15 = arith.constant 1.250000e-01 : f32
    %33 = vector.broadcast %cst_15 : f32 to vector<256x384xf32>
    %34 = arith.mulf %32, %33 : vector<256x384xf32>
    %35 = arith.truncf %34 : vector<256x384xf32> to vector<256x384xbf16>
    %c0_16 = arith.constant 0 : index
    %c0_17 = arith.constant 0 : index
    %c0_18 = arith.constant 0 : index
    %36 = vector.load %arg7[%c0_16, %c0_17, %c0_18] : memref<1x256x1152xbf16, #tpu.memory_space<vmem>>, vector<1x256x384xbf16>
    %37 = vector.shape_cast %36 : vector<1x256x384xbf16> to vector<256x384xbf16>
    %38 = vector.shape_cast %35 : vector<256x384xbf16> to vector<1x256x384xbf16>
    tpu.vector_store %arg7[%c0_16, %c0_17, %c0_18], %38 {strides = array<i32>} : memref<1x256x1152xbf16, #tpu.memory_space<vmem>>, vector<1x256x384xbf16>,
    %39 = vector.extract_strided_slice %31 {offsets = [0, 384], sizes = [256, 384], strides = [1, 1]} : vector<256x1152xf32> to vector<256x384xf32>
    %40 = arith.truncf %39 : vector<256x384xf32> to vector<256x384xbf16>
    %c0_19 = arith.constant 0 : index
    %c0_20 = arith.constant 0 : index
    %c384 = arith.constant 384 : index
    %41 = vector.load %arg7[%c0_19, %c0_20, %c384] : memref<1x256x1152xbf16, #tpu.memory_space<vmem>>, vector<1x256x384xbf16>
    %42 = vector.shape_cast %41 : vector<1x256x384xbf16> to vector<256x384xbf16>
    %43 = vector.shape_cast %40 : vector<256x384xbf16> to vector<1x256x384xbf16>
    tpu.vector_store %arg7[%c0_19, %c0_20, %c384], %43 {strides = array<i32>} : memref<1x256x1152xbf16, #tpu.memory_space<vmem>>, vector<1x256x384xbf16>,
    %44 = vector.extract_strided_slice %31 {offsets = [0, 768], sizes = [256, 384], strides = [1, 1]} : vector<256x1152xf32> to vector<256x384xf32>
    %45 = arith.truncf %44 : vector<256x384xf32> to vector<256x384xbf16>
    %c0_21 = arith.constant 0 : index
    %c0_22 = arith.constant 0 : index
    %c768 = arith.constant 768 : index
    %46 = vector.load %arg7[%c0_21, %c0_22, %c768] : memref<1x256x1152xbf16, #tpu.memory_space<vmem>>, vector<1x256x384xbf16>
    %47 = vector.shape_cast %46 : vector<1x256x384xbf16> to vector<256x384xbf16>
    %48 = vector.shape_cast %45 : vector<256x384xbf16> to vector<1x256x384xbf16>
    tpu.vector_store %arg7[%c0_21, %c0_22, %c768], %48 {strides = array<i32>} : memref<1x256x1152xbf16, #tpu.memory_space<vmem>>, vector<1x256x384xbf16>,
    return
  }
  func.func @transform_0(%arg0: i32, %arg1: i32) -> (i32, i32, i32) {
    %c0_i32 = arith.constant 0 : i32
    %c0_i32_0 = arith.constant 0 : i32
    return %arg0, %arg1, %c0_i32 : i32, i32, i32
  }
  func.func @transform_1(%arg0: i32, %arg1: i32) -> (i32, i32) {
    %c0_i32 = arith.constant 0 : i32
    %c0_i32_0 = arith.constant 0 : i32
    %c0_i32_1 = arith.constant 0 : i32
    return %c0_i32, %c0_i32_0 : i32, i32
  }
  func.func @transform_2(%arg0: i32, %arg1: i32) -> (i32, i32) {
    %c0_i32 = arith.constant 0 : i32
    %c0_i32_0 = arith.constant 0 : i32
    %c0_i32_1 = arith.constant 0 : i32
    return %c0_i32, %c0_i32_0 : i32, i32
  }
  func.func @transform_3(%arg0: i32, %arg1: i32) -> (i32, i32) {
    %c0_i32 = arith.constant 0 : i32
    %c0_i32_0 = arith.constant 0 : i32
    %c0_i32_1 = arith.constant 0 : i32
    return %c0_i32, %c0_i32_0 : i32, i32
  }
  func.func @transform_4(%arg0: i32, %arg1: i32) -> (i32, i32) {
    %c0_i32 = arith.constant 0 : i32
    %c0_i32_0 = arith.constant 0 : i32
    %c0_i32_1 = arith.constant 0 : i32
    return %c0_i32, %c0_i32_0 : i32, i32
  }
  func.func @transform_5(%arg0: i32, %arg1: i32) -> (i32, i32, i32) {
    %c0_i32 = arith.constant 0 : i32
    %c0_i32_0 = arith.constant 0 : i32
    return %arg0, %arg1, %c0_i32 : i32, i32, i32
  }
}

</mosaic_0001>

<bundles_post_ra>
// kernel: tpu_custom_call.1
= control target key start
LH: loop header
LB: loop body
LE: loop exit
PB: predicated region body
PF: predicated region fallthrough
CT: control target
= control target key end

     0   :  { %s10852_s0 = inlined_call_operand.hbm [shape: f32[2,256,384], index: 0, kind: input, shape index: {}]   ;;  %s10853_s1 = inlined_call_operand.hbm [shape: f32[1,384], index: 1, kind: input, shape index: {}]   ;;  %s10854_s2 = inlined_call_operand.hbm [shape: f32[1,384], index: 2, kind: input, shape index: {}]   ;;  %s10855_s3 = inlined_call_operand.hbm [shape: bf16[384,1152], index: 3, kind: input, shape index: {}]   ;;  %s10856_s4 = inlined_call_operand.hbm [shape: f32[1,1152], index: 4, kind: input, shape index: {}]   ;;  %s10857_s5 = inlined_call_operand.hbm [shape: bf16[2,256,1152], index: 5, kind: output, shape index: {}]  }
   0x1   :  { %10995 = sst [smem:[#allocation93_spill]] %s10853_s1 }
   0x2   :  { %10 = vsyncpa [#allocation3], 0 }
   0x3   :  { %12 = vsyncpa [#allocation3 + $0x1], 0 }
   0x4   :  { %13 = vsyncpa [#allocation6], 0 }
   0x5   :  { %14 = vsyncpa [#allocation9], 0 }
   0x6   :  { %15 = vsyncpa [#allocation4], 0 }
   0x7   :  { %17 = vsyncpa [#allocation4 + $0x1], 0  ;;  %s8187_s18 = smov 0   ;;  %s8189_s19 = smov 0  }
   0x8   :  { %s8191_s20 = smov 0   ;;  %s8193_s21 = smov 0  }
   0x9   :  { %s8195_s22 = smov 0   ;;  %s8197_s23 = smov 0  }
   0xa LB: > { %s6009_s24 = sadd.s32 4294967295, %s8142_s23   ;;  %s6010_s25 = sadd.s32 4294967294, %s8142_s23   ;;  %s8142_s23 = sphi %s8197_s23, %s23_s23   ;;  %s8138_s22 = sphi %s8195_s22, %s11305_s22   ;;  %s8134_s21 = sphi %s8193_s21, %s11304_s21   ;;  %s8130_s20 = sphi %s8191_s20, %s11303_s20   ;;  %s8126_s19 = sphi %s8189_s19, %s11302_s19   ;;  %s8122_s18 = sphi %s8187_s18, %s11301_s18  }
   0xb   : > { %p57_p0 = scmp.ne.s32.totalorder %s8126_s19, %s8122_s18  ;;  %p8221_p1 = scmp.eq.s32.totalorder %s6009_s24, 0 }
   0xc   : > { %p8225_p2 = scmp.eq.s32.totalorder %s6009_s24, 1  ;;  %p173_p3 = scmp.eq.s32.totalorder %s6010_s25, 1 }
   0xd   : > { %s10996_s26 = scalar_select %p8221_p1, 1, 0 }
   0xe   : > { %s10997_s27 = scalar_select %p8225_p2, 1, 0 }
   0xf   : > { %p8231_p4 = por %p8221_p1, %p57_p0  ;;  %p6011_p5 = scmp.ge.s32.totalorder %s8142_s23, 1 }
  0x10   : > { %p8236_p6 = por %p173_p3, %p57_p0  ;;  %p180_p7 = scmp.lt.s32.totalorder %s8142_s23, 3 }
  0x11   : > { %s10998_s28 = scalar_select %p8231_p4, 1, 0 }
  0x12   : > { %s10999_s29 = scalar_select %p8236_p6, 1, 0 }
  0x13   : > { %p8241_p8 = pnand %p6011_p5, %p180_p7  ;;  %s8144_s6 = smov [#allocation5]  }
  0x14   : > { %s193_s7 = sshll.u32 %s8144_s6, 4  ;;  %s8145_s8 = smov [#allocation8]   ;;  %s194_s7 = int_to_ptr.vmem [resolvable:$true] %s193_s7 }
  0x15   : > { %s11000_s30 = scalar_select %p8241_p8, 1, 0 }
  0x16   : > { %p7380_p10 = pneg %p8241_p8  ;;  %s214_s9 = sshll.u32 %s8145_s8, 4  ;;  %s8254_s9 = int_to_ptr.vmem [resolvable:$true] %s214_s9 }
  0x17   : > { %s8146_s11 = smov [#allocation7]   ;;  %s11002_s1 = sld [smem:[#allocation93_spill]] }
  0x18   : > { %p8250_p11 = pnand %p7380_p10, %p8221_p1  ;;  %s8256_s12 = sshll.u32 %s8146_s11, 4  ;;  %s205_s12 = int_to_ptr.vmem [resolvable:$true] %s8256_s12 }
  0x1a   : > { %p8266_p13 = pneg %p8250_p11 }
  0x1d   : > { %s7910_s15 = scalar_lea.hbm %s11002_s1, 48 }
  0x1e   : > { %p7911_p12 = scmp.ne.s32.totalorder %s11002_s1, %s7910_s15  ;;  %p7917_p5 = scmp.lt.u32.totalorder %s7910_s15, %s11002_s1 }
  0x20   : > { %p7913_p0 = pnand %p8266_p13, %p7911_p12 }
  0x22   : > { %p7914_p3 = pneg %p7913_p0 }
  0x24   : > { %p7919_p7 = pnand %p7917_p5, %p7914_p3 }
  0x26   : > { %7922 = shalt.err (!%p7919_p7)
}
  0x27   : > { %s7923_s8 = scalar_lea.vmem %s194_s7, 48  ;;  %s7930_s11 = scalar_lea.vmem %s194_s7, 64 }
  0x28   : > { %p7924_p10 = scmp.ne.s32.totalorder %s194_s7, %s7923_s8  ;;  %p7931_p1 = scmp.lt.s32.totalorder %s194_s7, %s194_s7 }
  0x29   : > { %p7932_p4 = scmp.lt.s32.totalorder %s7930_s11, %s7923_s8 }
  0x2a   : > { %p7926_p9 = pnand %p7924_p10, %p8266_p13 }
  0x2b   : > { %p7933_p8 = por %p7932_p4, %p7931_p1 }
  0x2c   : > { %p7927_p6 = pneg %p7926_p9 }
  0x2e   : > { %p7934_p2 = pnand %p7933_p8, %p7927_p6 }
  0x30   : > { %7937 = shalt.err (!%p7934_p2)
}
  0x31   : > { %7383 = dma.hbm_to_vmem [thread:$0]  (!%p8250_p11), %s11002_s1, 48, %s194_s7, [#allocation6]  }
  0x32   : > { %s7938_s17 = scalar_lea.hbm %s10855_s3, 27648 }
  0x33   : > { %p7939_p9 = scmp.ne.s32.totalorder %s10855_s3, %s7938_s17  ;;  %p7945_p2 = scmp.lt.u32.totalorder %s7938_s17, %s10855_s3 }
  0x35   : > { %p7941_p12 = pnand %p7939_p9, %p8266_p13 }
  0x37   : > { %p7942_p1 = pneg %p7941_p12 }
  0x39   : > { %p7947_p4 = pnand %p7945_p2, %p7942_p1 }
  0x3b   : > { %7950 = shalt.err (!%p7947_p4)
}
  0x3c   : > { %s7951_s7 = scalar_lea.vmem %s8254_s9, 27648  ;;  %p7959_p3 = scmp.lt.s32.totalorder %s8254_s9, %s8254_s9 }
  0x3d   : > { %p7952_p6 = scmp.ne.s32.totalorder %s8254_s9, %s7951_s7  ;;  %p7960_p5 = scmp.lt.s32.totalorder %s7951_s7, %s7951_s7 }
  0x3f   : > { %p7954_p8 = pnand %p7952_p6, %p8266_p13  ;;  %p7961_p7 = por %p7960_p5, %p7959_p3 }
  0x41   : > { %p7955_p0 = pneg %p7954_p8 }
  0x43   : > { %p7962_p10 = pnand %p7961_p7, %p7955_p0 }
  0x45   : > { %7965 = shalt.err (!%p7962_p10)
}
  0x46   : > { %s8147_s13 = smov 576   ;;  %s8148_s14 = smov 36  }
  0x47   : > { %7389 = dma.hbm_to_vmem [thread:$0]  (!%p8250_p11), %s10855_s3, 27648, %s8254_s9, [#allocation9], %s8147_s13, %s8147_s13, %s8148_s14  }
  0x48   : > { %s7966_s6 = scalar_lea.hbm %s10854_s2, 48 }
  0x49   : > { %p7967_p9 = scmp.ne.s32.totalorder %s10854_s2, %s7966_s6  ;;  %p7973_p2 = scmp.lt.u32.totalorder %s7966_s6, %s10854_s2 }
  0x4b   : > { %p7969_p12 = pnand %p7967_p9, %p8266_p13 }
  0x4d   : > { %p7970_p1 = pneg %p7969_p12 }
  0x4f   : > { %p7975_p4 = pnand %p7973_p2, %p7970_p1 }
  0x51   : > { %7978 = shalt.err (!%p7975_p4)
}
  0x52   : > { %s7979_s15 = scalar_lea.vmem %s205_s12, 48  ;;  %s7986_s9 = scalar_lea.vmem %s205_s12, 64 }
  0x53   : > { %p7980_p6 = scmp.ne.s32.totalorder %s205_s12, %s7979_s15  ;;  %p7987_p3 = scmp.lt.s32.totalorder %s205_s12, %s205_s12 }
  0x54   : > { %p7988_p5 = scmp.lt.s32.totalorder %s7986_s9, %s7979_s15 }
  0x55   : > { %p7982_p8 = pnand %p7980_p6, %p8266_p13 }
  0x56   : > { %p7989_p7 = por %p7988_p5, %p7987_p3 }
  0x57   : > { %p7983_p0 = pneg %p7982_p8 }
  0x59   : > { %p7990_p10 = pnand %p7989_p7, %p7983_p0 }
  0x5b   : > { %7993 = shalt.err (!%p7990_p10)
}
  0x5c   : > { %7386 = dma.hbm_to_vmem [thread:$0]  (!%p8250_p11), %s10854_s2, 48, %s205_s12, [#allocation6]  }
  0x5d   : > { %s8149_s1 = smov [#allocation10]   ;;  %s7994_s6 = scalar_lea.hbm %s10856_s4, 144 }
  0x5e   : > { %s228_s16 = sshll.u32 %s8149_s1, 4  ;;  %p7995_p9 = scmp.ne.s32.totalorder %s10856_s4, %s7994_s6  ;;  %s229_s16 = int_to_ptr.vmem [resolvable:$true] %s228_s16 }
  0x5f   : > { %p8001_p2 = scmp.lt.u32.totalorder %s7994_s6, %s10856_s4 }
  0x60   : > { %p7997_p12 = pnand %p7995_p9, %p8266_p13 }
  0x62   : > { %p7998_p1 = pneg %p7997_p12 }
  0x64   : > { %p8003_p4 = pnand %p8001_p2, %p7998_p1 }
  0x66   : > { %8006 = shalt.err (!%p8003_p4)
}
  0x67   : > { %s8007_s12 = scalar_lea.vmem %s229_s16, 144  ;;  %s8014_s9 = scalar_lea.vmem %s229_s16, 160 }
  0x68   : > { %p8008_p6 = scmp.ne.s32.totalorder %s229_s16, %s8007_s12  ;;  %p8015_p3 = scmp.lt.s32.totalorder %s229_s16, %s229_s16 }
  0x69   : > { %p8016_p5 = scmp.lt.s32.totalorder %s8014_s9, %s8007_s12 }
  0x6a   : > { %p8010_p8 = pnand %p8008_p6, %p8266_p13 }
  0x6b   : > { %p8017_p7 = por %p8016_p5, %p8015_p3 }
  0x6c   : > { %p8011_p0 = pneg %p8010_p8 }
  0x6e   : > { %p8018_p10 = pnand %p8017_p7, %p8011_p0 }
  0x70   : > { %8021 = shalt.err (!%p8018_p10)
}
  0x71   : > { %7392 = dma.hbm_to_vmem [thread:$0]  (!%p8250_p11), %s10856_s4, 144, %s229_s16, [#allocation9]  }
  0x72   : > { %s35_s24 = sadd.s32 1, %s8138_s22  ;;  %s44_s1 = sadd.s32 1, %s8130_s20 }
  0x73   : > { %p37_p13 = scmp.ge.s32.totalorder %s35_s24, 2  ;;  %p51_p9 = scmp.ne.s32.totalorder %s8130_s20, %s8126_s19 }
  0x74   : > { %p52_p12 = scmp.eq.s32.totalorder %s8142_s23, 0  ;;  %p7405_p1 = scmp.lt.s32.totalorder %s8142_s23, 2 }
  0x75   : > { %s11307_s24 = smov (%p37_p13, %s35_s24), 0  ;;  %p11004_p4 = scmp.ne.s32.totalorder %s10997_s27, 0 }
  0x76   : > { %p53_p2 = por %p52_p12, %p51_p9  ;;  %s39_s17 = ssub.s32 %s8138_s22, %s11307_s24 }
  0x77   : > { %p8352_p6 = por %p11004_p4, %p51_p9  ;;  %s239_s25 = sand.u32 1, %s8130_s20  }
  0x78   : > { %p42_p8 = scmp.eq.s32.totalorder %s39_s17, 0  ;;  %s7355_s16 = smul.u32 768, %s239_s25 }
  0x79   : > { %p8359_p11 = pnand %p7405_p1, %p53_p2  ;;  %s7356_s11 = smul.u32 12288, %s8138_s22 }
  0x7a   : > { %s8364_s8 = scalar_select %p42_p8, %s8130_s20, %s44_s1  }
  0x7b   : > { %s243_s7 = scalar_lea.vmem [#allocation2], %s7355_s16  ;;  %s8370_s9 = scalar_lea.hbm %s10852_s0, %s7356_s11 }
  0x7c   : > { %s253_s15 = sshll.u32 %s243_s7, 4  ;;  %s8374_s13 = scalar_lea.sflag [#allocation3], %s239_s25  ;;  %s8372_s15 = int_to_ptr.vmem [resolvable:$true] %s253_s15 }
  0x7d   : > { %s8022_s14 = scalar_lea.hbm %s8370_s9, 12288  ;;  %p8024_p3 = pneg %p8359_p11 }
  0x7e   : > { %p8023_p0 = scmp.ne.s32.totalorder %s8370_s9, %s8022_s14  ;;  %s8027_s16 = scalar_lea.hbm %s10852_s0, 24576 }
  0x7f   : > { %p8028_p10 = scmp.lt.u32.totalorder %s8370_s9, %s10852_s0  ;;  %p8029_p13 = scmp.lt.u32.totalorder %s8027_s16, %s8022_s14 }
  0x80   : > { %p8025_p5 = pnand %p8024_p3, %p8023_p0  ;;  %p8031_p12 = scmp.lt.u32.totalorder %s8022_s14, %s8370_s9 }
  0x81   : > { %p8030_p9 = por %p8029_p13, %p8028_p10 }
  0x82   : > { %p8026_p7 = pneg %p8025_p5 }
  0x83   : > { %p8032_p1 = por %p8031_p12, %p8030_p9 }
  0x85   : > { %p8033_p2 = pnand %p8032_p1, %p8026_p7 }
  0x87   : > { %8036 = shalt.err (!%p8033_p2)
}
  0x88   : > { %s8037_s25 = scalar_lea.vmem %s8372_s15, 12288  ;;  %s8150_s27 = smov [#allocation2]  }
  0x89   : > { %p8038_p4 = scmp.ne.s32.totalorder %s8372_s15, %s8037_s25  ;;  %s8042_s12 = sshll.u32 %s8150_s27, 4  ;;  %s8043_s12 = int_to_ptr.vmem [resolvable:$false] %s8042_s12 }
  0x8a   : > { %s8044_s1 = scalar_lea.vmem %s8043_s12, 24576  ;;  %p8045_p5 = scmp.lt.s32.totalorder %s8372_s15, %s8043_s12 }
  0x8b   : > { %p8040_p8 = pnand %p8038_p4, %p8024_p3  ;;  %p8046_p10 = scmp.lt.s32.totalorder %s8044_s1, %s8037_s25 }
  0x8d   : > { %p8041_p0 = pneg %p8040_p8  ;;  %p8047_p13 = por %p8046_p10, %p8045_p5 }
  0x8f   : > { %p8048_p9 = pnand %p8047_p13, %p8041_p0 }
  0x91   : > { %8051 = shalt.err (!%p8048_p9)
}
  0x92   : > { %s8151_s14 = smov 384   ;;  %s8152_s17 = smov 24  }
  0x93   : > { %7396 = dma.hbm_to_vmem [thread:$0]  (!%p8359_p11), %s8370_s9, 12288, %s8372_s15, %s8374_s13, %s8151_s14, %s8151_s14, %s8152_s17  }
  0x94   : > { %p11007_p3 = scmp.ne.s32.totalorder %s11000_s30, 0 }
  0x96   : > { %265 = sbr.rel (%p11007_p3) target bundleno = 1414 (0x586), region = 40 }
  0x9d   : > { %s8405_s16 = sand.u32 1, %s8126_s19   ;;  %p11008_p7 = scmp.ne.s32.totalorder %s10998_s28, 0 }
  0x9e   : > { %s7357_s11 = smul.u32 768, %s8405_s16  ;;  %s268_s7 = scalar_lea.sflag [#allocation3], %s8405_s16 }
  0xa0   : > { %s8409_s25 = scalar_lea.vmem [#allocation2], %s7357_s11 }
  0xa1   : > { %8105 = dma.done.wait (%p11008_p7), %s268_s7, 12288  }
  0xa2   : > { %8107 = vsyncadd (%p11008_p7), %s268_s7, 4294955008  ;;  %p11009_p11 = scmp.ne.s32.totalorder %s10996_s26, 0 }
  0xa4   : > { %8109 = dma.done.wait (%p11009_p11), [#allocation6], 96  }
  0xa5   : > { %8111 = vsyncadd (%p11009_p11), [#allocation6], 4294967200 }
  0xa6   : > { %8113 = dma.done.wait (%p11009_p11), [#allocation9], 27792  }
  0xa7   : > { %8115 = vsyncadd (%p11009_p11), [#allocation9], 4294939504  ;;  %v8424_v0 = vld [vmem:[%s8409_s25 + $0x180] sm:$0xff]  ;;  %v8427_v1 = vld [vmem:[%s8409_s25 + $0x188] sm:$0xff]  ;;  %s7358_s26 = smul.u32 1152, %s8405_s16  ;;  %s5868_s13 = scalar_lea.sflag [#allocation4], %s8405_s16 }
  0xa8   : > { %v8430_v2 = vld [vmem:[%s8409_s25 + $0x190] sm:$0xff]  ;;  %v479_v3 = vadd.f32 %v8427_v1, %v8424_v0  ;;  %v8435_v4 = vld [vmem:[%s8409_s25 + $0x198] sm:$0xff]  ;;  %v8438_v5 = vld [vmem:[%s8409_s25 + $0x1a0] sm:$0xff]  ;;  %s7359_s30 = smul.u32 18432, %s8134_s21  ;;  %s8154_s12 = smov [#allocation11]  }
  0xa9   : > { %v8441_v6 = vld [vmem:[%s8409_s25 + $0x1a8] sm:$0xff]  ;;  %v483_v7 = vadd.f32 %v8438_v5, %v8435_v4  ;;  %v8446_v8 = vld [vmem:[%s8409_s25 + $0x1b0] sm:$0xff]  ;;  %v8449_v9 = vld [vmem:[%s8409_s25 + $0x1b8] sm:$0xff]  ;;  %s9948_s28 = scalar_lea.vmem [#allocation11], %s7358_s26  ;;  %s8056_s1 = sshll.u32 %s8154_s12, 4  ;;  %s8057_s1 = int_to_ptr.vmem [resolvable:$false] %s8056_s1 }
  0xaa   : > { %v8452_v10 = vld [vmem:[%s8409_s25 + $0x1c0] sm:$0xff]  ;;  %v480_v11 = vadd.f32 %v479_v3, %v8430_v2  ;;  %v487_v12 = vadd.f32 %v8449_v9, %v8446_v8  ;;  %v8458_v13 = vld [vmem:[%s8409_s25 + $0x1c8] sm:$0xff]  ;;  %v8461_v14 = vld [vmem:[%s8409_s25 + $0x1d0] sm:$0xff]  ;;  %s5884_s6 = sshll.u32 %s9948_s28, 4  ;;  %s10798_s21 = scalar_lea.hbm %s10857_s5, %s7359_s30  ;;  %s10801_s6 = int_to_ptr.vmem [resolvable:$true] %s5884_s6 }
  0xab   : > { %v8464_v15 = vld [vmem:[%s8409_s25 + $0x1d8] sm:$0xff]  ;;  %v491_v16 = vadd.f32 %v8461_v14, %v8458_v13  ;;  %v8469_v17 = vld [vmem:[%s8409_s25 + $0x1e0] sm:$0xff]  ;;  %v8472_v18 = vld [vmem:[%s8409_s25 + $0x1e8] sm:$0xff]  ;;  %v484_v19 = vadd.f32 %v483_v7, %v8441_v6  ;;  %s8052_s27 = scalar_lea.vmem %s10801_s6, 18432  ;;  %s8058_s14 = scalar_lea.vmem %s8057_s1, 36864 }
  0xac   : > { %481 = vadd.xlane.f32.xlu0 %v480_v11  ;;  %v488_v20 = vadd.f32 %v487_v12, %v8452_v10  ;;  %v495_v21 = vadd.f32 %v8472_v18, %v8469_v17  ;;  %v8479_v22 = vld [vmem:[%s8409_s25 + $0x1f8] sm:$0xff]  ;;  %v8482_v23 = vld [vmem:[%s8409_s25 + $0x200] sm:$0xff]  ;;  %v8485_v24 = vld [vmem:[%s8409_s25 + $0x1f0] sm:$0xff]  ;;  %p8053_p12 = scmp.ne.s32.totalorder %s10801_s6, %s8052_s27  ;;  %p8059_p4 = scmp.lt.s32.totalorder %s10801_s6, %s8057_s1 }
  0xad   : > { %v8488_v25 = vld [vmem:[%s8409_s25 + $0x210] sm:$0xff]  ;;  %v8491_v26 = vld [vmem:[%s8409_s25 + $0x218] sm:$0xff]  ;;  %v492_v27 = vadd.f32 %v491_v16, %v8464_v15  ;;  %v499_v28 = vadd.f32 %v8482_v23, %v8479_v22  ;;  %v8497_v29 = vld [vmem:[%s8409_s25 + $0x208] sm:$0xff]  ;;  %p8060_p8 = scmp.lt.s32.totalorder %s8058_s14, %s8052_s27 }
  0xae   : > { %489 = vadd.xlane.f32.xlu1 %v488_v20  ;;  %v8500_v30 = vld [vmem:[%s8409_s25 + $0x228] sm:$0xff]  ;;  %v8503_v31 = vld [vmem:[%s8409_s25 + $0x230] sm:$0xff]  ;;  %v496_v32 = vadd.f32 %v495_v21, %v8485_v24  ;;  %v503_v33 = vadd.f32 %v8491_v26, %v8488_v25  ;;  %v8509_v34 = vld [vmem:[%s8409_s25 + $0x220] sm:$0xff]  ;;  %p8054_p1 = pnand %p8053_p12, %p8352_p6 }
  0xaf   : > { %v8512_v35 = vld [vmem:[%s8409_s25] sm:$0xff]  ;;  %v8515_v36 = vld [vmem:[%s8409_s25 + $0x8] sm:$0xff]  ;;  %v500_v37 = vadd.f32 %v499_v28, %v8497_v29  ;;  %v507_v38 = vadd.f32 %v8503_v31, %v8500_v30  ;;  %v8521_v39 = vld [vmem:[%s8409_s25 + $0x238] sm:$0xff]  ;;  %p8061_p0 = por %p8060_p8, %p8059_p4 }
  0xb0   : > { %485 = vadd.xlane.f32.xlu0 %v484_v19  ;;  %v8524_v40 = vld [vmem:[%s8409_s25 + $0x18] sm:$0xff]  ;;  %v8527_v41 = vld [vmem:[%s8409_s25 + $0x20] sm:$0xff]  ;;  %v504_v42 = vadd.f32 %v503_v33, %v8509_v34  ;;  %v415_v43 = vadd.f32 %v8515_v36, %v8512_v35  ;;  %v8533_v44 = vld [vmem:[%s8409_s25 + $0x10] sm:$0xff]  ;;  %p8055_p2 = pneg %p8054_p1 }
  0xb1   : > { %v8536_v45 = vld [vmem:[%s8409_s25 + $0x240] sm:$0xff]  ;;  %v8539_v46 = vld [vmem:[%s8409_s25 + $0x248] sm:$0xff]  ;;  %v508_v47 = vadd.f32 %v507_v38, %v8521_v39  ;;  %v419_v48 = vadd.f32 %v8527_v41, %v8524_v40  ;;  %v8548_v50 = vld [vmem:[%s8409_s25 + $0x258] sm:$0xff] }
  0xb2   : > { %493 = vadd.xlane.f32.xlu1 %v492_v27  ;;  %v8545_v49 = vld [vmem:[%s8409_s25 + $0x28] sm:$0xff]  ;;  %v8551_v51 = vld [vmem:[%s8409_s25 + $0x260] sm:$0xff]  ;;  %v416_v52 = vadd.f32 %v415_v43, %v8533_v44  ;;  %v511_v53 = vadd.f32 %v8539_v46, %v8536_v45  ;;  %v8557_v54 = vld [vmem:[%s8409_s25 + $0x250] sm:$0xff]  ;;  %p8062_p5 = pnand %p8061_p0, %p8055_p2 }
  0xb3   : > { %v8560_v55 = vld [vmem:[%s8409_s25 + $0x30] sm:$0xff]  ;;  %v8563_v56 = vld [vmem:[%s8409_s25 + $0x38] sm:$0xff]  ;;  %v420_v57 = vadd.f32 %v419_v48, %v8545_v49  ;;  %v515_v58 = vadd.f32 %v8551_v51, %v8548_v50  ;;  %v8569_v59 = vld [vmem:[%s8409_s25 + $0x268] sm:$0xff] }
  0xb4   : > { %497 = vadd.xlane.f32.xlu0 %v496_v32  ;;  %11010 = vst [vmem:[#allocation16_spill] sm:$0xff] %v8560_v55  ;;  %11011 = vst [vmem:[#allocation17_spill] sm:$0xff] %v8563_v56  ;;  %v8572_v60 = vld [vmem:[%s8409_s25 + $0x48] sm:$0xff]  ;;  %v8575_v61 = vld [vmem:[%s8409_s25 + $0x50] sm:$0xff]  ;;  %v512_v62 = vadd.f32 %v511_v53, %v8557_v54  ;;  %v423_v63 = vadd.f32 %v8563_v56, %v8560_v55 }
  0xb5   : > { %11012 = vst [vmem:[#allocation18_spill] sm:$0xff] %v8572_v60  ;;  %11013 = vst [vmem:[#allocation19_spill] sm:$0xff] %v8575_v61  ;;  %v8581_v3 = vld [vmem:[%s8409_s25 + $0x40] sm:$0xff]  ;;  %v395_v7 = vld [vmem:[%s8409_s25 + $0x270] sm:$0xff]  ;;  %v516_v12 = vadd.f32 %v515_v58, %v8569_v59  ;;  %v427_v16 = vadd.f32 %v8575_v61, %v8572_v60 }
  0xb6   : > { %501 = vadd.xlane.f32.xlu1 %v500_v37  ;;  %11014 = vst [vmem:[#allocation20_spill] sm:$0xff] %v8581_v3  ;;  %v396_v11 = vld [vmem:[%s8409_s25 + $0x278] sm:$0xff]  ;;  %v398_v20 = vld [vmem:[%s8409_s25 + $0x288] sm:$0xff]  ;;  %v399_v21 = vld [vmem:[%s8409_s25 + $0x290] sm:$0xff]  ;;  %v424_v27 = vadd.f32 %v423_v63, %v8581_v3 }
  0xb7   : > { %v8589_v19 = vld [vmem:[%s8409_s25 + $0x58] sm:$0xff]  ;;  %v519_v28 = vadd.f32 %v396_v11, %v395_v7  ;;  %v8595_v32 = vld [vmem:[%s8409_s25 + $0x280] sm:$0xff]  ;;  %v330_v37 = vld [vmem:[%s8409_s25 + $0x68] sm:$0xff] }
  0xb8   : > { %505 = vadd.xlane.f32.xlu0 %v504_v42  ;;  %11015 = vst [vmem:[#allocation21_spill] sm:$0xff] %v8589_v19  ;;  %11016 = vst [vmem:[#allocation22_spill] sm:$0xff] %v8595_v32  ;;  %v329_v33 = vld [vmem:[%s8409_s25 + $0x60] sm:$0xff]  ;;  %v428_v38 = vadd.f32 %v427_v16, %v8589_v19  ;;  %v523_v42 = vadd.f32 %v399_v21, %v398_v20  ;;  %v400_v43 = vld [vmem:[%s8409_s25 + $0x298] sm:$0xff] }
  0xb9   : > { %v333_v48 = vld [vmem:[%s8409_s25 + $0x80] sm:$0xff]  ;;  %v331_v53 = vld [vmem:[%s8409_s25 + $0x70] sm:$0xff]  ;;  %v402_v63 = vld [vmem:[%s8409_s25 + $0x2a8] sm:$0xff] }
  0xba   : > { %509 = vadd.xlane.f32.xlu1 %v508_v47  ;;  %v332_v47 = vld [vmem:[%s8409_s25 + $0x78] sm:$0xff]  ;;  %v401_v58 = vld [vmem:[%s8409_s25 + $0x2a0] sm:$0xff]  ;;  %v524_v11 = vadd.f32 %v523_v42, %v400_v43  ;;  %v403_v20 = vld [vmem:[%s8409_s25 + $0x2b0] sm:$0xff] }
  0xbb   : > { %v404_v7 = vld [vmem:[%s8409_s25 + $0x2b8] sm:$0xff]  ;;  %v405_v16 = vld [vmem:[%s8409_s25 + $0x2c0] sm:$0xff]  ;;  %v339_v19 = vld [vmem:[%s8409_s25 + $0xb0] sm:$0xff] }
  0xbc   : > { %417 = vadd.xlane.f32.xlu0 %v416_v52  ;;  %v520_v52 = vadd.f32 %v519_v28, %v8595_v32  ;;  %v335_v28 = vld [vmem:[%s8409_s25 + $0x90] sm:$0xff]  ;;  %v338_v32 = vld [vmem:[%s8409_s25 + $0xa8] sm:$0xff]  ;;  %v531_v42 = vadd.f32 %v405_v16, %v404_v7  ;;  %v337_v43 = vld [vmem:[%s8409_s25 + $0xa0] sm:$0xff] }
  0xbd   : > { %v341_v7 = vld [vmem:[%s8409_s25 + $0xc0] sm:$0xff]  ;;  %v342_v16 = vld [vmem:[%s8409_s25 + $0xc8] sm:$0xff]  ;;  %v352_v3 = vld [vmem:[%s8409_s25 + $0x118] sm:$0xff] }
  0xbe   : > { %421 = vadd.xlane.f32.xlu1 %v420_v57  ;;  %v431_v57 = vadd.f32 %v330_v37, %v329_v33  ;;  %v336_v33 = vld [vmem:[%s8409_s25 + $0x98] sm:$0xff]  ;;  %v406_v37 = vld [vmem:[%s8409_s25 + $0x2c8] sm:$0xff]  ;;  %v349_v60 = vld [vmem:[%s8409_s25 + $0x100] sm:$0xff] }
  0xbf   : > { %v357_v56 = vld [vmem:[%s8409_s25 + $0x140] sm:$0xff] }
  0xc0   : > { %513 = vadd.xlane.f32.xlu0 %v512_v62  ;;  %v334_v62 = vld [vmem:[%s8409_s25 + $0x88] sm:$0xff]  ;;  %v432_v21 = vadd.f32 %v431_v57, %v331_v53  ;;  %v439_v53 = vadd.f32 %v336_v33, %v335_v28  ;;  %v340_v57 = vld [vmem:[%s8409_s25 + $0xb8] sm:$0xff]  ;;  %v345_v33 = vld [vmem:[%s8409_s25 + $0xe0] sm:$0xff] }
  0xc1   : > { %v344_v28 = vld [vmem:[%s8409_s25 + $0xd8] sm:$0xff] }
  0xc2   : > { %517 = vadd.xlane.f32.xlu1 %v516_v12  ;;  %v435_v12 = vadd.f32 %v333_v48, %v332_v47  ;;  %v407_v47 = vld [vmem:[%s8409_s25 + $0x2d0] sm:$0xff]  ;;  %v408_v48 = vld [vmem:[%s8409_s25 + $0x2d8] sm:$0xff] }
  0xc4   : > { %425 = vadd.xlane.f32.xlu0 %v424_v27  ;;  %v527_v27 = vadd.f32 %v402_v63, %v401_v58  ;;  %v410_v58 = vld [vmem:[%s8409_s25 + $0x2e8] sm:$0xff]  ;;  %v411_v63 = vld [vmem:[%s8409_s25 + $0x2f0] sm:$0xff] }
  0xc6   : > { %429 = vadd.xlane.f32.xlu1 %v428_v38  ;;  %v436_v38 = vadd.f32 %v435_v12, %v334_v62  ;;  %v443_v62 = vadd.f32 %v339_v19, %v338_v32  ;;  %v409_v12 = vld [vmem:[%s8409_s25 + $0x2e0] sm:$0xff]  ;;  %v347_v19 = vld [vmem:[%s8409_s25 + $0xf0] sm:$0xff]  ;;  %v348_v32 = vld [vmem:[%s8409_s25 + $0xf8] sm:$0xff] }
  0xc8   : > { %521 = vadd.xlane.f32.xlu0 %v520_v52  ;;  %v528_v52 = vadd.f32 %v527_v27, %v403_v20  ;;  %v535_v20 = vadd.f32 %v408_v48, %v407_v47  ;;  %v412_v27 = vld [vmem:[%s8409_s25 + $0x2f8] sm:$0xff]  ;;  %v350_v47 = vld [vmem:[%s8409_s25 + $0x108] sm:$0xff]  ;;  %v351_v48 = vld [vmem:[%s8409_s25 + $0x110] sm:$0xff] }
  0xca   : > { %525 = vadd.xlane.f32.xlu1 %v524_v11  ;;  %v532_v11 = vadd.f32 %v531_v42, %v406_v37  ;;  %v539_v37 = vadd.f32 %v411_v63, %v410_v58  ;;  %v343_v42 = vld [vmem:[%s8409_s25 + $0xd0] sm:$0xff]  ;;  %v354_v58 = vld [vmem:[%s8409_s25 + $0x128] sm:$0xff] }
  0xcc   : > { %433 = vadd.xlane.f32.xlu0 %v432_v21  ;;  %v440_v21 = vadd.f32 %v439_v53, %v337_v43  ;;  %v447_v43 = vadd.f32 %v342_v16, %v341_v7  ;;  %v346_v53 = vld [vmem:[%s8409_s25 + $0xe8] sm:$0xff]  ;;  %v540_v61 = vadd.f32 %v539_v37, %v412_v27  ;;  %v459_v7 = vadd.f32 %v351_v48, %v350_v47  ;;  %v355_v16 = vld [vmem:[%s8409_s25 + $0x130] sm:$0xff]  ;;  %v8649_v48 = vld [vmem:[%s8409_s25 + $0x158] sm:$0xff] }
  0xcd   : > { %v8646_v47 = vld [vmem:[%s8409_s25 + $0x150] sm:$0xff] }
  0xce   : > { %437 = vadd.xlane.f32.xlu1 %v436_v38  ;;  %v444_v38 = vadd.f32 %v443_v62, %v340_v57  ;;  %v353_v57 = vld [vmem:[%s8409_s25 + $0x120] sm:$0xff]  ;;  %v448_v63 = vadd.f32 %v447_v43, %v343_v42  ;;  %v455_v62 = vadd.f32 %v348_v32, %v347_v19  ;;  %v460_v27 = vadd.f32 %v459_v7, %v352_v3  ;;  %v7470_v42 = vld [vmem:[#allocation8 + $0x4] ss:$36 sps:$4 sm:$0xff]   ;;  %v7473_v32 = vld [vmem:[#allocation8 + $0x4c] ss:$36 sps:$4 sm:$0xff]  }
  0xcf   : > { %v463_v55 = vadd.f32 %v354_v58, %v353_v57  ;;  %v7472_v19 = vld [vmem:[#allocation8] ss:$36 sps:$4 sm:$0xff]   ;;  %2753 = vmatprep.subr.bf16.mxu0 %v7470_v42  ;;  %v8655_v57 = vld [vmem:[%s8409_s25 + $0x170] sm:$0xff] }
  0xd0   : > { %529 = vadd.xlane.f32.xlu0 %v528_v52  ;;  %v536_v52 = vadd.f32 %v535_v20, %v409_v12  ;;  %v456_v20 = vadd.f32 %v455_v62, %v349_v60  ;;  %v7483_v43 = vld [vmem:[#allocation8 + $0x480] ss:$36 sps:$4 sm:$0xff]   ;;  %2754 = vmatpush1.bf16.msra.mxu0 %v7472_v19  ;;  %v7476_v60 = vld [vmem:[#allocation8 + $0x94] ss:$36 sps:$4 sm:$0xff]  }
  0xd1   : > { %2755 = vmatprep.subr.bf16.mxu0 %v7473_v32  ;;  %v7481_v3 = vld [vmem:[#allocation8 + $0xdc] ss:$36 sps:$4 sm:$0xff]  }
  0xd2   : > { %533 = vadd.xlane.f32.xlu1 %v532_v11  ;;  %v451_v11 = vadd.f32 %v345_v33, %v344_v28  ;;  %v464_v33 = vadd.f32 %v463_v55, %v355_v16  ;;  %v7478_v55 = vld [vmem:[#allocation8 + $0x90] ss:$36 sps:$4 sm:$0xff]  }
  0xd4   : > { %441 = vadd.xlane.f32.xlu0 %v440_v21  ;;  %v356_v21 = vld [vmem:[%s8409_s25 + $0x138] sm:$0xff]  ;;  %v452_v12 = vadd.f32 %v451_v11, %v346_v53  ;;  %v7484_v53 = vld [vmem:[#allocation8 + $0xd8] ss:$36 sps:$4 sm:$0xff]   ;;  %v8652_v11 = vld [vmem:[%s8409_s25 + $0x168] sm:$0xff] }
  0xd5   : > { %v467_v28 = vadd.f32 %v357_v56, %v356_v21  ;;  %v7485_v56 = vld [vmem:[#allocation8 + $0x4cc] ss:$36 sps:$4 sm:$0xff]   ;;  %v8660_v21 = vld [vmem:[%s8409_s25 + $0x160] sm:$0xff]  ;;  %v475_v7 = vadd.f32 %v8655_v57, %v8652_v11 }
  0xd6   : > { %445 = vadd.xlane.f32.xlu1 %v444_v38  ;;  %v358_v38 = vld [vmem:[%s8409_s25 + $0x148] sm:$0xff] }
  0xd7   : > { %v468_v37 = vadd.f32 %v467_v28, %v358_v38  ;;  %v8674_v28 = vld [vmem:[%s8409_s25 + $0x178] sm:$0xff] }
  0xd8   : > { %537 = vadd.xlane.f32.xlu0 %v536_v52  ;;  %v8642_v52 = vld [vmem:[#allocation8 + $0x484] ss:$36 sps:$4 sm:$0xff]  }
  0xd9   : > { %6811 = vmatprep.subr.bf16.mxu1 %v8642_v52 }
  0xda   : > { %541 = vadd.xlane.f32.xlu1 %v540_v61  ;;  %v7475_v61 = vld [vmem:[#allocation8 + $0x48] ss:$36 sps:$4 sm:$0xff]   ;;  %6819 = vmatpush1.bf16.msra.mxu1 %v7483_v43 }
  0xdb   : > { %6812 = vmatprep.subr.bf16.mxu1 %v7485_v56  ;;  %2756 = vmatpush1.bf16.msra.mxu0 %v7475_v61 }
  0xdc   : > { %449 = vadd.xlane.f32.xlu0 %v448_v63  ;;  %2757 = vmatprep.subr.bf16.mxu0 %v7476_v60  ;;  %v471_v63 = vadd.f32 %v8649_v48, %v8646_v47  ;;  %v476_v60 = vadd.f32 %v475_v7, %v8674_v28 }
  0xde   : > { %453 = vadd.xlane.f32.xlu1 %v452_v12 }
  0xdf   : > { %2758 = vmatpush1.bf16.msra.mxu0 %v7478_v55 }
  0xe0   : > { %457 = vadd.xlane.f32.xlu0 %v456_v20  ;;  %2759 = vmatprep.subr.bf16.mxu0 %v7481_v3 }
  0xe2   : > { %461 = vadd.xlane.f32.xlu1 %v460_v27 }
  0xe3   : > { %2760 = vmatpush1.bf16.msra.mxu0 %v7484_v53 }
  0xe4   : > { %465 = vadd.xlane.f32.xlu0 %v464_v33 }
  0xe6   : > { %469 = vadd.xlane.f32.xlu1 %v468_v37  ;;  %v472_v37 = vadd.f32 %v471_v63, %v8660_v21 }
 0x139   : > { %v482_v58 = vpop.xlane.xlu0 %481 }
 0x13a   : > { %v560_v62 = vmul.f32 0.0026041667, %v482_v58 }
 0x13b   : > { %v490_v12 = vpop.xlane.xlu1 %489 }
 0x13c   : > { %v8665_v16 = vsub.f32 %v8424_v0, %v560_v62  ;;  %v8668_v20 = vsub.f32 %v8427_v1, %v560_v62  ;;  %v8671_v38 = vsub.f32 %v8430_v2, %v560_v62  ;;  %v562_v27 = vmul.f32 0.0026041667, %v490_v12 }
 0x13d   : > { %v486_v33 = vpop.xlane.xlu0 %485 }
 0x13e   : > { %v561_v42 = vmul.f32 0.0026041667, %v486_v33  ;;  %v8678_v19 = vsub.f32 %v8446_v8, %v562_v27  ;;  %v8681_v32 = vsub.f32 %v8449_v9, %v562_v27  ;;  %v8684_v0 = vsub.f32 %v8452_v10, %v562_v27 }
 0x13f   : > { %v720_v1 = vmul.f32 %v8665_v16, %v8665_v16  ;;  %v721_v2 = vmul.f32 %v8668_v20, %v8668_v20  ;;  %v722_v61 = vmul.f32 %v8671_v38, %v8671_v38  ;;  %v494_v43 = vpop.xlane.xlu1 %493 }
 0x140   : > { %v8694_v8 = vsub.f32 %v8435_v4, %v561_v42  ;;  %v8697_v9 = vsub.f32 %v8438_v5, %v561_v42  ;;  %v8700_v10 = vsub.f32 %v8441_v6, %v561_v42  ;;  %v563_v56 = vmul.f32 0.0026041667, %v494_v43 }
 0x141   : > { %v832_v55 = vadd.f32 %v721_v2, %v720_v1  ;;  %v498_v3 = vpop.xlane.xlu0 %497  ;;  %v726_v53 = vmul.f32 %v8678_v19, %v8678_v19  ;;  %v727_v58 = vmul.f32 %v8681_v32, %v8681_v32  ;;  %v728_v63 = vmul.f32 %v8684_v0, %v8684_v0 }
 0x142   : > { %v8709_v4 = vsub.f32 %v8458_v13, %v563_v56  ;;  %v8712_v5 = vsub.f32 %v8461_v14, %v563_v56  ;;  %v8715_v6 = vsub.f32 %v8464_v15, %v563_v56  ;;  %v564_v62 = vmul.f32 0.0026041667, %v498_v3 }
 0x143   : > { %v833_v12 = vadd.f32 %v832_v55, %v722_v61  ;;  %v723_v7 = vmul.f32 %v8694_v8, %v8694_v8  ;;  %v724_v27 = vmul.f32 %v8697_v9, %v8697_v9  ;;  %v725_v33 = vmul.f32 %v8700_v10, %v8700_v10  ;;  %v502_v42 = vpop.xlane.xlu1 %501 }
 0x144   : > { %v8724_v13 = vsub.f32 %v8469_v17, %v564_v62  ;;  %v8727_v14 = vsub.f32 %v8472_v18, %v564_v62  ;;  %v8730_v15 = vsub.f32 %v8485_v24, %v564_v62  ;;  %v565_v1 = vmul.f32 0.0026041667, %v502_v42 }
 0x145   : > { %834 = vadd.xlane.f32.xlu0 %v833_v12  ;;  %v836_v2 = vadd.f32 %v724_v27, %v723_v7  ;;  %v506_v61 = vpop.xlane.xlu0 %505  ;;  %v840_v43 = vadd.f32 %v727_v58, %v726_v53  ;;  %v729_v56 = vmul.f32 %v8709_v4, %v8709_v4  ;;  %v730_v55 = vmul.f32 %v8712_v5, %v8712_v5 }
 0x146   : > { %11017 = vst [vmem:[#allocation23_spill] sm:$0xff] %v8724_v13  ;;  %11018 = vst [vmem:[#allocation24_spill] sm:$0xff] %v8727_v14  ;;  %v8737_v17 = vsub.f32 %v8479_v22, %v565_v1  ;;  %v8740_v18 = vsub.f32 %v8482_v23, %v565_v1  ;;  %v8743_v24 = vsub.f32 %v8497_v29, %v565_v1  ;;  %v566_v3 = vmul.f32 0.0026041667, %v506_v61 }
 0x147   : > { %v837_v62 = vadd.f32 %v836_v2, %v725_v33  ;;  %v841_v12 = vadd.f32 %v840_v43, %v728_v63  ;;  %v510_v7 = vpop.xlane.xlu1 %509  ;;  %v731_v53 = vmul.f32 %v8715_v6, %v8715_v6  ;;  %v844_v58 = vadd.f32 %v730_v55, %v729_v56 }
 0x148   : > { %11019 = vst [vmem:[#allocation25_spill] sm:$0xff] %v8737_v17  ;;  %11020 = vst [vmem:[#allocation26_spill] sm:$0xff] %v8740_v18  ;;  %v8748_v27 = vsub.f32 %v8488_v25, %v566_v3  ;;  %v8751_v22 = vsub.f32 %v8491_v26, %v566_v3  ;;  %v8754_v23 = vsub.f32 %v8509_v34, %v566_v3  ;;  %v567_v42 = vmul.f32 0.0026041667, %v510_v7 }
 0x149   : > { %838 = vadd.xlane.f32.xlu1 %v837_v62  ;;  %473 = vadd.xlane.f32.xlu0 %v472_v37  ;;  %v418_v29 = vpop.xlane.xlu0 %417  ;;  %v845_v33 = vadd.f32 %v844_v58, %v731_v53  ;;  %v732_v63 = vmul.f32 %v8724_v13, %v8724_v13  ;;  %v733_v1 = vmul.f32 %v8727_v14, %v8727_v14 }
 0x14a   : > { %11021 = vst [vmem:[#allocation27_spill] sm:$0xff] %v8748_v27  ;;  %11022 = vst [vmem:[#allocation28_spill] sm:$0xff] %v8751_v22  ;;  %v8761_v25 = vsub.f32 %v8500_v30, %v567_v42  ;;  %v8764_v26 = vsub.f32 %v8503_v31, %v567_v42  ;;  %v8767_v34 = vsub.f32 %v8521_v39, %v567_v42  ;;  %v544_v2 = vmul.f32 0.0026041667, %v418_v29 }
 0x14b   : > { %v734_v37 = vmul.f32 %v8730_v15, %v8730_v15  ;;  %v848_v61 = vadd.f32 %v733_v1, %v732_v63  ;;  %v422_v43 = vpop.xlane.xlu1 %421  ;;  %v735_v56 = vmul.f32 %v8737_v17, %v8737_v17  ;;  %v736_v55 = vmul.f32 %v8740_v18, %v8740_v18  ;;  %v7851_v18 = vld [vmem:[%s8409_s25 + $0x60] sm:$0xff] }
 0x14c   : > { %11023 = vst [vmem:[#allocation29_spill] sm:$0xff] %v8761_v25  ;;  %11024 = vst [vmem:[#allocation30_spill] sm:$0xff] %v8764_v26  ;;  %v8776_v30 = vsub.f32 %v8512_v35, %v544_v2  ;;  %v8779_v31 = vsub.f32 %v8515_v36, %v544_v2  ;;  %v8782_v39 = vsub.f32 %v8533_v44, %v544_v2  ;;  %v545_v3 = vmul.f32 0.0026041667, %v422_v43 }
 0x14d   : > { %477 = vadd.xlane.f32.xlu1 %v476_v60  ;;  %842 = vadd.xlane.f32.xlu0 %v841_v12  ;;  %v849_v62 = vadd.f32 %v848_v61, %v734_v37  ;;  %v514_v7 = vpop.xlane.xlu0 %513  ;;  %v737_v53 = vmul.f32 %v8743_v24, %v8743_v24  ;;  %v852_v58 = vadd.f32 %v736_v55, %v735_v56 }
 0x14e   : > { %11025 = vst [vmem:[#allocation31_spill] sm:$0xff] %v8782_v39  ;;  %v8787_v42 = vsub.f32 %v8524_v40, %v545_v3  ;;  %v8790_v35 = vsub.f32 %v8527_v41, %v545_v3  ;;  %v8793_v36 = vsub.f32 %v8545_v49, %v545_v3  ;;  %v568_v44 = vmul.f32 0.0026041667, %v514_v7 }
 0x14f   : > { %v853_v29 = vadd.f32 %v852_v58, %v737_v53  ;;  %v738_v60 = vmul.f32 %v8748_v27, %v8748_v27  ;;  %v739_v12 = vmul.f32 %v8751_v22, %v8751_v22  ;;  %v740_v63 = vmul.f32 %v8754_v23, %v8754_v23  ;;  %v518_v1 = vpop.xlane.xlu1 %517  ;;  %v11033_v58 = vld [vmem:[#allocation16_spill] sm:$0xff] }
 0x150   : > { %11026 = vst [vmem:[#allocation32_spill] sm:$0xff] %v8793_v36  ;;  %v8802_v40 = vsub.f32 %v8536_v45, %v568_v44  ;;  %v8805_v41 = vsub.f32 %v8539_v46, %v568_v44  ;;  %v8808_v49 = vsub.f32 %v8557_v54, %v568_v44  ;;  %v569_v2 = vmul.f32 0.0026041667, %v518_v1  ;;  %v7847_v22 = vld [vmem:[%s8409_s25 + $0x278] sm:$0xff] }
 0x151   : > { %846 = vadd.xlane.f32.xlu1 %v845_v33  ;;  %850 = vadd.xlane.f32.xlu0 %v849_v62  ;;  %v856_v37 = vadd.f32 %v739_v12, %v738_v60  ;;  %v426_v61 = vpop.xlane.xlu0 %425  ;;  %v741_v43 = vmul.f32 %v8761_v25, %v8761_v25  ;;  %v742_v56 = vmul.f32 %v8764_v26, %v8764_v26  ;;  %v7491_v25 = vld [vmem:[#allocation8 + $0x514] ss:$36 sps:$4 sm:$0xff]   ;;  %v7846_v26 = vld [vmem:[%s8409_s25 + $0x270] sm:$0xff] }
 0x152   : > { %11027 = vst [vmem:[#allocation33_spill] sm:$0xff] %v8802_v40  ;;  %11028 = vst [vmem:[#allocation34_spill] sm:$0xff] %v8805_v41  ;;  %v8815_v45 = vsub.f32 %v8548_v50, %v569_v2  ;;  %v8818_v46 = vsub.f32 %v8551_v51, %v569_v2  ;;  %v8821_v54 = vsub.f32 %v8569_v59, %v569_v2  ;;  %v546_v55 = vmul.f32 0.0026041667, %v426_v61  ;;  %v11035_v50 = vld [vmem:[#allocation17_spill] sm:$0xff]  ;;  %v11037_v51 = vld [vmem:[#allocation20_spill] sm:$0xff] }
 0x153   : > { %11029 = vst [vmem:[#allocation35_spill] sm:$0xff] %v8808_v49  ;;  %v857_v33 = vadd.f32 %v856_v37, %v740_v63  ;;  %v743_v3 = vmul.f32 %v8767_v34, %v8767_v34  ;;  %v860_v62 = vadd.f32 %v742_v56, %v741_v43  ;;  %v672_v7 = vmul.f32 %v8776_v30, %v8776_v30  ;;  %v430_v53 = vpop.xlane.xlu1 %429 }
 0x154   : > { %11030 = vst [vmem:[#allocation36_spill] sm:$0xff] %v8815_v45  ;;  %11031 = vst [vmem:[#allocation37_spill] sm:$0xff] %v8818_v46  ;;  %v8828_v44 = vsub.f32 %v11033_v58, %v546_v55  ;;  %v8831_v60 = vsub.f32 %v11035_v50, %v546_v55  ;;  %v8834_v12 = vsub.f32 %v11037_v51, %v546_v55  ;;  %v547_v2 = vmul.f32 0.0026041667, %v430_v53  ;;  %v11041_v53 = vld [vmem:[#allocation19_spill] sm:$0xff]  ;;  %v11043_v51 = vld [vmem:[#allocation21_spill] sm:$0xff] }
 0x155   : > { %11032 = vst [vmem:[#allocation38_spill] sm:$0xff] %v8821_v54  ;;  %v673_v59 = vmul.f32 %v8779_v31, %v8779_v31  ;;  %854 = vadd.xlane.f32.xlu1 %v853_v29  ;;  %858 = vadd.xlane.f32.xlu0 %v857_v33  ;;  %v861_v63 = vadd.f32 %v860_v62, %v743_v3  ;;  %v522_v37 = vpop.xlane.xlu0 %521  ;;  %v7487_v33 = vld [vmem:[#allocation8 + $0x124] ss:$36 sps:$4 sm:$0xff]   ;;  %v11039_v62 = vld [vmem:[#allocation18_spill] sm:$0xff] }
 0x156   : > { %11034 = vst [vmem:[#allocation16_spill] sm:$0xff] %v8828_v44  ;;  %11036 = vst [vmem:[#allocation17_spill] sm:$0xff] %v8831_v60  ;;  %v674_v1 = vmul.f32 %v8782_v39, %v8782_v39  ;;  %v675_v61 = vmul.f32 %v8787_v42, %v8787_v42  ;;  %v570_v56 = vmul.f32 0.0026041667, %v522_v37  ;;  %v676_v55 = vmul.f32 %v8790_v35, %v8790_v35  ;;  %v7489_v3 = vld [vmem:[#allocation8 + $0x4c8] ss:$36 sps:$4 sm:$0xff]  }
 0x157   : > { %11038 = vst [vmem:[#allocation20_spill] sm:$0xff] %v8834_v12  ;;  %v768_v43 = vadd.f32 %v673_v59, %v672_v7  ;;  %v677_v29 = vmul.f32 %v8793_v36, %v8793_v36  ;;  %v8847_v58 = vsub.f32 %v11039_v62, %v547_v2  ;;  %v8850_v50 = vsub.f32 %v11041_v53, %v547_v2  ;;  %v526_v59 = vpop.xlane.xlu1 %525  ;;  %v7490_v37 = vld [vmem:[#allocation8 + $0x120] ss:$36 sps:$4 sm:$0xff]  }
 0x158   : > { %v8853_v39 = vsub.f32 %v11043_v51, %v547_v2  ;;  %v744_v7 = vmul.f32 %v8802_v40, %v8802_v40  ;;  %v8858_v36 = vsub.f32 %v7846_v26, %v570_v56  ;;  %v8861_v17 = vsub.f32 %v7847_v22, %v570_v56  ;;  %v11047_v62 = vld [vmem:[#allocation22_spill] sm:$0xff]  ;;  %2761 = vmatprep.subr.bf16.mxu0 %v7487_v33  ;;  %v7496_v40 = vld [vmem:[#allocation8 + $0x168] ss:$36 sps:$4 sm:$0xff]  }
 0x159   : > { %11040 = vst [vmem:[#allocation18_spill] sm:$0xff] %v8847_v58  ;;  %11042 = vst [vmem:[#allocation19_spill] sm:$0xff] %v8850_v50  ;;  %v769_v27 = vadd.f32 %v768_v43, %v674_v1  ;;  %v8864_v13 = vsub.f32 %v11047_v62, %v570_v56  ;;  %862 = vadd.xlane.f32.xlu1 %v861_v63  ;;  %v772_v2 = vadd.f32 %v676_v55, %v675_v61  ;;  %v434_v26 = vpop.xlane.xlu0 %433  ;;  %v7493_v56 = vld [vmem:[#allocation8 + $0x16c] ss:$36 sps:$4 sm:$0xff]  }
 0x15a   : > { %11044 = vst [vmem:[#allocation21_spill] sm:$0xff] %v8853_v39  ;;  %11045 = vst [vmem:[#allocation39_spill] sm:$0xff] %v8858_v36  ;;  %v745_v53 = vmul.f32 %v8805_v41, %v8805_v41  ;;  %v746_v51 = vmul.f32 %v8808_v49, %v8808_v49  ;;  %v571_v1 = vmul.f32 0.0026041667, %v526_v59  ;;  %6820 = vmatpush1.bf16.msra.mxu1 %v7489_v3  ;;  %v548_v22 = vmul.f32 0.0026041667, %v434_v26 }
 0x15b   : > { %11046 = vst [vmem:[#allocation40_spill] sm:$0xff] %v8861_v17  ;;  %11048 = vst [vmem:[#allocation22_spill] sm:$0xff] %v8864_v13  ;;  %770 = vadd.xlane.f32.xlu0 %v769_v27  ;;  %v747_v43 = vmul.f32 %v8815_v45, %v8815_v45  ;;  %v748_v63 = vmul.f32 %v8818_v46, %v8818_v46  ;;  %v749_v61 = vmul.f32 %v8821_v54, %v8821_v54  ;;  %v7495_v55 = vld [vmem:[#allocation8 + $0x510] ss:$36 sps:$4 sm:$0xff]   ;;  %v7848_v27 = vld [vmem:[%s8409_s25 + $0x288] sm:$0xff]  ;;  %v438_v45 = vpop.xlane.xlu1 %437 }
 0x15c   : > { %2762 = vmatpush1.bf16.msra.mxu0 %v7490_v37  ;;  %v773_v33 = vadd.f32 %v772_v2, %v677_v29  ;;  %v864_v3 = vadd.f32 %v745_v53, %v744_v7  ;;  %v8877_v59 = vsub.f32 %v7848_v27, %v571_v1  ;;  %v7849_v62 = vld [vmem:[%s8409_s25 + $0x290] sm:$0xff]  ;;  %6813 = vmatprep.subr.bf16.mxu1 %v7491_v25  ;;  %v7850_v46 = vld [vmem:[%s8409_s25 + $0x298] sm:$0xff]  ;;  %v7852_v54 = vld [vmem:[%s8409_s25 + $0x68] sm:$0xff] }
 0x15d   : > { %v8880_v26 = vsub.f32 %v7849_v62, %v571_v1  ;;  %v8883_v41 = vsub.f32 %v7850_v46, %v571_v1  ;;  %v8886_v37 = vsub.f32 %v7851_v18, %v548_v22  ;;  %v8889_v14 = vsub.f32 %v7852_v54, %v548_v22  ;;  %v7853_v29 = vld [vmem:[%s8409_s25 + $0x70] sm:$0xff]  ;;  %2763 = vmatprep.subr.bf16.mxu0 %v7493_v56  ;;  %v7497_v2 = vld [vmem:[#allocation8 + $0x55c] ss:$36 sps:$4 sm:$0xff]   ;;  %v530_v1 = vpop.xlane.xlu0 %529 }
 0x15e   : > { %11049 = vst [vmem:[#allocation41_spill] sm:$0xff] %v8877_v59  ;;  %v8892_v7 = vsub.f32 %v7853_v29, %v548_v22  ;;  %774 = vadd.xlane.f32.xlu1 %v773_v33  ;;  %v865_v53 = vadd.f32 %v864_v3, %v746_v51  ;;  %v868_v27 = vadd.f32 %v748_v63, %v747_v43  ;;  %v549_v54 = vmul.f32 0.0026041667, %v438_v45  ;;  %v7499_v51 = vld [vmem:[#allocation8 + $0x1b4] ss:$36 sps:$4 sm:$0xff]  }
 0x15f   : > { %11050 = vst [vmem:[#allocation42_spill] sm:$0xff] %v8880_v26  ;;  %11051 = vst [vmem:[#allocation43_spill] sm:$0xff] %v8883_v41  ;;  %v678_v25 = vmul.f32 %v8828_v44, %v8828_v44  ;;  %v679_v46 = vmul.f32 %v8831_v60, %v8831_v60  ;;  %v680_v18 = vmul.f32 %v8834_v12, %v8834_v12  ;;  %v572_v22 = vmul.f32 0.0026041667, %v530_v1  ;;  %v534_v45 = vpop.xlane.xlu1 %533  ;;  %v7501_v62 = vld [vmem:[#allocation8 + $0x558] ss:$36 sps:$4 sm:$0xff]  }
 0x160   : > { %11052 = vst [vmem:[#allocation44_spill] sm:$0xff] %v8886_v37  ;;  %11053 = vst [vmem:[#allocation45_spill] sm:$0xff] %v8889_v14  ;;  %v681_v56 = vmul.f32 %v8847_v58, %v8847_v58  ;;  %6821 = vmatpush1.bf16.msra.mxu1 %v7495_v55  ;;  %2764 = vmatpush1.bf16.msra.mxu0 %v7496_v40  ;;  %v869_v43 = vadd.f32 %v868_v27, %v749_v61  ;;  %v7502_v29 = vld [vmem:[#allocation8 + $0x1b0] ss:$36 sps:$4 sm:$0xff]   ;;  %v7855_v40 = vld [vmem:[%s8409_s25 + $0x80] sm:$0xff] }
 0x161   : > { %11054 = vst [vmem:[#allocation46_spill] sm:$0xff] %v8892_v7  ;;  %866 = vadd.xlane.f32.xlu0 %v865_v53  ;;  %v776_v63 = vadd.f32 %v679_v46, %v678_v25  ;;  %v682_v33 = vmul.f32 %v8850_v50, %v8850_v50  ;;  %v683_v3 = vmul.f32 %v8853_v39, %v8853_v39  ;;  %v7854_v1 = vld [vmem:[%s8409_s25 + $0x78] sm:$0xff]  ;;  %v7856_v53 = vld [vmem:[%s8409_s25 + $0x88] sm:$0xff]  ;;  %v7857_v27 = vld [vmem:[%s8409_s25 + $0x2a0] sm:$0xff]  ;;  %v442_v49 = vpop.xlane.xlu0 %441 }
 0x162   : > { %v8907_v12 = vsub.f32 %v7854_v1, %v549_v54  ;;  %v8910_v55 = vsub.f32 %v7855_v40, %v549_v54  ;;  %v8913_v61 = vsub.f32 %v7856_v53, %v549_v54  ;;  %v8916_v25 = vsub.f32 %v7857_v27, %v572_v22  ;;  %6814 = vmatprep.subr.bf16.mxu1 %v7497_v2  ;;  %v7503_v46 = vld [vmem:[#allocation8 + $0x5a4] ss:$36 sps:$4 sm:$0xff]  }
 0x163   : > { %870 = vadd.xlane.f32.xlu1 %v869_v43  ;;  %v777_v39 = vadd.f32 %v776_v63, %v680_v18  ;;  %v7858_v58 = vld [vmem:[%s8409_s25 + $0x2a8] sm:$0xff]  ;;  %v7859_v44 = vld [vmem:[%s8409_s25 + $0x2b0] sm:$0xff]  ;;  %v780_v1 = vadd.f32 %v682_v33, %v681_v56  ;;  %v750_v40 = vmul.f32 %v8858_v36, %v8858_v36  ;;  %v751_v54 = vmul.f32 %v8861_v17, %v8861_v17  ;;  %v446_v63 = vpop.xlane.xlu1 %445  ;;  %v7864_v36 = vld [vmem:[%s8409_s25 + $0x98] sm:$0xff] }
 0x164   : > { %11055 = vst [vmem:[#allocation47_spill] sm:$0xff] %v8907_v12  ;;  %11056 = vst [vmem:[#allocation48_spill] sm:$0xff] %v8910_v55  ;;  %v8919_v50 = vsub.f32 %v7858_v58, %v572_v22  ;;  %v8922_v60 = vsub.f32 %v7859_v44, %v572_v22  ;;  %v752_v2 = vmul.f32 %v8864_v13, %v8864_v13  ;;  %v573_v43 = vmul.f32 0.0026041667, %v534_v45  ;;  %v7505_v58 = vld [vmem:[#allocation8 + $0x1fc] ss:$36 sps:$4 sm:$0xff]  }
 0x165   : > { %11057 = vst [vmem:[#allocation49_spill] sm:$0xff] %v8913_v61  ;;  %11058 = vst [vmem:[#allocation50_spill] sm:$0xff] %v8916_v25  ;;  %2765 = vmatprep.subr.bf16.mxu0 %v7499_v51  ;;  %6822 = vmatpush1.bf16.msra.mxu1 %v7501_v62  ;;  %v781_v44 = vadd.f32 %v780_v1, %v683_v3  ;;  %v550_v18 = vmul.f32 0.0026041667, %v442_v49  ;;  %v753_v22 = vmul.f32 %v8877_v59, %v8877_v59  ;;  %v7507_v33 = vld [vmem:[#allocation8 + $0x5a0] ss:$36 sps:$4 sm:$0xff]  }
 0x166   : > { %11059 = vst [vmem:[#allocation51_spill] sm:$0xff] %v8919_v50  ;;  %11060 = vst [vmem:[#allocation52_spill] sm:$0xff] %v8922_v60  ;;  %778 = vadd.xlane.f32.xlu0 %v777_v39  ;;  %v754_v56 = vmul.f32 %v8880_v26, %v8880_v26  ;;  %2766 = vmatpush1.bf16.msra.mxu0 %v7502_v29  ;;  %v7508_v45 = vld [vmem:[#allocation8 + $0x1f8] ss:$36 sps:$4 sm:$0xff]   ;;  %v872_v51 = vadd.f32 %v751_v54, %v750_v40  ;;  %v7860_v62 = vld [vmem:[%s8409_s25 + $0x2b8] sm:$0xff]  ;;  %v538_v54 = vpop.xlane.xlu0 %537 }
 0x167   : > { %v8935_v53 = vsub.f32 %v7860_v62, %v573_v43  ;;  %v7861_v39 = vld [vmem:[%s8409_s25 + $0x2c0] sm:$0xff]  ;;  %v7862_v49 = vld [vmem:[%s8409_s25 + $0x2c8] sm:$0xff]  ;;  %6815 = vmatprep.subr.bf16.mxu1 %v7503_v46  ;;  %782 = vadd.xlane.f32.xlu1 %v781_v44  ;;  %v7863_v1 = vld [vmem:[%s8409_s25 + $0x90] sm:$0xff]  ;;  %v8947_v29 = vsub.f32 %v7864_v36, %v550_v18  ;;  %v755_v40 = vmul.f32 %v8883_v41, %v8883_v41  ;;  %v551_v44 = vmul.f32 0.0026041667, %v446_v63 }
 0x168   : > { %v8938_v3 = vsub.f32 %v7861_v39, %v573_v43  ;;  %v8941_v27 = vsub.f32 %v7862_v49, %v573_v43  ;;  %v8944_v59 = vsub.f32 %v7863_v1, %v550_v18  ;;  %v7865_v26 = vld [vmem:[%s8409_s25 + $0xa0] sm:$0xff]  ;;  %v7509_v62 = vld [vmem:[#allocation8 + $0x5ec] ss:$36 sps:$4 sm:$0xff]   ;;  %v873_v39 = vadd.f32 %v872_v51, %v752_v2  ;;  %2767 = vmatprep.subr.bf16.mxu0 %v7505_v58  ;;  %v7511_v36 = vld [vmem:[#allocation8 + $0x244] ss:$36 sps:$4 sm:$0xff]  }
 0x169   : > { %11061 = vst [vmem:[#allocation53_spill] sm:$0xff] %v8935_v53  ;;  %11065 = vst [vmem:[#allocation57_spill] sm:$0xff] %v8947_v29  ;;  %v8950_v17 = vsub.f32 %v7865_v26, %v550_v18  ;;  %v876_v13 = vadd.f32 %v754_v56, %v753_v22  ;;  %v684_v46 = vmul.f32 %v8886_v37, %v8886_v37  ;;  %v574_v18 = vmul.f32 0.0026041667, %v538_v54  ;;  %v542_v22 = vpop.xlane.xlu1 %541  ;;  %v7513_v56 = vld [vmem:[#allocation8 + $0x5e8] ss:$36 sps:$4 sm:$0xff]  }
 0x16a   : > { %11062 = vst [vmem:[#allocation54_spill] sm:$0xff] %v8938_v3  ;;  %11063 = vst [vmem:[#allocation55_spill] sm:$0xff] %v8941_v27  ;;  %v685_v43 = vmul.f32 %v8889_v14, %v8889_v14  ;;  %v686_v26 = vmul.f32 %v8892_v7, %v8892_v7  ;;  %v687_v2 = vmul.f32 %v8907_v12, %v8907_v12  ;;  %6823 = vmatpush1.bf16.msra.mxu1 %v7507_v33  ;;  %v7514_v1 = vld [vmem:[#allocation8 + $0x240] ss:$36 sps:$4 sm:$0xff]   ;;  %v7867_v12 = vld [vmem:[%s8409_s25 + $0xb0] sm:$0xff] }
 0x16b   : > { %11064 = vst [vmem:[#allocation56_spill] sm:$0xff] %v8944_v59  ;;  %11066 = vst [vmem:[#allocation58_spill] sm:$0xff] %v8950_v17  ;;  %2768 = vmatpush1.bf16.msra.mxu0 %v7508_v45  ;;  %874 = vadd.xlane.f32.xlu0 %v873_v39  ;;  %v877_v51 = vadd.f32 %v876_v13, %v755_v40  ;;  %v688_v49 = vmul.f32 %v8910_v55, %v8910_v55  ;;  %v7866_v54 = vld [vmem:[%s8409_s25 + $0xa8] sm:$0xff]  ;;  %v7868_v33 = vld [vmem:[%s8409_s25 + $0xb8] sm:$0xff]  ;;  %v450_v39 = vpop.xlane.xlu0 %449 }
 0x16c   : > { %v784_v58 = vadd.f32 %v685_v43, %v684_v46  ;;  %v689_v63 = vmul.f32 %v8913_v61, %v8913_v61  ;;  %v8967_v7 = vsub.f32 %v7866_v54, %v551_v44  ;;  %v8970_v37 = vsub.f32 %v7867_v12, %v551_v44  ;;  %v7869_v13 = vld [vmem:[%s8409_s25 + $0x2d0] sm:$0xff]  ;;  %6816 = vmatprep.subr.bf16.mxu1 %v7509_v62  ;;  %v7515_v46 = vld [vmem:[#allocation8 + $0x634] ss:$36 sps:$4 sm:$0xff]  }
 0x16d   : > { %v8973_v45 = vsub.f32 %v7868_v33, %v551_v44  ;;  %v8976_v40 = vsub.f32 %v7869_v13, %v574_v18  ;;  %878 = vadd.xlane.f32.xlu1 %v877_v51  ;;  %v7870_v61 = vld [vmem:[%s8409_s25 + $0x2d8] sm:$0xff]  ;;  %v7871_v14 = vld [vmem:[%s8409_s25 + $0x2e0] sm:$0xff]  ;;  %v788_v41 = vadd.f32 %v688_v49, %v687_v2  ;;  %v756_v12 = vmul.f32 %v8916_v25, %v8916_v25 }
 0x16e   : > { %11067 = vst [vmem:[#allocation59_spill] sm:$0xff] %v8967_v7  ;;  %11068 = vst [vmem:[#allocation60_spill] sm:$0xff] %v8970_v37  ;;  %v785_v43 = vadd.f32 %v784_v58, %v686_v26  ;;  %v8979_v55 = vsub.f32 %v7870_v61, %v574_v18  ;;  %v8982_v54 = vsub.f32 %v7871_v14, %v574_v18  ;;  %v575_v33 = vmul.f32 0.0026041667, %v542_v22  ;;  %v454_v26 = vpop.xlane.xlu1 %453  ;;  %v7517_v61 = vld [vmem:[#allocation8 + $0x28c] ss:$36 sps:$4 sm:$0xff]  }
 0x16f   : > { %11069 = vst [vmem:[#allocation61_spill] sm:$0xff] %v8973_v45  ;;  %11070 = vst [vmem:[#allocation62_spill] sm:$0xff] %v8976_v40  ;;  %v757_v44 = vmul.f32 %v8919_v50, %v8919_v50  ;;  %v758_v62 = vmul.f32 %v8922_v60, %v8922_v60  ;;  %2769 = vmatprep.subr.bf16.mxu0 %v7511_v36  ;;  %6824 = vmatpush1.bf16.msra.mxu1 %v7513_v56  ;;  %v552_v18 = vmul.f32 0.0026041667, %v450_v39  ;;  %v7519_v58 = vld [vmem:[#allocation8 + $0x630] ss:$36 sps:$4 sm:$0xff]   ;;  %v458_v39 = vpop.xlane.xlu0 %457 }
 0x170   : > { %11071 = vst [vmem:[#allocation63_spill] sm:$0xff] %v8979_v55  ;;  %786 = vadd.xlane.f32.xlu0 %v785_v43  ;;  %v789_v14 = vadd.f32 %v788_v41, %v689_v63  ;;  %v759_v2 = vmul.f32 %v8935_v53, %v8935_v53  ;;  %v760_v51 = vmul.f32 %v8938_v3, %v8938_v3  ;;  %v7520_v22 = vld [vmem:[#allocation8 + $0x288] ss:$36 sps:$4 sm:$0xff]   ;;  %v7872_v36 = vld [vmem:[%s8409_s25 + $0x2e8] sm:$0xff]  ;;  %v7874_v41 = vld [vmem:[%s8409_s25 + $0x2f8] sm:$0xff] }
 0x171   : > { %2770 = vmatpush1.bf16.msra.mxu0 %v7514_v1  ;;  %v880_v49 = vadd.f32 %v757_v44, %v756_v12  ;;  %v8995_v13 = vsub.f32 %v7872_v36, %v575_v33  ;;  %v7873_v56 = vld [vmem:[%s8409_s25 + $0x2f0] sm:$0xff]  ;;  %v9001_v63 = vsub.f32 %v7874_v41, %v575_v33  ;;  %6817 = vmatprep.subr.bf16.mxu1 %v7515_v46  ;;  %v7875_v53 = vld [vmem:[%s8409_s25 + $0xc0] sm:$0xff]  ;;  %v7876_v1 = vld [vmem:[%s8409_s25 + $0xc8] sm:$0xff] }
 0x172   : > { %v8998_v43 = vsub.f32 %v7873_v56, %v575_v33  ;;  %790 = vadd.xlane.f32.xlu1 %v789_v14  ;;  %v9004_v25 = vsub.f32 %v7875_v53, %v552_v18  ;;  %v9007_v3 = vsub.f32 %v7876_v1, %v552_v18  ;;  %v7877_v50 = vld [vmem:[%s8409_s25 + $0xd0] sm:$0xff]  ;;  %v761_v44 = vmul.f32 %v8941_v27, %v8941_v27  ;;  %v7521_v36 = vld [vmem:[#allocation8 + $0x67c] ss:$36 sps:$4 sm:$0xff]   ;;  %v7523_v53 = vld [vmem:[#allocation8 + $0x2d4] ss:$36 sps:$4 sm:$0xff]  }
 0x173   : > { %11072 = vst [vmem:[#allocation64_spill] sm:$0xff] %v8995_v13  ;;  %v9010_v12 = vsub.f32 %v7877_v50, %v552_v18  ;;  %v881_v56 = vadd.f32 %v880_v49, %v758_v62  ;;  %v884_v60 = vadd.f32 %v760_v51, %v759_v2  ;;  %v690_v33 = vmul.f32 %v8944_v59, %v8944_v59  ;;  %v462_v2 = vpop.xlane.xlu1 %461  ;;  %v7525_v51 = vld [vmem:[#allocation8 + $0x678] ss:$36 sps:$4 sm:$0xff]   ;;  %v7878_v1 = vld [vmem:[%s8409_s25 + $0xd8] sm:$0xff] }
 0x174   : > { %11073 = vst [vmem:[#allocation65_spill] sm:$0xff] %v8998_v43  ;;  %v691_v46 = vmul.f32 %v8947_v29, %v8947_v29  ;;  %2771 = vmatprep.subr.bf16.mxu0 %v7517_v61  ;;  %v692_v14 = vmul.f32 %v8950_v17, %v8950_v17  ;;  %v553_v50 = vmul.f32 0.0026041667, %v454_v26  ;;  %v554_v18 = vmul.f32 0.0026041667, %v458_v39  ;;  %6825 = vmatpush1.bf16.msra.mxu1 %v7519_v58  ;;  %v7880_v58 = vld [vmem:[%s8409_s25 + $0xe8] sm:$0xff] }
 0x175   : > { %11074 = vst [vmem:[#allocation66_spill] sm:$0xff] %v9010_v12  ;;  %v693_v62 = vmul.f32 %v8967_v7, %v8967_v7  ;;  %2772 = vmatpush1.bf16.msra.mxu0 %v7520_v22  ;;  %882 = vadd.xlane.f32.xlu0 %v881_v56  ;;  %v885_v49 = vadd.f32 %v884_v60, %v761_v44  ;;  %v7526_v39 = vld [vmem:[#allocation8 + $0x2d0] ss:$36 sps:$4 sm:$0xff]   ;;  %v7879_v7 = vld [vmem:[%s8409_s25 + $0xe0] sm:$0xff]  ;;  %v7881_v60 = vld [vmem:[%s8409_s25 + $0xf0] sm:$0xff]  ;;  %v466_v56 = vpop.xlane.xlu0 %465 }
 0x176   : > { %v792_v61 = vadd.f32 %v691_v46, %v690_v33  ;;  %v694_v41 = vmul.f32 %v8970_v37, %v8970_v37  ;;  %v695_v26 = vmul.f32 %v8973_v45, %v8973_v45  ;;  %v9027_v17 = vsub.f32 %v7878_v1, %v553_v50  ;;  %6818 = vmatprep.subr.bf16.mxu1 %v7521_v36  ;;  %v7529_v33 = vld [vmem:[#allocation8 + $0xc] ss:$36 sps:$4 sm:$0xff]   ;;  %v7883_v29 = vld [vmem:[%s8409_s25 + $0x100] sm:$0xff] }
 0x177   : > { %v9030_v59 = vsub.f32 %v7879_v7, %v553_v50  ;;  %v9033_v22 = vsub.f32 %v7880_v58, %v553_v50  ;;  %v9036_v44 = vsub.f32 %v7881_v60, %v554_v18  ;;  %886 = vadd.xlane.f32.xlu1 %v885_v49  ;;  %v7882_v45 = vld [vmem:[%s8409_s25 + $0xf8] sm:$0xff]  ;;  %v9042_v1 = vsub.f32 %v7883_v29, %v554_v18  ;;  %v470_v60 = vpop.xlane.xlu1 %469 }
 0x178   : > { %11075 = vst [vmem:[#allocation67_spill] sm:$0xff] %v9027_v17  ;;  %v793_v46 = vadd.f32 %v792_v61, %v692_v14  ;;  %v9039_v37 = vsub.f32 %v7882_v45, %v554_v18  ;;  %v796_v27 = vadd.f32 %v694_v41, %v693_v62  ;;  %v762_v7 = vmul.f32 %v8976_v40, %v8976_v40  ;;  %v7530_v45 = vld [vmem:[#allocation8 + $0x31c] ss:$36 sps:$4 sm:$0xff]   ;;  %v7889_v40 = vld [vmem:[%s8409_s25 + $0x130] sm:$0xff] }
 0x179   : > { %11076 = vst [vmem:[#allocation68_spill] sm:$0xff] %v9033_v22  ;;  %11077 = vst [vmem:[#allocation69_spill] sm:$0xff] %v9042_v1  ;;  %v763_v50 = vmul.f32 %v8979_v55, %v8979_v55  ;;  %v764_v36 = vmul.f32 %v8982_v54, %v8982_v54  ;;  %v555_v49 = vmul.f32 0.0026041667, %v462_v2  ;;  %2773 = vmatprep.subr.bf16.mxu0 %v7523_v53  ;;  %6826 = vmatpush1.bf16.msra.mxu1 %v7525_v51  ;;  %v7532_v61 = vld [vmem:[#allocation8 + $0x318] ss:$36 sps:$4 sm:$0xff]  }
 0x17a   : > { %794 = vadd.xlane.f32.xlu0 %v793_v46  ;;  %v797_v29 = vadd.f32 %v796_v27, %v695_v26  ;;  %v556_v14 = vmul.f32 0.0026041667, %v466_v56  ;;  %v765_v18 = vmul.f32 %v8995_v13, %v8995_v13  ;;  %v766_v62 = vmul.f32 %v8998_v43, %v8998_v43  ;;  %2774 = vmatpush1.bf16.msra.mxu0 %v7526_v39  ;;  %v7884_v2 = vld [vmem:[%s8409_s25 + $0x108] sm:$0xff]  ;;  %v7885_v53 = vld [vmem:[%s8409_s25 + $0x110] sm:$0xff]  ;;  %v7886_v27 = vld [vmem:[%s8409_s25 + $0x118] sm:$0xff] }
 0x17b   : > { %v888_v41 = vadd.f32 %v763_v50, %v762_v7  ;;  %v9055_v58 = vsub.f32 %v7884_v2, %v555_v49  ;;  %v9058_v51 = vsub.f32 %v7885_v53, %v555_v49  ;;  %v9061_v26 = vsub.f32 %v7886_v27, %v555_v49  ;;  %3139 = vmatprep.subr.bf16.mxu1 %v7529_v33  ;;  %v7887_v56 = vld [vmem:[%s8409_s25 + $0x120] sm:$0xff]  ;;  %v7888_v13 = vld [vmem:[%s8409_s25 + $0x128] sm:$0xff] }
 0x17c   : > { %798 = vadd.xlane.f32.xlu1 %v797_v29  ;;  %v9064_v46 = vsub.f32 %v7887_v56, %v556_v14  ;;  %v9067_v39 = vsub.f32 %v7888_v13, %v556_v14  ;;  %v9070_v7 = vsub.f32 %v7889_v40, %v556_v14  ;;  %v767_v50 = vmul.f32 %v9001_v63, %v9001_v63  ;;  %v7536_v2 = vld [vmem:[#allocation8 + $0x364] ss:$36 sps:$4 sm:$0xff]   ;;  %v7890_v56 = vld [vmem:[%s8409_s25 + $0x138] sm:$0xff] }
 0x17d   : > { %11078 = vst [vmem:[#allocation70_spill] sm:$0xff] %v9061_v26  ;;  %v889_v53 = vadd.f32 %v888_v41, %v764_v36  ;;  %v892_v49 = vadd.f32 %v766_v62, %v765_v18  ;;  %v696_v33 = vmul.f32 %v9004_v25, %v9004_v25  ;;  %v697_v29 = vmul.f32 %v9007_v3, %v9007_v3  ;;  %v7538_v18 = vld [vmem:[#allocation8 + $0x360] ss:$36 sps:$4 sm:$0xff]  }
 0x17e   : > { %11079 = vst [vmem:[#allocation71_spill] sm:$0xff] %v9070_v7  ;;  %2775 = vmatprep.subr.bf16.mxu0 %v7530_v45  ;;  %v698_v40 = vmul.f32 %v9010_v12, %v9010_v12  ;;  %v557_v13 = vmul.f32 0.0026041667, %v470_v60  ;;  %v699_v14 = vmul.f32 %v9027_v17, %v9027_v17  ;;  %v700_v36 = vmul.f32 %v9030_v59, %v9030_v59  ;;  %v7891_v60 = vld [vmem:[%s8409_s25 + $0x140] sm:$0xff]  ;;  %v7892_v55 = vld [vmem:[%s8409_s25 + $0x148] sm:$0xff] }
 0x17f   : > { %2776 = vmatpush1.bf16.msra.mxu0 %v7532_v61  ;;  %890 = vadd.xlane.f32.xlu0 %v889_v53  ;;  %v893_v62 = vadd.f32 %v892_v49, %v767_v50  ;;  %v800_v41 = vadd.f32 %v697_v29, %v696_v33  ;;  %v701_v27 = vmul.f32 %v9033_v22, %v9033_v22  ;;  %v7542_v53 = vld [vmem:[#allocation8 + $0x3ac] ss:$36 sps:$4 sm:$0xff]  }
 0x180   : > { %v702_v45 = vmul.f32 %v9036_v44, %v9036_v44  ;;  %v9089_v12 = vsub.f32 %v7890_v56, %v557_v13  ;;  %v9092_v43 = vsub.f32 %v7891_v60, %v557_v13  ;;  %v9095_v17 = vsub.f32 %v7892_v55, %v557_v13  ;;  %2777 = vmatprep.subr.bf16.mxu0 %v7536_v2 }
 0x181   : > { %v804_v61 = vadd.f32 %v700_v36, %v699_v14  ;;  %894 = vadd.xlane.f32.xlu1 %v893_v62  ;;  %v801_v50 = vadd.f32 %v800_v41, %v698_v40  ;;  %v703_v49 = vmul.f32 %v9039_v37, %v9039_v37  ;;  %v704_v33 = vmul.f32 %v9042_v1, %v9042_v1  ;;  %v7544_v40 = vld [vmem:[#allocation8 + $0x3a8] ss:$36 sps:$4 sm:$0xff]   ;;  %v7548_v41 = vld [vmem:[#allocation8 + $0x3f4] ss:$36 sps:$4 sm:$0xff]  }
 0x182   : > { %11080 = vst [vmem:[#allocation72_spill] sm:$0xff] %v9095_v17  ;;  %v705_v29 = vmul.f32 %v9055_v58, %v9055_v58  ;;  %v706_v60 = vmul.f32 %v9058_v51, %v9058_v51  ;;  %v707_v55 = vmul.f32 %v9061_v26, %v9061_v26  ;;  %v708_v2 = vmul.f32 %v9064_v46, %v9064_v46  ;;  %v7550_v1 = vld [vmem:[#allocation8 + $0x3f0] ss:$36 sps:$4 sm:$0xff]  }
 0x183   : > { %v805_v56 = vadd.f32 %v804_v61, %v701_v27  ;;  %2778 = vmatpush1.bf16.msra.mxu0 %v7538_v18  ;;  %802 = vadd.xlane.f32.xlu0 %v801_v50  ;;  %v808_v13 = vadd.f32 %v703_v49, %v702_v45  ;;  %v709_v14 = vmul.f32 %v9067_v39, %v9067_v39  ;;  %v10925_v50 = vmov 0  }
 0x184   : > { %v710_v36 = vmul.f32 %v9070_v7, %v9070_v7  ;;  %v711_v62 = vmul.f32 %v9089_v12, %v9089_v12  ;;  %v812_v27 = vadd.f32 %v706_v60, %v705_v29  ;;  %v712_v61 = vmul.f32 %v9092_v43, %v9092_v43  ;;  %2779 = vmatprep.subr.bf16.mxu0 %v7542_v53  ;;  %v7554_v29 = vld [vmem:[#allocation8 + $0x43c] ss:$36 sps:$4 sm:$0xff]  }
 0x185   : > { %806 = vadd.xlane.f32.xlu1 %v805_v56  ;;  %v809_v18 = vadd.f32 %v808_v13, %v704_v33  ;;  %v816_v26 = vadd.f32 %v709_v14, %v708_v2  ;;  %v713_v45 = vmul.f32 %v9095_v17, %v9095_v17  ;;  %3058 = vmatprep.mubr.bf16.mxu1 %v10925_v50  ;;  %v7556_v53 = vld [vmem:[#allocation8 + $0x438] ss:$36 sps:$4 sm:$0xff]   ;;  %v1089_v56 = vlaneseq }
 0x186   : > { %v813_v49 = vadd.f32 %v812_v27, %v707_v55  ;;  %v820_v7 = vadd.f32 %v712_v61, %v711_v62 }
 0x187   : > { %2780 = vmatpush1.bf16.msra.mxu0 %v7544_v40  ;;  %810 = vadd.xlane.f32.xlu0 %v809_v18  ;;  %v817_v22 = vadd.f32 %v816_v26, %v710_v36  ;;  %v9121_v14 = vshrl.u32 %v1089_v56, 7 }
 0x188   : > { %2781 = vmatprep.subr.bf16.mxu0 %v7548_v41  ;;  %v821_v60 = vadd.f32 %v820_v7, %v713_v45 }
 0x189   : > { %814 = vadd.xlane.f32.xlu1 %v813_v49  ;;  %11081 = vst [vmem:[#allocation73_spill] sm:$0xff] %v9121_v14  ;;  %v9133_v27 = vsub.s32 2, %v9121_v14  ;;  %v413_v49 = vld [vmem:[#allocation5] sm:$0x7] }
 0x18b   : > { %2782 = vmatpush1.bf16.msra.mxu0 %v7550_v1  ;;  %818 = vadd.xlane.f32.xlu0 %v817_v22  ;;  %11085 = vst [vmem:[#allocation77_spill] sm:$0xff] %v9133_v27 }
 0x18c   : > { %2783 = vmatprep.subr.bf16.mxu0 %v7554_v29  ;;  %v9145_v29 = vsub.s32 0, %v9121_v14 }
 0x18d   : > { %822 = vadd.xlane.f32.xlu1 %v821_v60 }
 0x18e   : > { %11087 = vst [vmem:[#allocation79_spill] sm:$0xff] %v9145_v29 }
 0x18f   : > { %2784 = vmatpush1.bf16.msra.mxu0 %v7556_v53 }
 0x190   : > { %2946 = vmatprep.subr.bf16.mxu0 %v8642_v52 }
 0x1d2   : > { %v835_v33 = vpop.xlane.xlu0 %834 }
 0x1d3   : > { %v912_v55 = vmul.f32 0.0026041667, %v835_v33 }
 0x1d5   : > { %v944_v2 = vadd.f32 1e-05, %v912_v55  ;;  %v414_v55 = vld [vmem:[#allocation7] sm:$0x7] }
 0x1d6   : > { %v839_v40 = vpop.xlane.xlu1 %838  ;;  %v474_v13 = vpop.xlane.xlu0 %473 }
 0x1d7   : > { %7782 = vrsqrt.f32 %v944_v2  ;;  %v913_v26 = vmul.f32 0.0026041667, %v839_v40  ;;  %v558_v36 = vmul.f32 0.0026041667, %v474_v13 }
 0x1d9   : > { %v945_v7 = vadd.f32 1e-05, %v913_v26  ;;  %v9124_v1 = vsub.f32 %v8646_v47, %v558_v36  ;;  %v9127_v22 = vsub.f32 %v8649_v48, %v558_v36  ;;  %v9130_v52 = vsub.f32 %v8660_v21, %v558_v36 }
 0x1da   : > { %v478_v62 = vpop.xlane.xlu1 %477  ;;  %v843_v41 = vpop.xlane.xlu0 %842  ;;  %v9142_v21 = vsub.s32 1, %v9121_v14  ;;  %v9157_v26 = vrot.slane %v413_v49, %v9133_v27 }
 0x1db   : > { %11082 = vst [vmem:[#allocation74_spill] sm:$0xff] %v9124_v1  ;;  %11083 = vst [vmem:[#allocation75_spill] sm:$0xff] %v9127_v22  ;;  %7784 = vrsqrt.f32 %v945_v7  ;;  %v559_v61 = vmul.f32 0.0026041667, %v478_v62  ;;  %v914_v18 = vmul.f32 0.0026041667, %v843_v41  ;;  %v714_v45 = vmul.f32 %v9124_v1, %v9124_v1 }
 0x1dc   : > { %11084 = vst [vmem:[#allocation76_spill] sm:$0xff] %v9130_v52  ;;  %v715_v47 = vmul.f32 %v9127_v22, %v9127_v22  ;;  %v716_v48 = vmul.f32 %v9130_v52, %v9130_v52  ;;  %11086 = vst [vmem:[#allocation78_spill] sm:$0xff] %v9142_v21  ;;  %v9167_v41 = vrot.slane %v413_v49, %v9142_v21  ;;  %v7897_v1 = vld [vmem:[#allocation8 + $0x510] ss:$36 sps:$4 sm:$0xff]  }
 0x1dd   : > { %v9148_v60 = vsub.f32 %v8652_v11, %v559_v61  ;;  %v9151_v53 = vsub.f32 %v8655_v57, %v559_v61  ;;  %v9154_v33 = vsub.f32 %v8674_v28, %v559_v61  ;;  %v946_v56 = vadd.f32 1e-05, %v914_v18 }
 0x1de   : > { %v847_v2 = vpop.xlane.xlu1 %846  ;;  %v851_v40 = vpop.xlane.xlu0 %850  ;;  %v824_v13 = vadd.f32 %v715_v47, %v714_v45  ;;  %v9164_v28 = vrot.slane %v414_v55, %v9133_v27 }
 0x1df   : > { %11088 = vst [vmem:[#allocation80_spill] sm:$0xff] %v9148_v60  ;;  %11089 = vst [vmem:[#allocation81_spill] sm:$0xff] %v9151_v53  ;;  %7786 = vrsqrt.f32 %v946_v56  ;;  %v915_v36 = vmul.f32 0.0026041667, %v847_v2  ;;  %v916_v7 = vmul.f32 0.0026041667, %v851_v40  ;;  %v717_v11 = vmul.f32 %v9148_v60, %v9148_v60 }
 0x1e0   : > { %11090 = vst [vmem:[#allocation82_spill] sm:$0xff] %v9154_v33  ;;  %v825_v62 = vadd.f32 %v824_v13, %v716_v48  ;;  %v718_v57 = vmul.f32 %v9151_v53, %v9151_v53  ;;  %v719_v47 = vmul.f32 %v9154_v33, %v9154_v33  ;;  %v9172_v56 = vrot.slane %v413_v49, %v9145_v29 }
 0x1e1   : > { %v7783_v61 = vpop.eup %7782  ;;  %v947_v18 = vadd.f32 1e-05, %v915_v36  ;;  %v948_v45 = vadd.f32 1e-05, %v916_v7  ;;  %v9178_v7 = vrot.slane %v414_v55, %v9142_v21  ;;  %v11103_v21 = vld [vmem:[#allocation24_spill] sm:$0xff] }
 0x1e2   : > { %826 = vadd.xlane.f32.xlu0 %v825_v62  ;;  %v855_v48 = vpop.xlane.xlu1 %854  ;;  %v859_v2 = vpop.xlane.xlu0 %858  ;;  %v828_v40 = vadd.f32 %v718_v57, %v717_v11  ;;  %v1042_v13 = vmul.f32 %v7783_v61, %v8671_v38  ;;  %v1041_v50 = vmul.f32 %v7783_v61, %v8668_v20  ;;  %v1040_v14 = vmul.f32 %v7783_v61, %v8665_v16 }
 0x1e3   : > { %7788 = vrsqrt.f32 %v947_v18  ;;  %v917_v27 = vmul.f32 0.0026041667, %v855_v48  ;;  %v918_v36 = vmul.f32 0.0026041667, %v859_v2  ;;  %v9182_v62 = vrot.slane %v414_v55, %v9145_v29  ;;  %v11107_v29 = vld [vmem:[#allocation17_spill] sm:$0xff] }
 0x1e4   : > { %7790 = vrsqrt.f32 %v948_v45  ;;  %v829_v33 = vadd.f32 %v828_v40, %v719_v47  ;;  %v1154_v49 = vmul.f32 %v9157_v26, %v1042_v13  ;;  %v1153_v20 = vmul.f32 %v9167_v41, %v1041_v50 }
 0x1e5   : > { %v7785_v11 = vpop.eup %7784  ;;  %v949_v57 = vadd.f32 1e-05, %v917_v27  ;;  %v950_v38 = vadd.f32 1e-05, %v918_v36  ;;  %v1152_v16 = vmul.f32 %v9172_v56, %v1040_v14 }
 0x1e6   : > { %830 = vadd.xlane.f32.xlu1 %v829_v33  ;;  %v863_v61 = vpop.xlane.xlu1 %862  ;;  %v1045_v18 = vmul.f32 %v7785_v11, %v8700_v10  ;;  %v1044_v48 = vmul.f32 %v7785_v11, %v8697_v9  ;;  %v1266_v2 = vadd.f32 %v9164_v28, %v1154_v49  ;;  %v1043_v55 = vmul.f32 %v7785_v11, %v8694_v8 }
 0x1e7   : > { %7792 = vrsqrt.f32 %v949_v57  ;;  %v919_v45 = vmul.f32 0.0026041667, %v863_v61  ;;  %v1265_v13 = vadd.f32 %v9178_v7, %v1153_v20  ;;  %v1264_v9 = vadd.f32 %v9182_v62, %v1152_v16  ;;  %v7527_v61 = vld [vmem:[#allocation8 + $0x8] ss:$36 sps:$4 sm:$0xff]   ;;  %v7535_v16 = vld [vmem:[#allocation8 + $0x54] ss:$36 sps:$4 sm:$0xff]  }
 0x1e8   : > { %v771_v47 = vpop.xlane.xlu0 %770  ;;  %7794 = vrsqrt.f32 %v950_v38  ;;  %v1157_v40 = vmul.f32 %v9157_v26, %v1045_v18  ;;  %v1156_v50 = vmul.f32 %v9167_v41, %v1044_v48  ;;  %v1155_v10 = vmul.f32 %v9172_v56, %v1043_v55 }
 0x1e9   : > { %v896_v27 = vmul.f32 0.0026041667, %v771_v47  ;;  %v7787_v14 = vpop.eup %7786  ;;  %v951_v33 = vadd.f32 1e-05, %v919_v45 }
 0x1ea   : > { %v1269_v49 = vadd.f32 %v9164_v28, %v1157_v40  ;;  %v1048_v8 = vmul.f32 %v7787_v14, %v8684_v0  ;;  %v1268_v11 = vadd.f32 %v9178_v7, %v1156_v50  ;;  %v1267_v18 = vadd.f32 %v9182_v62, %v1155_v10 }
 0x1eb   : > { %v928_v36 = vadd.f32 1e-05, %v896_v27  ;;  %v775_v57 = vpop.xlane.xlu1 %774  ;;  %7796 = vrsqrt.f32 %v951_v33  ;;  %v1047_v48 = vmul.f32 %v7787_v14, %v8681_v32 }
 0x1ec   : > { %v897_v38 = vmul.f32 0.0026041667, %v775_v57  ;;  %v9200_v45 = vpack.c.bf16 %v1269_v49, %v1266_v2  ;;  %v1160_v47 = vmul.f32 %v9157_v26, %v1048_v8  ;;  %v9203_v55 = vpack.c.bf16 %v1268_v11, %v1265_v13 }
 0x1ed   : > { %7798 = vrsqrt.f32 %v928_v36  ;;  %v7789_v27 = vpop.eup %7788  ;;  %v9205_v50 = vpack.c.bf16 %v1267_v18, %v1264_v9  ;;  %v1159_v33 = vmul.f32 %v9167_v41, %v1047_v48  ;;  %v1046_v13 = vmul.f32 %v7787_v14, %v8678_v19  ;;  %v7533_v9 = vld [vmem:[#allocation8 + $0x50] ss:$36 sps:$4 sm:$0xff]   ;;  %v7541_v48 = vld [vmem:[#allocation8 + $0x9c] ss:$36 sps:$4 sm:$0xff]  }
 0x1ee   : > { %v867_v20 = vpop.xlane.xlu0 %866  ;;  %11091 = vst [vmem:[#allocation83_spill] sm:$0xff] %v9200_v45  ;;  %11092 = vst [vmem:[#allocation84_spill] sm:$0xff] %v9203_v55  ;;  %v929_v0 = vadd.f32 1e-05, %v897_v38  ;;  %v9208_v57 = vpop.eup %7790  ;;  %3059 = vmatmul.mubr.bf16.vlgmr.msra.gmra.mrb[0].mxu1 %v9200_v45  ;;  %v1051_v32 = vmul.f32 %v7789_v27, %v8715_v6  ;;  %v1272_v2 = vadd.f32 %v9164_v28, %v1160_v47  ;;  %v11094_v11 = vmov 0  }
 0x1ef   : > { %v920_v40 = vmul.f32 0.0026041667, %v867_v20  ;;  %11093 = vst [vmem:[#allocation85_spill] sm:$0xff] %v9205_v50  ;;  %v1050_v36 = vmul.f32 %v7789_v27, %v8712_v5  ;;  %3140 = vmatpush1.bf16.msra.mxu1 %v7527_v61  ;;  %3068 = vmatprep.mubr.bf16.mxu1 %v11094_v11  ;;  %v1054_v38 = vmul.f32 %v9208_v57, %v8730_v15  ;;  %v7895_v55 = vld [vmem:[#allocation8 + $0x4c8] ss:$36 sps:$4 sm:$0xff]  }
 0x1f0   : > { %v871_v10 = vpop.xlane.xlu1 %870  ;;  %7800 = vrsqrt.f32 %v929_v0  ;;  %3141 = vmatprep.subr.bf16.mxu1 %v7535_v16  ;;  %v1163_v6 = vmul.f32 %v9157_v26, %v1051_v32  ;;  %v1271_v5 = vadd.f32 %v9178_v7, %v1159_v33  ;;  %v1049_v19 = vmul.f32 %v7789_v27, %v8709_v4 }
 0x1f1   : > { %v952_v49 = vadd.f32 1e-05, %v920_v40  ;;  %v921_v8 = vmul.f32 0.0026041667, %v871_v10  ;;  %v1162_v20 = vmul.f32 %v9167_v41, %v1050_v36  ;;  %v9222_v14 = vpop.eup %7792  ;;  %v1166_v0 = vmul.f32 %v9157_v26, %v1054_v38  ;;  %v7539_v36 = vld [vmem:[#allocation8 + $0x98] ss:$36 sps:$4 sm:$0xff]  }
 0x1f2   : > { %v9225_v40 = vpop.eup %7794  ;;  %v1275_v16 = vadd.f32 %v9164_v28, %v1163_v6  ;;  %v1057_v10 = vmul.f32 %v9222_v14, %v8743_v24  ;;  %v1158_v33 = vmul.f32 %v9172_v56, %v1046_v13  ;;  %v7547_v38 = vld [vmem:[#allocation8 + $0xe4] ss:$36 sps:$4 sm:$0xff]  }
 0x1f3   : > { %v779_v18 = vpop.xlane.xlu0 %778  ;;  %7802 = vrsqrt.f32 %v952_v49  ;;  %v953_v61 = vadd.f32 1e-05, %v921_v8  ;;  %v1274_v32 = vadd.f32 %v9178_v7, %v1162_v20  ;;  %3142 = vmatpush1.bf16.msra.mxu1 %v7533_v9  ;;  %v1278_v49 = vadd.f32 %v9164_v28, %v1166_v0 }
 0x1f4   : > { %v898_v47 = vmul.f32 0.0026041667, %v779_v18  ;;  %v783_v15 = vpop.xlane.xlu1 %782  ;;  %v9233_v8 = vpack.c.bf16 %v1275_v16, %v1272_v2  ;;  %3143 = vmatprep.subr.bf16.mxu1 %v7541_v48  ;;  %v1169_v18 = vmul.f32 %v9157_v26, %v1057_v10  ;;  %v1060_v24 = vmul.f32 %v9225_v40, %v8754_v23  ;;  %v7545_v16 = vld [vmem:[#allocation8 + $0xe0] ss:$36 sps:$4 sm:$0xff]  }
 0x1f5   : > { %7804 = vrsqrt.f32 %v953_v61  ;;  %v899_v27 = vmul.f32 0.0026041667, %v783_v15  ;;  %v9238_v6 = vpack.c.bf16 %v1274_v32, %v1271_v5  ;;  %v9240_v20 = vpop.eup %7796  ;;  %v1161_v9 = vmul.f32 %v9172_v56, %v1049_v19 }
 0x1f6   : > { %v930_v4 = vadd.f32 1e-05, %v898_v47  ;;  %11095 = vst [vmem:[#allocation86_spill] sm:$0xff] %v9233_v8  ;;  %v1270_v47 = vadd.f32 %v9182_v62, %v1158_v33  ;;  %3069 = vmatmul.mubr.bf16.gmra.mrb[4].mxu1 %v9233_v8  ;;  %v1281_v0 = vadd.f32 %v9164_v28, %v1169_v18  ;;  %v1063_v23 = vmul.f32 %v9240_v20, %v8767_v34 }
 0x1f7   : > { %11096 = vst [vmem:[#allocation87_spill] sm:$0xff] %v9238_v6  ;;  %v931_v13 = vadd.f32 1e-05, %v899_v27  ;;  %v9244_v2 = vpop.eup %7798  ;;  %v1172_v5 = vmul.f32 %v9157_v26, %v1060_v24  ;;  %3144 = vmatpush1.bf16.msra.mxu1 %v7539_v36  ;;  %3078 = vmatprep.mubr.bf16.mxu1 %v11094_v11  ;;  %v1273_v32 = vadd.f32 %v9182_v62, %v1161_v9  ;;  %v7553_v27 = vld [vmem:[#allocation8 + $0x12c] ss:$36 sps:$4 sm:$0xff]  }
 0x1f8   : > { %7806 = vrsqrt.f32 %v930_v4  ;;  %v875_v61 = vpop.xlane.xlu0 %874  ;;  %11097 = vst [vmem:[#allocation88_spill] sm:$0xff] %v9244_v2  ;;  %v993_v19 = vmul.f32 %v9244_v2, %v8779_v31  ;;  %v992_v10 = vmul.f32 %v9244_v2, %v8776_v30  ;;  %3145 = vmatprep.subr.bf16.mxu1 %v7547_v38  ;;  %v9257_v34 = vpack.c.bf16 %v1281_v0, %v1278_v49  ;;  %v7894_v6 = vld [vmem:[#allocation8 + $0x4cc] ss:$36 sps:$4 sm:$0xff]  }
 0x1f9   : > { %v922_v48 = vmul.f32 0.0026041667, %v875_v61  ;;  %7808 = vrsqrt.f32 %v931_v13  ;;  %v1175_v18 = vmul.f32 %v9157_v26, %v1063_v23  ;;  %v1284_v61 = vadd.f32 %v9164_v28, %v1172_v5  ;;  %v7551_v23 = vld [vmem:[#allocation8 + $0x128] ss:$36 sps:$4 sm:$0xff]  }
 0x1fa   : > { %v879_v15 = vpop.xlane.xlu1 %878  ;;  %11098 = vst [vmem:[#allocation89_spill] sm:$0xff] %v9257_v34  ;;  %v9260_v36 = vpop.eup %7800  ;;  %v1105_v13 = vmul.f32 %v9167_v41, %v993_v19  ;;  %v1104_v31 = vmul.f32 %v9172_v56, %v992_v10  ;;  %v9265_v30 = vpack.c.bf16 %v1273_v32, %v1270_v47 }
 0x1fb   : > { %v954_v33 = vadd.f32 1e-05, %v922_v48  ;;  %v923_v4 = vmul.f32 0.0026041667, %v879_v15  ;;  %11099 = vst [vmem:[#allocation90_spill] sm:$0xff] %v9260_v36  ;;  %v996_v49 = vmul.f32 %v9260_v36, %v8790_v35  ;;  %3146 = vmatpush1.bf16.msra.mxu1 %v7545_v16  ;;  %v995_v19 = vmul.f32 %v9260_v36, %v8787_v42 }
 0x1fc   : > { %11100 = vst [vmem:[#allocation91_spill] sm:$0xff] %v9265_v30  ;;  %v1217_v15 = vadd.f32 %v9178_v7, %v1105_v13  ;;  %v1216_v5 = vadd.f32 %v9182_v62, %v1104_v31  ;;  %v1287_v47 = vadd.f32 %v9164_v28, %v1175_v18  ;;  %3147 = vmatprep.subr.bf16.mxu1 %v7553_v27  ;;  %v11102_v13 = vld [vmem:[#allocation35_spill] sm:$0xff] }
 0x1fd   : > { %v787_v24 = vpop.xlane.xlu0 %786  ;;  %7810 = vrsqrt.f32 %v954_v33  ;;  %v955_v9 = vadd.f32 1e-05, %v923_v4  ;;  %v9269_v38 = vpop.eup %7802  ;;  %v1108_v35 = vmul.f32 %v9167_v41, %v996_v49  ;;  %v7559_v33 = vld [vmem:[#allocation8 + $0x174] ss:$36 sps:$4 sm:$0xff]   ;;  %v1107_v16 = vmul.f32 %v9172_v56, %v995_v19  ;;  %v7893_v30 = vld [vmem:[#allocation8 + $0x480] ss:$36 sps:$4 sm:$0xff]  }
 0x1fe   : > { %v900_v48 = vmul.f32 0.0026041667, %v787_v24  ;;  %v9280_v24 = vpack.c.bf16 %v1287_v47, %v1284_v61  ;;  %v1066_v42 = vmul.f32 %v9269_v38, %v11102_v13  ;;  %v9286_v31 = vmul.f32 %v9208_v57, %v11103_v21  ;;  %3079 = vmatmul.mubr.bf16.gmra.mrb[8].mxu1 %v9257_v34  ;;  %v7557_v19 = vld [vmem:[#allocation8 + $0x170] ss:$36 sps:$4 sm:$0xff]  }
 0x1ff   : > { %v791_v0 = vpop.xlane.xlu1 %790  ;;  %7812 = vrsqrt.f32 %v955_v9  ;;  %v9277_v4 = vpop.eup %7804  ;;  %v1220_v27 = vadd.f32 %v9178_v7, %v1108_v35  ;;  %3148 = vmatpush1.bf16.msra.mxu1 %v7551_v23  ;;  %v1219_v47 = vadd.f32 %v9182_v62, %v1107_v16  ;;  %3088 = vmatprep.mubr.bf16.mxu1 %v11094_v11 }
 0x200   : > { %v932_v10 = vadd.f32 1e-05, %v900_v48  ;;  %v901_v32 = vmul.f32 0.0026041667, %v791_v0  ;;  %11101 = vst [vmem:[#allocation92_spill] sm:$0xff] %v9280_v24  ;;  %v11104_v48 = vld [vmem:[#allocation38_spill] sm:$0xff]  ;;  %v1178_v21 = vmul.f32 %v9157_v26, %v1066_v42  ;;  %3149 = vmatprep.subr.bf16.mxu1 %v7559_v33 }
 0x201   : > { %v1069_v49 = vmul.f32 %v9277_v4, %v11104_v48  ;;  %v9301_v13 = vpack.c.bf16 %v1220_v27, %v1217_v15  ;;  %v7562_v48 = vld [vmem:[#allocation8 + $0x1bc] ss:$36 sps:$4 sm:$0xff]   ;;  %v9309_v45 = vpack.c.bf16 %v1219_v47, %v1216_v5 }
 0x202   : > { %7814 = vrsqrt.f32 %v932_v10  ;;  %v933_v18 = vadd.f32 1e-05, %v901_v32  ;;  %v883_v9 = vpop.xlane.xlu0 %882  ;;  %v9292_v0 = vpop.eup %7806  ;;  %v11105_v10 = vld [vmem:[#allocation26_spill] sm:$0xff]  ;;  %v11110_v15 = vld [vmem:[#allocation19_spill] sm:$0xff] }
 0x203   : > { %v924_v61 = vmul.f32 0.0026041667, %v883_v9  ;;  %v9299_v32 = vmul.f32 %v9222_v14, %v11105_v10  ;;  %11106 = vst [vmem:[#allocation35_spill] sm:$0xff] %v9301_v13  ;;  %v999_v23 = vmul.f32 %v9292_v0, %v11107_v29  ;;  %v11108_v9 = vld [vmem:[#allocation16_spill] sm:$0xff]  ;;  %v9307_v34 = vpop.eup %7808  ;;  %11109 = vst [vmem:[#allocation24_spill] sm:$0xff] %v9309_v45  ;;  %v1181_v10 = vmul.f32 %v9157_v26, %v1069_v49  ;;  %v11111_v29 = vld [vmem:[#allocation18_spill] sm:$0xff] }
 0x204   : > { %7816 = vrsqrt.f32 %v933_v18  ;;  %v887_v35 = vpop.xlane.xlu1 %886  ;;  %v998_v16 = vmul.f32 %v9292_v0, %v11108_v9  ;;  %2785 = vmatprep.mubr.bf16.mxu0 %v9301_v13  ;;  %v1002_v33 = vmul.f32 %v9307_v34, %v11110_v15  ;;  %v1001_v2 = vmul.f32 %v9307_v34, %v11111_v29  ;;  %3150 = vmatpush1.bf16.msra.mxu1 %v7557_v19  ;;  %v7560_v5 = vld [vmem:[#allocation8 + $0x1b8] ss:$36 sps:$4 sm:$0xff]   ;;  %v7565_v29 = vld [vmem:[#allocation8 + $0x204] ss:$36 sps:$4 sm:$0xff]  }
 0x205   : > { %v956_v8 = vadd.f32 1e-05, %v924_v61  ;;  %v925_v42 = vmul.f32 0.0026041667, %v887_v35  ;;  %v1111_v27 = vmul.f32 %v9167_v41, %v999_v23  ;;  %2786 = vmatmul.mubr.bf16.vlgmr.msra.gmra.mrb[0].mxu0 %v9309_v45  ;;  %v1290_v49 = vadd.f32 %v9164_v28, %v1178_v21  ;;  %3151 = vmatprep.subr.bf16.mxu1 %v7562_v48 }
 0x206   : > { %v1110_v9 = vmul.f32 %v9172_v56, %v998_v16  ;;  %v1114_v23 = vmul.f32 %v9167_v41, %v1002_v33  ;;  %v1113_v16 = vmul.f32 %v9172_v56, %v1001_v2  ;;  %v1293_v19 = vadd.f32 %v9164_v28, %v1181_v10  ;;  %2947 = vmatpush1.bf16.msra.mxu0 %v7893_v30  ;;  %v7563_v10 = vld [vmem:[#allocation8 + $0x200] ss:$36 sps:$4 sm:$0xff]  }
 0x207   : > { %v795_v18 = vpop.xlane.xlu0 %794  ;;  %7818 = vrsqrt.f32 %v956_v8  ;;  %v957_v61 = vadd.f32 1e-05, %v925_v42  ;;  %v9321_v47 = vpop.eup %7810  ;;  %v1223_v15 = vadd.f32 %v9178_v7, %v1111_v27  ;;  %3089 = vmatmul.mubr.bf16.gmra.mrb[12].mxu1 %v9280_v24  ;;  %v11112_v27 = vld [vmem:[#allocation22_spill] sm:$0xff]  ;;  %2948 = vmatprep.subr.bf16.mxu0 %v7894_v6  ;;  %v7568_v6 = vld [vmem:[#allocation8 + $0x24c] ss:$36 sps:$4 sm:$0xff]  }
 0x208   : > { %v902_v35 = vmul.f32 0.0026041667, %v795_v18  ;;  %v1222_v8 = vadd.f32 %v9182_v62, %v1110_v9  ;;  %v1226_v48 = vadd.f32 %v9178_v7, %v1114_v23  ;;  %v1225_v33 = vadd.f32 %v9182_v62, %v1113_v16  ;;  %3152 = vmatpush1.bf16.msra.mxu1 %v7560_v5  ;;  %3098 = vmatprep.mubr.bf16.mxu1 %v11094_v11 }
 0x209   : > { %v799_v36 = vpop.xlane.xlu1 %798  ;;  %7820 = vrsqrt.f32 %v957_v61  ;;  %v9328_v21 = vpop.eup %7812  ;;  %v1072_v2 = vmul.f32 %v9321_v47, %v11112_v27  ;;  %v9336_v30 = vpack.c.bf16 %v1293_v19, %v1290_v49  ;;  %v11114_v61 = vld [vmem:[#allocation43_spill] sm:$0xff]  ;;  %3153 = vmatprep.subr.bf16.mxu1 %v7565_v29  ;;  %v11118_v19 = vld [vmem:[#allocation44_spill] sm:$0xff] }
 0x20a   : > { %v934_v42 = vadd.f32 1e-05, %v902_v35  ;;  %v903_v18 = vmul.f32 0.0026041667, %v799_v36  ;;  %v1075_v35 = vmul.f32 %v9328_v21, %v11114_v61  ;;  %v9342_v24 = vpack.c.bf16 %v1226_v48, %v1223_v15  ;;  %2949 = vmatpush1.bf16.msra.mxu0 %v7895_v55  ;;  %v11120_v55 = vld [vmem:[#allocation48_spill] sm:$0xff] }
 0x20b   : > { %11113 = vst [vmem:[#allocation38_spill] sm:$0xff] %v9336_v30  ;;  %v9344_v27 = vpack.c.bf16 %v1225_v33, %v1222_v8  ;;  %v7896_v33 = vld [vmem:[#allocation8 + $0x514] ss:$36 sps:$4 sm:$0xff]  }
 0x20c   : > { %7822 = vrsqrt.f32 %v934_v42  ;;  %v935_v9 = vadd.f32 1e-05, %v903_v18  ;;  %v891_v36 = vpop.xlane.xlu0 %890  ;;  %v9340_v23 = vpop.eup %7814  ;;  %11115 = vst [vmem:[#allocation26_spill] sm:$0xff] %v9342_v24  ;;  %v1184_v42 = vmul.f32 %v9157_v26, %v1072_v2  ;;  %v11117_v18 = vld [vmem:[#allocation45_spill] sm:$0xff]  ;;  %v1187_v61 = vmul.f32 %v9157_v26, %v1075_v35  ;;  %2795 = vmatprep.mubr.bf16.mxu0 %v9342_v24  ;;  %2950 = vmatprep.subr.bf16.mxu0 %v7896_v33 }
 0x20d   : > { %v926_v16 = vmul.f32 0.0026041667, %v891_v36  ;;  %11116 = vst [vmem:[#allocation17_spill] sm:$0xff] %v9344_v27  ;;  %v1005_v49 = vmul.f32 %v9340_v23, %v11117_v18  ;;  %v1004_v50 = vmul.f32 %v9340_v23, %v11118_v19  ;;  %v9358_v2 = vmul.f32 %v9167_v41, %v9286_v31  ;;  %2796 = vmatmul.mubr.bf16.gmra.mrb[4].mxu0 %v9344_v27  ;;  %v7566_v36 = vld [vmem:[#allocation8 + $0x248] ss:$36 sps:$4 sm:$0xff]  }
 0x20e   : > { %7824 = vrsqrt.f32 %v935_v9  ;;  %v895_v5 = vpop.xlane.xlu1 %894  ;;  %v9352_v15 = vpop.eup %7816  ;;  %v1296_v48 = vadd.f32 %v9164_v28, %v1184_v42  ;;  %3154 = vmatpush1.bf16.msra.mxu1 %v7563_v10  ;;  %v7571_v33 = vld [vmem:[#allocation8 + $0x294] ss:$36 sps:$4 sm:$0xff]   ;;  %2951 = vmatpush1.bf16.msra.mxu0 %v7897_v1 }
 0x20f   : > { %11119 = vst [vmem:[#allocation16_spill] sm:$0xff] %v9352_v15  ;;  %v958_v29 = vadd.f32 1e-05, %v926_v16  ;;  %v927_v8 = vmul.f32 0.0026041667, %v895_v5  ;;  %v1008_v35 = vmul.f32 %v9352_v15, %v11120_v55  ;;  %v1117_v16 = vmul.f32 %v9167_v41, %v1005_v49  ;;  %v11121_v5 = vld [vmem:[#allocation47_spill] sm:$0xff]  ;;  %3155 = vmatprep.subr.bf16.mxu1 %v7568_v6  ;;  %3099 = vmatmul.mubr.bf16.gmra.mrb[16].mxu1 %v9336_v30 }
 0x210   : > { %v803_v9 = vpop.xlane.xlu0 %802  ;;  %v1007_v18 = vmul.f32 %v9352_v15, %v11121_v5  ;;  %v1116_v31 = vmul.f32 %v9172_v56, %v1004_v50  ;;  %v1299_v49 = vadd.f32 %v9164_v28, %v1187_v61  ;;  %v7898_v6 = vld [vmem:[#allocation8 + $0x55c] ss:$36 sps:$4 sm:$0xff]   ;;  %v7569_v5 = vld [vmem:[#allocation8 + $0x290] ss:$36 sps:$4 sm:$0xff]   ;;  %3108 = vmatprep.mubr.bf16.mxu1 %v11094_v11 }
 0x211   : > { %7826 = vrsqrt.f32 %v958_v29  ;;  %v959_v42 = vadd.f32 1e-05, %v927_v8  ;;  %v904_v19 = vmul.f32 0.0026041667, %v803_v9  ;;  %v9367_v60 = vpop.eup %7818  ;;  %v1120_v10 = vmul.f32 %v9167_v41, %v1008_v35  ;;  %2952 = vmatprep.subr.bf16.mxu0 %v7898_v6  ;;  %v11131_v15 = vld [vmem:[#allocation59_spill] sm:$0xff] }
 0x212   : > { %v807_v53 = vpop.xlane.xlu1 %806  ;;  %v1229_v52 = vadd.f32 %v9178_v7, %v1117_v16  ;;  %v1119_v55 = vmul.f32 %v9172_v56, %v1007_v18  ;;  %v1228_v50 = vadd.f32 %v9182_v62, %v1116_v31  ;;  %3156 = vmatpush1.bf16.msra.mxu1 %v7566_v36  ;;  %v9380_v1 = vpack.c.bf16 %v1299_v49, %v1296_v48  ;;  %v7899_v48 = vld [vmem:[#allocation8 + $0x558] ss:$36 sps:$4 sm:$0xff]  }
 0x213   : > { %7828 = vrsqrt.f32 %v959_v42  ;;  %v936_v29 = vadd.f32 1e-05, %v904_v19  ;;  %v905_v8 = vmul.f32 0.0026041667, %v807_v53  ;;  %v9375_v9 = vpop.eup %7820  ;;  %v1232_v16 = vadd.f32 %v9178_v7, %v1120_v10  ;;  %3157 = vmatprep.subr.bf16.mxu1 %v7571_v33  ;;  %v7574_v42 = vld [vmem:[#allocation8 + $0x2dc] ss:$36 sps:$4 sm:$0xff]   ;;  %2953 = vmatpush1.bf16.msra.mxu0 %v7899_v48 }
 0x214   : > { %v811_v35 = vpop.xlane.xlu0 %810  ;;  %v1231_v61 = vadd.f32 %v9182_v62, %v1119_v55  ;;  %11122 = vst [vmem:[#allocation19_spill] sm:$0xff] %v9380_v1  ;;  %v11123_v19 = vld [vmem:[#allocation52_spill] sm:$0xff]  ;;  %v11127_v55 = vld [vmem:[#allocation55_spill] sm:$0xff]  ;;  %v1168_v49 = vmul.f32 %v9167_v41, %v9299_v32 }
 0x215   : > { %7830 = vrsqrt.f32 %v936_v29  ;;  %v937_v53 = vadd.f32 1e-05, %v905_v8  ;;  %v906_v18 = vmul.f32 0.0026041667, %v811_v35  ;;  %v1078_v31 = vmul.f32 %v9367_v60, %v11123_v19  ;;  %v11128_v8 = vld [vmem:[#allocation57_spill] sm:$0xff]  ;;  %v11130_v48 = vld [vmem:[#allocation60_spill] sm:$0xff] }
 0x216   : > { %v9384_v6 = vpop.eup %7822  ;;  %v815_v36 = vpop.xlane.xlu1 %814  ;;  %v9386_v30 = vpack.c.bf16 %v1232_v16, %v1229_v52  ;;  %v9388_v10 = vpack.c.bf16 %v1231_v61, %v1228_v50  ;;  %v1081_v22 = vmul.f32 %v9375_v9, %v11127_v55  ;;  %v7900_v19 = vld [vmem:[#allocation8 + $0x5a4] ss:$36 sps:$4 sm:$0xff]   ;;  %3158 = vmatpush1.bf16.msra.mxu1 %v7569_v5  ;;  %v7572_v16 = vld [vmem:[#allocation8 + $0x2d8] ss:$36 sps:$4 sm:$0xff]  }
 0x217   : > { %11124 = vst [vmem:[#allocation18_spill] sm:$0xff] %v9384_v6  ;;  %7832 = vrsqrt.f32 %v937_v53  ;;  %v938_v33 = vadd.f32 1e-05, %v906_v18  ;;  %v907_v29 = vmul.f32 0.0026041667, %v815_v36  ;;  %v1011_v35 = vmul.f32 %v9384_v6, %v11128_v8  ;;  %2954 = vmatprep.subr.bf16.mxu0 %v7900_v19  ;;  %v11129_v61 = vld [vmem:[#allocation56_spill] sm:$0xff]  ;;  %3159 = vmatprep.subr.bf16.mxu1 %v7574_v42 }
 0x218   : > { %11125 = vst [vmem:[#allocation22_spill] sm:$0xff] %v9386_v30  ;;  %11126 = vst [vmem:[#allocation43_spill] sm:$0xff] %v9388_v10  ;;  %v9396_v52 = vpop.eup %7824  ;;  %v819_v50 = vpop.xlane.xlu0 %818  ;;  %2805 = vmatprep.mubr.bf16.mxu0 %v9386_v30  ;;  %v1010_v55 = vmul.f32 %v9384_v6, %v11129_v61  ;;  %v1190_v32 = vmul.f32 %v9157_v26, %v1078_v31  ;;  %v1193_v53 = vmul.f32 %v9157_v26, %v1081_v22  ;;  %v7577_v19 = vld [vmem:[#allocation8 + $0x324] ss:$36 sps:$4 sm:$0xff]   ;;  %v7902_v6 = vld [vmem:[#allocation8 + $0x5ec] ss:$36 sps:$4 sm:$0xff]  }
 0x219   : > { %7834 = vrsqrt.f32 %v938_v33  ;;  %v939_v18 = vadd.f32 1e-05, %v907_v29  ;;  %v908_v36 = vmul.f32 0.0026041667, %v819_v50  ;;  %2806 = vmatmul.mubr.bf16.gmra.mrb[8].mxu0 %v9388_v10  ;;  %v1014_v8 = vmul.f32 %v9396_v52, %v11130_v48  ;;  %v7901_v33 = vld [vmem:[#allocation8 + $0x5a0] ss:$36 sps:$4 sm:$0xff]   ;;  %3109 = vmatmul.mubr.bf16.gmra.mrb[20].mxu1 %v9380_v1 }
 0x21a   : > { %v823_v17 = vpop.xlane.xlu1 %822  ;;  %v1123_v5 = vmul.f32 %v9167_v41, %v1011_v35  ;;  %v1013_v61 = vmul.f32 %v9396_v52, %v11131_v15  ;;  %v1122_v31 = vmul.f32 %v9172_v56, %v1010_v55  ;;  %v1302_v22 = vadd.f32 %v9164_v28, %v1190_v32  ;;  %2955 = vmatpush1.bf16.msra.mxu0 %v7901_v33  ;;  %v7575_v35 = vld [vmem:[#allocation8 + $0x320] ss:$36 sps:$4 sm:$0xff]  }
 0x21b   : > { %v9411_v29 = vpop.eup %7826  ;;  %7836 = vrsqrt.f32 %v939_v18  ;;  %v940_v42 = vadd.f32 1e-05, %v908_v36  ;;  %v909_v50 = vmul.f32 0.0026041667, %v823_v17  ;;  %v1126_v48 = vmul.f32 %v9167_v41, %v1014_v8  ;;  %2956 = vmatprep.subr.bf16.mxu0 %v7902_v6  ;;  %3160 = vmatpush1.bf16.msra.mxu1 %v7572_v16  ;;  %v7580_v6 = vld [vmem:[#allocation8 + $0x36c] ss:$36 sps:$4 sm:$0xff]  }
 0x21c   : > { %v1235_v15 = vadd.f32 %v9178_v7, %v1123_v5  ;;  %v1125_v55 = vmul.f32 %v9172_v56, %v1013_v61  ;;  %v1234_v32 = vadd.f32 %v9182_v62, %v1122_v31  ;;  %3118 = vmatprep.mubr.bf16.mxu1 %v11094_v11  ;;  %3161 = vmatprep.subr.bf16.mxu1 %v7577_v19  ;;  %v7903_v31 = vld [vmem:[#allocation8 + $0x5e8] ss:$36 sps:$4 sm:$0xff]  }
 0x21d   : > { %v9419_v33 = vpop.eup %7828  ;;  %7838 = vrsqrt.f32 %v940_v42  ;;  %v941_v17 = vadd.f32 1e-05, %v909_v50  ;;  %v1238_v18 = vadd.f32 %v9178_v7, %v1126_v48  ;;  %v1305_v36 = vadd.f32 %v9164_v28, %v1193_v53  ;;  %v7904_v48 = vld [vmem:[#allocation8 + $0x634] ss:$36 sps:$4 sm:$0xff]  }
 0x21e   : > { %v1237_v16 = vadd.f32 %v9182_v62, %v1125_v55  ;;  %v1084_v8 = vmul.f32 %v9411_v29, %v8982_v54  ;;  %v1087_v5 = vmul.f32 %v9419_v33, %v9001_v63  ;;  %v1277_v61 = vadd.f32 %v9178_v7, %v9358_v2  ;;  %2957 = vmatpush1.bf16.msra.mxu0 %v7903_v31  ;;  %v7578_v63 = vld [vmem:[#allocation8 + $0x368] ss:$36 sps:$4 sm:$0xff]  }
 0x21f   : > { %v9430_v42 = vpop.eup %7830  ;;  %7840 = vrsqrt.f32 %v941_v17  ;;  %v9432_v19 = vpack.c.bf16 %v1238_v18, %v1235_v15  ;;  %v9434_v53 = vpack.c.bf16 %v1305_v36, %v1302_v22  ;;  %v1280_v50 = vadd.f32 %v9178_v7, %v1168_v49  ;;  %2958 = vmatprep.subr.bf16.mxu0 %v7904_v48  ;;  %3162 = vmatpush1.bf16.msra.mxu1 %v7575_v35  ;;  %v7583_v49 = vld [vmem:[#allocation8 + $0x3b4] ss:$36 sps:$4 sm:$0xff]   ;;  %v11134_v35 = vld [vmem:[#allocation23_spill] sm:$0xff] }
 0x220   : > { %v9437_v54 = vpack.c.bf16 %v1237_v16, %v1234_v32  ;;  %v1017_v2 = vmul.f32 %v9430_v42, %v9007_v3  ;;  %v1016_v55 = vmul.f32 %v9430_v42, %v9004_v25  ;;  %v1196_v17 = vmul.f32 %v9157_v26, %v1084_v8  ;;  %3163 = vmatprep.subr.bf16.mxu1 %v7580_v6  ;;  %v11135_v36 = vld [vmem:[#allocation67_spill] sm:$0xff] }
 0x221   : > { %11132 = vst [vmem:[#allocation45_spill] sm:$0xff] %v9432_v19  ;;  %11133 = vst [vmem:[#allocation44_spill] sm:$0xff] %v9434_v53  ;;  %v9444_v15 = vpop.eup %7832  ;;  %2815 = vmatprep.mubr.bf16.mxu0 %v9432_v19  ;;  %v1199_v22 = vmul.f32 %v9157_v26, %v1087_v5  ;;  %v9448_v32 = vpack.c.bf16 %v1280_v50, %v1277_v61  ;;  %v1052_v18 = vmul.f32 %v9208_v57, %v11134_v35  ;;  %v11136_v61 = vld [vmem:[#allocation25_spill] sm:$0xff] }
 0x222   : > { %2816 = vmatmul.mubr.bf16.gmra.mrb[12].mxu0 %v9437_v54  ;;  %v1020_v25 = vmul.f32 %v9444_v15, %v9030_v59  ;;  %v1129_v3 = vmul.f32 %v9167_v41, %v1017_v2  ;;  %v1019_v16 = vmul.f32 %v9444_v15, %v11135_v36  ;;  %v1128_v6 = vmul.f32 %v9172_v56, %v1016_v55  ;;  %v7581_v2 = vld [vmem:[#allocation8 + $0x3b0] ss:$36 sps:$4 sm:$0xff]  }
 0x223   : > { %v9459_v8 = vpop.eup %7834  ;;  %3119 = vmatmul.mubr.bf16.gmra.mrb[24].mxu1 %v9434_v53  ;;  %v1308_v5 = vadd.f32 %v9164_v28, %v1196_v17  ;;  %v1311_v57 = vadd.f32 %v9164_v28, %v1199_v22  ;;  %v1055_v31 = vmul.f32 %v9222_v14, %v11136_v61  ;;  %v1164_v59 = vmul.f32 %v9172_v56, %v1052_v18  ;;  %v7906_v61 = vld [vmem:[#allocation8 + $0x67c] ss:$36 sps:$4 sm:$0xff]  }
 0x224   : > { %3164 = vmatpush1.bf16.msra.mxu1 %v7578_v63  ;;  %v1132_v50 = vmul.f32 %v9167_v41, %v1020_v25  ;;  %v1241_v48 = vadd.f32 %v9178_v7, %v1129_v3  ;;  %v1131_v55 = vmul.f32 %v9172_v56, %v1019_v16  ;;  %v1240_v35 = vadd.f32 %v9182_v62, %v1128_v6  ;;  %v7586_v63 = vld [vmem:[#allocation8 + $0x3fc] ss:$36 sps:$4 sm:$0xff]   ;;  %v7905_v16 = vld [vmem:[#allocation8 + $0x630] ss:$36 sps:$4 sm:$0xff]  }
 0x225   : > { %v9471_v36 = vpop.eup %7836  ;;  %3165 = vmatprep.subr.bf16.mxu1 %v7583_v49  ;;  %3128 = vmatprep.mubr.bf16.mxu1 %v11094_v11  ;;  %v1023_v14 = vmul.f32 %v9459_v8, %v9039_v37  ;;  %v9476_v17 = vpack.c.bf16 %v1311_v57, %v1308_v5  ;;  %v1022_v22 = vmul.f32 %v9459_v8, %v9036_v44 }
 0x226   : > { %v1244_v18 = vadd.f32 %v9178_v7, %v1132_v50  ;;  %v1243_v25 = vadd.f32 %v9182_v62, %v1131_v55  ;;  %v1026_v3 = vmul.f32 %v9471_v36, %v9058_v51  ;;  %v1025_v49 = vmul.f32 %v9471_v36, %v9055_v58  ;;  %2959 = vmatpush1.bf16.msra.mxu0 %v7905_v16  ;;  %v7584_v55 = vld [vmem:[#allocation8 + $0x3f8] ss:$36 sps:$4 sm:$0xff]  }
 0x227   : > { %11137 = vst [vmem:[#allocation48_spill] sm:$0xff] %v9476_v17  ;;  %v9486_v6 = vpop.eup %7838  ;;  %v1135_v37 = vmul.f32 %v9167_v41, %v1023_v14  ;;  %v1134_v5 = vmul.f32 %v9172_v56, %v1022_v22  ;;  %v1167_v44 = vmul.f32 %v9172_v56, %v1055_v31  ;;  %v1276_v57 = vadd.f32 %v9182_v62, %v1164_v59  ;;  %v7589_v31 = vld [vmem:[#allocation8 + $0x444] ss:$36 sps:$4 sm:$0xff]  }
 0x228   : > { %2960 = vmatprep.subr.bf16.mxu0 %v7906_v61  ;;  %v9492_v50 = vpack.c.bf16 %v1244_v18, %v1241_v48  ;;  %v9494_v51 = vpack.c.bf16 %v1243_v25, %v1240_v35  ;;  %3166 = vmatpush1.bf16.msra.mxu1 %v7581_v2  ;;  %v1138_v58 = vmul.f32 %v9167_v41, %v1026_v3 }
 0x229   : > { %v1137_v16 = vmul.f32 %v9172_v56, %v1025_v49  ;;  %v9498_v53 = vpop.eup %7840  ;;  %v1247_v14 = vadd.f32 %v9178_v7, %v1135_v37  ;;  %3167 = vmatprep.subr.bf16.mxu1 %v7586_v63  ;;  %v1246_v59 = vadd.f32 %v9182_v62, %v1134_v5  ;;  %v1029_v48 = vmul.f32 %v9486_v6, %v9067_v39  ;;  %v7587_v49 = vld [vmem:[#allocation8 + $0x440] ss:$36 sps:$4 sm:$0xff]  }
 0x22a   : > { %v1028_v35 = vmul.f32 %v9486_v6, %v9064_v46  ;;  %2825 = vmatprep.mubr.bf16.mxu0 %v9492_v50  ;;  %v1250_v2 = vadd.f32 %v9178_v7, %v1138_v58  ;;  %v1032_v18 = vmul.f32 %v9498_v53, %v9092_v43  ;;  %v1031_v63 = vmul.f32 %v9498_v53, %v9089_v12  ;;  %v7592_v58 = vld [vmem:[#allocation8 + $0x48c] ss:$36 sps:$4 sm:$0xff]  }
 0x22b   : > { %v1249_v22 = vadd.f32 %v9182_v62, %v1137_v16  ;;  %2826 = vmatmul.mubr.bf16.gmra.mrb[16].mxu0 %v9494_v51  ;;  %3129 = vmatmul.mubr.bf16.gmra.mrb[28].mxu1 %v9476_v17  ;;  %v1141_v39 = vmul.f32 %v9167_v41, %v1029_v48  ;;  %v1279_v25 = vadd.f32 %v9182_v62, %v1167_v44 }
 0x22c   : > { %v1140_v46 = vmul.f32 %v9172_v56, %v1028_v35  ;;  %v9518_v3 = vpack.c.bf16 %v1250_v2, %v1247_v14  ;;  %3168 = vmatpush1.bf16.msra.mxu1 %v7584_v55  ;;  %3171 = vmatprep.mubr.bf16.mxu1 %v9301_v13  ;;  %v1144_v12 = vmul.f32 %v9167_v41, %v1032_v18  ;;  %v11138_v55 = vld [vmem:[#allocation28_spill] sm:$0xff] }
 0x22d   : > { %v9521_v43 = vpack.c.bf16 %v1249_v22, %v1246_v59  ;;  %3169 = vmatprep.subr.bf16.mxu1 %v7589_v31  ;;  %v1253_v37 = vadd.f32 %v9178_v7, %v1141_v39  ;;  %v1143_v5 = vmul.f32 %v9172_v56, %v1031_v63  ;;  %v9527_v16 = vpack.c.bf16 %v1279_v25, %v1276_v57  ;;  %v11139_v59 = vld [vmem:[#allocation30_spill] sm:$0xff]  ;;  %v11140_v31 = vld [vmem:[#allocation27_spill] sm:$0xff]  ;;  %v11141_v22 = vld [vmem:[#allocation29_spill] sm:$0xff] }
 0x22e   : > { %v1252_v61 = vadd.f32 %v9182_v62, %v1140_v46  ;;  %2835 = vmatprep.mubr.bf16.mxu0 %v9518_v3  ;;  %v1256_v44 = vadd.f32 %v9178_v7, %v1144_v12  ;;  %v1059_v14 = vmul.f32 %v9225_v40, %v11138_v55  ;;  %v1062_v48 = vmul.f32 %v9240_v20, %v11139_v59  ;;  %v11142_v57 = vld [vmem:[#allocation34_spill] sm:$0xff]  ;;  %v11143_v39 = vld [vmem:[#allocation37_spill] sm:$0xff] }
 0x22f   : > { %v1058_v35 = vmul.f32 %v9225_v40, %v11140_v31  ;;  %v1255_v2 = vadd.f32 %v9182_v62, %v1143_v5  ;;  %v1061_v18 = vmul.f32 %v9240_v20, %v11141_v22  ;;  %v1065_v63 = vmul.f32 %v9269_v38, %v11142_v57  ;;  %v7907_v25 = vld [vmem:[#allocation8 + $0x678] ss:$36 sps:$4 sm:$0xff]   ;;  %v7590_v20 = vld [vmem:[#allocation8 + $0x488] ss:$36 sps:$4 sm:$0xff]  }
 0x230   : > { %v1068_v46 = vmul.f32 %v9277_v4, %v11143_v39  ;;  %2961 = vmatpush1.bf16.msra.mxu0 %v7907_v25  ;;  %3170 = vmatpush1.bf16.msra.mxu1 %v7587_v49  ;;  %v9544_v12 = vpack.c.bf16 %v1256_v44, %v1253_v37  ;;  %v1171_v55 = vmul.f32 %v9167_v41, %v1059_v14  ;;  %v7595_v39 = vld [vmem:[#allocation8 + $0x4d4] ss:$36 sps:$4 sm:$0xff]  }
 0x231   : > { %v1174_v40 = vmul.f32 %v9167_v41, %v1062_v48  ;;  %v1170_v5 = vmul.f32 %v9172_v56, %v1058_v35  ;;  %v9549_v59 = vpack.c.bf16 %v1255_v2, %v1252_v61  ;;  %3332 = vmatprep.subr.bf16.mxu1 %v7592_v58  ;;  %v1173_v31 = vmul.f32 %v9172_v56, %v1061_v18  ;;  %v11144_v14 = vld [vmem:[#allocation33_spill] sm:$0xff]  ;;  %v11145_v18 = vld [vmem:[#allocation36_spill] sm:$0xff] }
 0x232   : > { %v1177_v22 = vmul.f32 %v9167_v41, %v1065_v63  ;;  %v1180_v57 = vmul.f32 %v9167_v41, %v1068_v46  ;;  %v1283_v49 = vadd.f32 %v9178_v7, %v1171_v55  ;;  %v1064_v48 = vmul.f32 %v9269_v38, %v11144_v14  ;;  %v7593_v46 = vld [vmem:[#allocation8 + $0x4d0] ss:$36 sps:$4 sm:$0xff]  }
 0x233   : > { %v1286_v37 = vadd.f32 %v9178_v7, %v1174_v40  ;;  %v1282_v44 = vadd.f32 %v9182_v62, %v1170_v5  ;;  %2836 = vmatmul.mubr.bf16.gmra.mrb[20].mxu0 %v9521_v43  ;;  %3172 = vmatmul.mubr.bf16.vlgmr.msra.gmra.mrb[32].mxu1 %v9309_v45  ;;  %v1285_v61 = vadd.f32 %v9182_v62, %v1173_v31  ;;  %v11146_v40 = vld [vmem:[#allocation40_spill] sm:$0xff]  ;;  %v11147_v31 = vld [vmem:[#allocation42_spill] sm:$0xff]  ;;  %v11149_v14 = vld [vmem:[#allocation41_spill] sm:$0xff] }
 0x234   : > { %v1289_v58 = vadd.f32 %v9178_v7, %v1177_v22  ;;  %v1292_v35 = vadd.f32 %v9178_v7, %v1180_v57  ;;  %2845 = vmatprep.mubr.bf16.mxu0 %v9544_v12  ;;  %3181 = vmatprep.mubr.bf16.mxu1 %v9342_v24  ;;  %v1067_v63 = vmul.f32 %v9277_v4, %v11145_v18  ;;  %v7598_v57 = vld [vmem:[#allocation8 + $0x51c] ss:$36 sps:$4 sm:$0xff]  }
 0x235   : > { %v9566_v2 = vpack.c.bf16 %v1286_v37, %v1283_v49  ;;  %v1176_v38 = vmul.f32 %v9172_v56, %v1064_v48  ;;  %3333 = vmatpush1.bf16.msra.mxu1 %v7590_v20  ;;  %v9571_v25 = vpack.c.bf16 %v1285_v61, %v1282_v44  ;;  %v1071_v5 = vmul.f32 %v9321_v47, %v11146_v40  ;;  %v11148_v37 = vld [vmem:[#allocation39_spill] sm:$0xff]  ;;  %v11151_v18 = vld [vmem:[#allocation54_spill] sm:$0xff] }
 0x236   : > { %v9573_v55 = vpack.c.bf16 %v1292_v35, %v1289_v58  ;;  %v1074_v22 = vmul.f32 %v9328_v21, %v11147_v31  ;;  %3334 = vmatprep.subr.bf16.mxu1 %v7595_v39  ;;  %v1179_v49 = vmul.f32 %v9172_v56, %v1067_v63  ;;  %v1070_v20 = vmul.f32 %v9321_v47, %v11148_v37  ;;  %v11150_v58 = vld [vmem:[#allocation51_spill] sm:$0xff]  ;;  %v11152_v47 = vld [vmem:[#allocation50_spill] sm:$0xff] }
 0x237   : > { %v1288_v4 = vadd.f32 %v9182_v62, %v1176_v38  ;;  %v1073_v44 = vmul.f32 %v9328_v21, %v11149_v14  ;;  %v1183_v48 = vmul.f32 %v9167_v41, %v1071_v5  ;;  %v1077_v35 = vmul.f32 %v9367_v60, %v11150_v58  ;;  %v7596_v21 = vld [vmem:[#allocation8 + $0x518] ss:$36 sps:$4 sm:$0xff]   ;;  %v7601_v58 = vld [vmem:[#allocation8 + $0x564] ss:$36 sps:$4 sm:$0xff]  }
 0x238   : > { %v1186_v61 = vmul.f32 %v9167_v41, %v1074_v22  ;;  %v1080_v39 = vmul.f32 %v9375_v9, %v11151_v18  ;;  %v1291_v63 = vadd.f32 %v9182_v62, %v1179_v49  ;;  %v1182_v38 = vmul.f32 %v9172_v56, %v1070_v20  ;;  %v11153_v18 = vld [vmem:[#allocation53_spill] sm:$0xff] }
 0x239   : > { %v1185_v40 = vmul.f32 %v9172_v56, %v1073_v44  ;;  %v1076_v31 = vmul.f32 %v9367_v60, %v11152_v47  ;;  %3335 = vmatpush1.bf16.msra.mxu1 %v7593_v46  ;;  %v1295_v5 = vadd.f32 %v9178_v7, %v1183_v48  ;;  %v1189_v37 = vmul.f32 %v9167_v41, %v1077_v35 }
 0x23a   : > { %v1298_v22 = vadd.f32 %v9178_v7, %v1186_v61  ;;  %v1192_v14 = vmul.f32 %v9167_v41, %v1080_v39  ;;  %3336 = vmatprep.subr.bf16.mxu1 %v7598_v57  ;;  %v9600_v49 = vpack.c.bf16 %v1291_v63, %v1288_v4  ;;  %v1294_v20 = vadd.f32 %v9182_v62, %v1182_v38  ;;  %v11154_v39 = vld [vmem:[#allocation63_spill] sm:$0xff] }
 0x23b   : > { %v1297_v44 = vadd.f32 %v9182_v62, %v1185_v40  ;;  %v1079_v60 = vmul.f32 %v9375_v9, %v11153_v18  ;;  %2846 = vmatmul.mubr.bf16.gmra.mrb[24].mxu0 %v9549_v59  ;;  %3182 = vmatmul.mubr.bf16.gmra.mrb[36].mxu1 %v9344_v27  ;;  %v1301_v48 = vadd.f32 %v9178_v7, %v1189_v37  ;;  %v7599_v63 = vld [vmem:[#allocation8 + $0x560] ss:$36 sps:$4 sm:$0xff]   ;;  %v11155_v40 = vld [vmem:[#allocation65_spill] sm:$0xff]  ;;  %v11157_v37 = vld [vmem:[#allocation64_spill] sm:$0xff] }
 0x23c   : > { %v9608_v46 = vpack.c.bf16 %v1298_v22, %v1295_v5  ;;  %v1304_v57 = vadd.f32 %v9178_v7, %v1192_v14  ;;  %3191 = vmatprep.mubr.bf16.mxu1 %v9386_v30  ;;  %v1188_v61 = vmul.f32 %v9172_v56, %v1076_v31  ;;  %v1083_v9 = vmul.f32 %v9411_v29, %v11154_v39  ;;  %v11156_v5 = vld [vmem:[#allocation62_spill] sm:$0xff]  ;;  %v7604_v31 = vld [vmem:[#allocation8 + $0x5ac] ss:$36 sps:$4 sm:$0xff]  }
 0x23d   : > { %v9613_v4 = vpack.c.bf16 %v1297_v44, %v1294_v20  ;;  %v1191_v35 = vmul.f32 %v9172_v56, %v1079_v60  ;;  %3337 = vmatpush1.bf16.msra.mxu1 %v7596_v21  ;;  %v1086_v47 = vmul.f32 %v9419_v33, %v11155_v40  ;;  %v1082_v22 = vmul.f32 %v9411_v29, %v11156_v5  ;;  %v11159_v29 = vld [vmem:[#allocation20_spill] sm:$0xff]  ;;  %v11160_v40 = vld [vmem:[#allocation21_spill] sm:$0xff] }
 0x23e   : > { %v9619_v38 = vpack.c.bf16 %v1304_v57, %v1301_v48  ;;  %v1085_v14 = vmul.f32 %v9419_v33, %v11157_v37  ;;  %3338 = vmatprep.subr.bf16.mxu1 %v7601_v58  ;;  %v1300_v20 = vadd.f32 %v9182_v62, %v1188_v61  ;;  %v1195_v21 = vmul.f32 %v9167_v41, %v1083_v9  ;;  %v7602_v33 = vld [vmem:[#allocation8 + $0x5a8] ss:$36 sps:$4 sm:$0xff]  }
 0x23f   : > { %v1303_v44 = vadd.f32 %v9182_v62, %v1191_v35  ;;  %v1198_v18 = vmul.f32 %v9167_v41, %v1086_v47  ;;  %v1194_v60 = vmul.f32 %v9172_v56, %v1082_v22  ;;  %v1000_v39 = vmul.f32 %v9292_v0, %v11159_v29  ;;  %v11161_v22 = vld [vmem:[#allocation46_spill] sm:$0xff]  ;;  %v11168_v29 = vld [vmem:[#allocation61_spill] sm:$0xff] }
 0x240   : > { %v1197_v48 = vmul.f32 %v9172_v56, %v1085_v14  ;;  %v1307_v58 = vadd.f32 %v9178_v7, %v1195_v21  ;;  %v1003_v47 = vmul.f32 %v9307_v34, %v11160_v40  ;;  %v1006_v37 = vmul.f32 %v9340_v23, %v11161_v22  ;;  %v11164_v14 = vld [vmem:[#allocation49_spill] sm:$0xff]  ;;  %v11166_v21 = vld [vmem:[#allocation58_spill] sm:$0xff] }
 0x241   : > { %v9633_v57 = vpack.c.bf16 %v1303_v44, %v1300_v20  ;;  %3339 = vmatpush1.bf16.msra.mxu1 %v7599_v63  ;;  %v1310_v61 = vadd.f32 %v9178_v7, %v1198_v18  ;;  %v1306_v35 = vadd.f32 %v9182_v62, %v1194_v60  ;;  %v1112_v5 = vmul.f32 %v9157_v26, %v1000_v39  ;;  %v11165_v20 = vld [vmem:[#allocation16_spill] sm:$0xff]  ;;  %v11167_v18 = vld [vmem:[#allocation18_spill] sm:$0xff] }
 0x242   : > { %v1309_v9 = vadd.f32 %v9182_v62, %v1197_v48  ;;  %3340 = vmatprep.subr.bf16.mxu1 %v7604_v31  ;;  %v1009_v44 = vmul.f32 %v11165_v20, %v11164_v14  ;;  %v1115_v31 = vmul.f32 %v9157_v26, %v1003_v47  ;;  %v1118_v34 = vmul.f32 %v9157_v26, %v1006_v37  ;;  %v11170_v47 = vld [vmem:[#allocation68_spill] sm:$0xff]  ;;  %v7607_v37 = vld [vmem:[#allocation8 + $0x5f4] ss:$36 sps:$4 sm:$0xff]  }
 0x243   : > { %11158 = vst [vmem:[#allocation47_spill] sm:$0xff] %v9633_v57  ;;  %3192 = vmatmul.mubr.bf16.gmra.mrb[40].mxu1 %v9388_v10  ;;  %v9647_v0 = vpack.c.bf16 %v1310_v61, %v1307_v58  ;;  %v1012_v60 = vmul.f32 %v11167_v18, %v11166_v21  ;;  %v1224_v23 = vadd.f32 %v9164_v28, %v1112_v5  ;;  %v11169_v58 = vld [vmem:[#allocation66_spill] sm:$0xff]  ;;  %v11171_v20 = vld [vmem:[#allocation69_spill] sm:$0xff] }
 0x244   : > { %v9649_v63 = vpack.c.bf16 %v1309_v9, %v1306_v35  ;;  %3201 = vmatprep.mubr.bf16.mxu1 %v9432_v19  ;;  %v1121_v48 = vmul.f32 %v9157_v26, %v1009_v44  ;;  %v1015_v39 = vmul.f32 %v9396_v52, %v11168_v29  ;;  %v1018_v61 = vmul.f32 %v9430_v42, %v11169_v58  ;;  %v11173_v21 = vld [vmem:[#allocation70_spill] sm:$0xff] }
 0x245   : > { %11162 = vst [vmem:[#allocation52_spill] sm:$0xff] %v9647_v0  ;;  %3341 = vmatpush1.bf16.msra.mxu1 %v7602_v33  ;;  %v1227_v35 = vadd.f32 %v9164_v28, %v1115_v31  ;;  %v1230_v9 = vadd.f32 %v9164_v28, %v1118_v34  ;;  %v1124_v40 = vmul.f32 %v9157_v26, %v1012_v60  ;;  %v7605_v33 = vld [vmem:[#allocation8 + $0x5f0] ss:$36 sps:$4 sm:$0xff]  }
 0x246   : > { %11163 = vst [vmem:[#allocation55_spill] sm:$0xff] %v9649_v63  ;;  %v1021_v22 = vmul.f32 %v9444_v15, %v11170_v47  ;;  %v1233_v5 = vadd.f32 %v9164_v28, %v1121_v48  ;;  %v1127_v14 = vmul.f32 %v9157_v26, %v1015_v39  ;;  %v1130_v52 = vmul.f32 %v9157_v26, %v1018_v61  ;;  %v11175_v39 = vld [vmem:[#allocation71_spill] sm:$0xff]  ;;  %v11176_v61 = vld [vmem:[#allocation72_spill] sm:$0xff] }
 0x247   : > { %v1024_v42 = vmul.f32 %v9459_v8, %v11171_v20  ;;  %v9674_v44 = vpack.c.bf16 %v1227_v35, %v1224_v23  ;;  %v1236_v31 = vadd.f32 %v9164_v28, %v1124_v40  ;;  %v1027_v15 = vmul.f32 %v9471_v36, %v11173_v21  ;;  %3342 = vmatprep.subr.bf16.mxu1 %v7607_v37  ;;  %v7613_v20 = vld [vmem:[#allocation8 + $0x684] ss:$36 sps:$4 sm:$0xff]  }
 0x248   : > { %v1133_v34 = vmul.f32 %v9157_v26, %v1021_v22  ;;  %v9680_v18 = vpack.c.bf16 %v1233_v5, %v1230_v9  ;;  %v1239_v60 = vadd.f32 %v9164_v28, %v1127_v14  ;;  %v1242_v48 = vadd.f32 %v9164_v28, %v1130_v52  ;;  %v7608_v14 = vld [vmem:[#allocation8 + $0x638] ss:$36 sps:$4 sm:$0xff]  }
 0x249   : > { %11172 = vst [vmem:[#allocation57_spill] sm:$0xff] %v9674_v44  ;;  %v1136_v29 = vmul.f32 %v9157_v26, %v1024_v42  ;;  %3343 = vmatpush1.bf16.msra.mxu1 %v7605_v33  ;;  %v1139_v23 = vmul.f32 %v9157_v26, %v1027_v15  ;;  %v1030_v58 = vmul.f32 %v9486_v6, %v11175_v39  ;;  %v7610_v52 = vld [vmem:[#allocation8 + $0x63c] ss:$36 sps:$4 sm:$0xff]  }
 0x24a   : > { %11174 = vst [vmem:[#allocation56_spill] sm:$0xff] %v9680_v18  ;;  %v1245_v8 = vadd.f32 %v9164_v28, %v1133_v34  ;;  %v1033_v36 = vmul.f32 %v9498_v53, %v11176_v61  ;;  %v9692_v35 = vpack.c.bf16 %v1239_v60, %v1236_v31  ;;  %3344 = vmatprep.subr.bf16.mxu1 %v7610_v52  ;;  %v7611_v42 = vld [vmem:[#allocation8 + $0x680] ss:$36 sps:$4 sm:$0xff]   ;;  %v7616_v31 = vld [vmem:[#allocation8 + $0x14] ss:$36 sps:$4 sm:$0xff]  }
 0x24b   : > { %3202 = vmatmul.mubr.bf16.gmra.mrb[44].mxu1 %v9437_v54  ;;  %v1248_v9 = vadd.f32 %v9164_v28, %v1136_v29  ;;  %v1251_v47 = vadd.f32 %v9164_v28, %v1139_v23  ;;  %v1142_v22 = vmul.f32 %v9157_v26, %v1030_v58  ;;  %3525 = vmatprep.subr.bf16.mxu0 %v7616_v31  ;;  %v11180_v39 = vld [vmem:[#allocation75_spill] sm:$0xff]  ;;  %v11181_v61 = vld [vmem:[#allocation74_spill] sm:$0xff] }
 0x24c   : > { %11177 = vst [vmem:[#allocation60_spill] sm:$0xff] %v9692_v35  ;;  %3211 = vmatprep.mubr.bf16.mxu1 %v9492_v50  ;;  %v9696_v40 = vpack.c.bf16 %v1245_v8, %v1242_v48  ;;  %v1145_v33 = vmul.f32 %v9157_v26, %v1033_v36  ;;  %v7643_v48 = vld [vmem:[#allocation8 + $0x1c] ss:$36 sps:$4 sm:$0xff]  }
 0x24d   : > { %v9701_v6 = vpack.c.bf16 %v1251_v47, %v1248_v9  ;;  %v1254_v53 = vadd.f32 %v9164_v28, %v1142_v22  ;;  %3345 = vmatpush1.bf16.msra.mxu1 %v7608_v14  ;;  %v11182_v9 = vld [vmem:[#allocation76_spill] sm:$0xff] }
 0x24e   : > { %11178 = vst [vmem:[#allocation59_spill] sm:$0xff] %v9696_v40  ;;  %v1257_v37 = vadd.f32 %v9164_v28, %v1145_v33  ;;  %3346 = vmatprep.subr.bf16.mxu1 %v7613_v20  ;;  %v11183_v33 = vld [vmem:[#allocation81_spill] sm:$0xff]  ;;  %v11184_v14 = vld [vmem:[#allocation80_spill] sm:$0xff] }
 0x24f   : > { %11179 = vst [vmem:[#allocation23_spill] sm:$0xff] %v9701_v6 }
 0x250   : > { %v9705_v5 = vpack.c.bf16 %v1257_v37, %v1254_v53 }
 0x251   : > { %3347 = vmatpush1.bf16.msra.mxu1 %v7611_v42  ;;  %v11185_v42 = vld [vmem:[#allocation82_spill] sm:$0xff] }
 0x252   : > { %3911 = vmatprep.subr.bf16.mxu1 %v7643_v48 }
 0x253   : > { %3212 = vmatmul.mubr.bf16.gmra.mrb[48].mxu1 %v9494_v51 }
 0x254   : > { %3221 = vmatprep.mubr.bf16.mxu1 %v9518_v3 }
 0x25b   : > { %3222 = vmatmul.mubr.bf16.gmra.mrb[52].mxu1 %v9521_v43 }
 0x25c   : > { %3231 = vmatprep.mubr.bf16.mxu1 %v9544_v12 }
 0x263   : > { %3232 = vmatmul.mubr.bf16.gmra.mrb[56].mxu1 %v9549_v59 }
 0x26f   : > { %v827_v34 = vpop.xlane.xlu0 %826 }
 0x270   : > { %v910_v21 = vmul.f32 0.0026041667, %v827_v34 }
 0x272   : > { %v942_v15 = vadd.f32 1e-05, %v910_v21 }
 0x273   : > { %v831_v60 = vpop.xlane.xlu1 %830 }
 0x274   : > { %7842 = vrsqrt.f32 %v942_v15  ;;  %v911_v29 = vmul.f32 0.0026041667, %v831_v60 }
 0x276   : > { %v943_v8 = vadd.f32 1e-05, %v911_v29 }
 0x278   : > { %7844 = vrsqrt.f32 %v943_v8 }
 0x27e   : > { %v7843_v23 = vpop.eup %7842 }
 0x27f   : > { %v1035_v58 = vmul.f32 %v7843_v23, %v11180_v39  ;;  %v1034_v36 = vmul.f32 %v7843_v23, %v11181_v61  ;;  %v1036_v47 = vmul.f32 %v7843_v23, %v11182_v9  ;;  %v11190_v9 = vld [vmem:[#allocation91_spill] sm:$0xff] }
 0x281   : > { %v1147_v37 = vmul.f32 %v9167_v41, %v1035_v58  ;;  %v1146_v20 = vmul.f32 %v9172_v56, %v1034_v36  ;;  %v1148_v34 = vmul.f32 %v9157_v26, %v1036_v47 }
 0x282   : > { %v7845_v22 = vpop.eup %7844 }
 0x283   : > { %v1038_v53 = vmul.f32 %v7845_v22, %v11183_v33  ;;  %v1037_v52 = vmul.f32 %v7845_v22, %v11184_v14  ;;  %v1039_v31 = vmul.f32 %v7845_v22, %v11185_v42  ;;  %v1259_v48 = vadd.f32 %v9178_v7, %v1147_v37  ;;  %v11191_v37 = vld [vmem:[#allocation32_spill] sm:$0xff]  ;;  %v11192_v14 = vld [vmem:[#allocation90_spill] sm:$0xff] }
 0x284   : > { %v1258_v8 = vadd.f32 %v9182_v62, %v1146_v20  ;;  %v1260_v39 = vadd.f32 %v9164_v28, %v1148_v34  ;;  %v11193_v20 = vld [vmem:[#allocation31_spill] sm:$0xff]  ;;  %v11194_v42 = vld [vmem:[#allocation88_spill] sm:$0xff] }
 0x285   : > { %v1150_v21 = vmul.f32 %v9167_v41, %v1038_v53  ;;  %v1149_v15 = vmul.f32 %v9172_v56, %v1037_v52  ;;  %v1151_v60 = vmul.f32 %v9157_v26, %v1039_v31  ;;  %v11187_v56 = vld [vmem:[#allocation84_spill] sm:$0xff]  ;;  %v997_v52 = vmul.f32 %v11192_v14, %v11191_v37 }
 0x286   : > { %v994_v31 = vmul.f32 %v11194_v42, %v11193_v20  ;;  %v7641_v42 = vld [vmem:[#allocation8 + $0x18] ss:$36 sps:$4 sm:$0xff]  }
 0x287   : > { %v1262_v29 = vadd.f32 %v9178_v7, %v1150_v21  ;;  %v1261_v23 = vadd.f32 %v9182_v62, %v1149_v15  ;;  %v1263_v58 = vadd.f32 %v9164_v28, %v1151_v60  ;;  %v11188_v7 = vld [vmem:[#allocation85_spill] sm:$0xff]  ;;  %v11189_v62 = vld [vmem:[#allocation87_spill] sm:$0xff]  ;;  %v1109_v15 = vmul.f32 %v9157_v26, %v997_v52 }
 0x288   : > { %v7619_v52 = vld [vmem:[#allocation8 + $0x5c] ss:$36 sps:$4 sm:$0xff]  }
 0x289   : > { %v9730_v61 = vpack.c.bf16 %v1262_v29, %v1259_v48  ;;  %v9732_v36 = vpack.c.bf16 %v1261_v23, %v1258_v8  ;;  %v9734_v41 = vpack.c.bf16 %v1263_v58, %v1260_v39  ;;  %v1106_v29 = vmul.f32 %v9157_v26, %v994_v31  ;;  %v7614_v58 = vld [vmem:[#allocation8 + $0x10] ss:$36 sps:$4 sm:$0xff]   ;;  %v7652_v31 = vld [vmem:[#allocation8 + $0x64] ss:$36 sps:$4 sm:$0xff]  }
 0x28a   : > { %v1221_v8 = vadd.f32 %v9164_v28, %v1109_v15  ;;  %v7622_v15 = vld [vmem:[#allocation8 + $0xa4] ss:$36 sps:$4 sm:$0xff]  }
 0x28b   : > { %11186 = vst [vmem:[#allocation67_spill] sm:$0xff] %v9734_v41  ;;  %2855 = vmatprep.mubr.bf16.mxu0 %v9730_v61  ;;  %3241 = vmatprep.mubr.bf16.mxu1 %v9730_v61  ;;  %v1218_v23 = vadd.f32 %v9164_v28, %v1106_v29  ;;  %v7617_v28 = vld [vmem:[#allocation8 + $0x58] ss:$36 sps:$4 sm:$0xff]   ;;  %v7650_v29 = vld [vmem:[#allocation8 + $0x60] ss:$36 sps:$4 sm:$0xff]  }
 0x28c   : > { %2856 = vmatmul.mubr.bf16.gmra.mrb[28].mxu0 %v9732_v36  ;;  %3242 = vmatmul.mubr.bf16.gmra.mrb[60].mxu1 %v9732_v36 }
 0x28d   : > { %2865 = vmatprep.mubr.bf16.mxu0 %v11187_v56  ;;  %3251 = vmatprep.mubr.bf16.mxu1 %v11187_v56  ;;  %v9802_v14 = vpack.c.bf16 %v1221_v8, %v1218_v23  ;;  %v7620_v23 = vld [vmem:[#allocation8 + $0xa0] ss:$36 sps:$4 sm:$0xff]  }
 0x28f   : > { %11195 = vst [vmem:[#allocation25_spill] sm:$0xff] %v9802_v14 }
 0x294   : > { %2866 = vmatmul.mubr.bf16.gmra.mrb[32].mxu0 %v11188_v7  ;;  %3252 = vmatmul.mubr.bf16.gmra.mrb[64].mxu1 %v11188_v7 }
 0x295   : > { %2875 = vmatprep.mubr.bf16.mxu0 %v11189_v62  ;;  %3261 = vmatprep.mubr.bf16.mxu1 %v11189_v62 }
 0x29c   : > { %2876 = vmatmul.mubr.bf16.gmra.mrb[36].mxu0 %v11190_v9  ;;  %3262 = vmatmul.mubr.bf16.gmra.mrb[68].mxu1 %v11190_v9 }
 0x29d   : > { %2885 = vmatprep.mubr.bf16.mxu0 %v9448_v32  ;;  %3271 = vmatprep.mubr.bf16.mxu1 %v9448_v32 }
 0x2a4   : > { %2886 = vmatmul.mubr.bf16.gmra.mrb[40].mxu0 %v9527_v16  ;;  %3272 = vmatmul.mubr.bf16.gmra.mrb[72].mxu1 %v9527_v16 }
 0x2a5   : > { %2895 = vmatprep.mubr.bf16.mxu0 %v9566_v2  ;;  %3281 = vmatprep.mubr.bf16.mxu1 %v9566_v2 }
 0x2ac   : > { %2896 = vmatmul.mubr.bf16.gmra.mrb[44].mxu0 %v9571_v25  ;;  %3282 = vmatmul.mubr.bf16.gmra.mrb[76].mxu1 %v9571_v25 }
 0x2ad   : > { %2905 = vmatprep.mubr.bf16.mxu0 %v9573_v55  ;;  %3291 = vmatprep.mubr.bf16.mxu1 %v9573_v55 }
 0x2b4   : > { %2906 = vmatmul.mubr.bf16.gmra.mrb[48].mxu0 %v9600_v49  ;;  %3292 = vmatmul.mubr.bf16.gmra.mrb[80].mxu1 %v9600_v49 }
 0x2b5   : > { %2915 = vmatprep.mubr.bf16.mxu0 %v9608_v46  ;;  %3301 = vmatprep.mubr.bf16.mxu1 %v9608_v46 }
 0x2bc   : > { %2916 = vmatmul.mubr.bf16.gmra.mrb[52].mxu0 %v9613_v4  ;;  %3302 = vmatmul.mubr.bf16.gmra.mrb[84].mxu1 %v9613_v4 }
 0x2bd   : > { %2925 = vmatprep.mubr.bf16.mxu0 %v9619_v38  ;;  %3311 = vmatprep.mubr.bf16.mxu1 %v9619_v38 }
 0x2c1   : > { %v9766_v47 = vpop.f32.mrb[0].mxu1 }
 0x2c2   : > { %v9768_v22 = vpop.f32.mrb[1].mxu1 }
 0x2c3   : > { %v9770_v33 = vpop.f32.mrb[2].mxu1 }
 0x2c4   : > { %2926 = vmatmul.mubr.bf16.gmra.mrb[56].mxu0 %v9633_v57  ;;  %3312 = vmatmul.mubr.bf16.gmra.mrb[88].mxu1 %v9633_v57  ;;  %v9774_v53 = vpop.f32.mrb[3].mxu1  ;;  %v7626_v57 = vld [vmem:[#allocation8 + $0x130] ss:$36 sps:$4 sm:$0xff]  }
 0x2c5   : > { %2935 = vmatprep.mubr.bf16.mxu0 %v9647_v0  ;;  %3321 = vmatprep.mubr.bf16.mxu1 %v9647_v0 }
 0x2c9   : > { %v9782_v34 = vpop.f32.mrb[4].mxu1 }
 0x2ca   : > { %v9784_v21 = vpop.f32.mrb[5].mxu1 }
 0x2cb   : > { %v9787_v60 = vpop.f32.mrb[6].mxu1 }
 0x2cc   : > { %2936 = vmatmul.mubr.bf16.gmra.mrb[60].mxu0 %v9649_v63  ;;  %3322 = vmatmul.mubr.bf16.gmra.mrb[92].mxu1 %v9649_v63  ;;  %v9791_v48 = vpop.f32.mrb[7].mxu1 }
 0x2cd   : > { %2978 = vmatprep.mubr.bf16.mxu0 %v11094_v11  ;;  %3364 = vmatprep.mubr.bf16.mxu1 %v11094_v11 }
 0x2d1   : > { %v9798_v39 = vpop.f32.mrb[8].mxu1 }
 0x2d2   : > { %v9800_v37 = vpop.f32.mrb[9].mxu1 }
 0x2d3   : > { %v9804_v20 = vpop.f32.mrb[10].mxu1 }
 0x2d4   : > { %2979 = vmatmul.mubr.bf16.vlgmr.msra.gmra.mrb[0].mxu0 %v9802_v14  ;;  %3365 = vmatmul.mubr.bf16.vlgmr.msra.gmra.mrb[32].mxu1 %v9802_v14  ;;  %v9808_v26 = vpop.f32.mrb[11].mxu1  ;;  %v7625_v14 = vld [vmem:[#allocation8 + $0xec] ss:$36 sps:$4 sm:$0xff]  }
 0x2d5   : > { %3526 = vmatpush1.bf16.msra.mxu0 %v7614_v58  ;;  %2988 = vmatprep.mubr.bf16.mxu0 %v11094_v11  ;;  %v7661_v58 = vld [vmem:[#allocation8 + $0xac] ss:$36 sps:$4 sm:$0xff]  }
 0x2d6   : > { %3527 = vmatprep.subr.bf16.mxu0 %v7619_v52  ;;  %3374 = vmatprep.mubr.bf16.mxu1 %v11094_v11 }
 0x2d7   : > { %3912 = vmatpush1.bf16.msra.mxu1 %v7641_v42  ;;  %v7659_v42 = vld [vmem:[#allocation8 + $0xa8] ss:$36 sps:$4 sm:$0xff]  }
 0x2d8   : > { %3913 = vmatprep.subr.bf16.mxu1 %v7652_v31  ;;  %v7623_v31 = vld [vmem:[#allocation8 + $0xe8] ss:$36 sps:$4 sm:$0xff]  }
 0x2d9   : > { %3528 = vmatpush1.bf16.msra.mxu0 %v7617_v28  ;;  %v7670_v28 = vld [vmem:[#allocation8 + $0xf4] ss:$36 sps:$4 sm:$0xff]  }
 0x2da   : > { %v9812_v8 = vpop.f32.mrb[12].mxu1  ;;  %3529 = vmatprep.subr.bf16.mxu0 %v7622_v15  ;;  %v7628_v15 = vld [vmem:[#allocation8 + $0x134] ss:$36 sps:$4 sm:$0xff]  }
 0x2db   : > { %v9814_v63 = vpop.f32.mrb[13].mxu1  ;;  %3914 = vmatpush1.bf16.msra.mxu1 %v7650_v29 }
 0x2dc   : > { %v9816_v0 = vpop.f32.mrb[14].mxu1  ;;  %2989 = vmatmul.mubr.bf16.gmra.mrb[4].mxu0 %v9674_v44  ;;  %3375 = vmatmul.mubr.bf16.gmra.mrb[36].mxu1 %v9674_v44 }
 0x2dd   : > { %11196 = vst [vmem:[#allocation28_spill] sm:$0xff] %v9816_v0  ;;  %v9820_v52 = vpop.f32.mrb[15].mxu1  ;;  %3530 = vmatpush1.bf16.msra.mxu0 %v7620_v23  ;;  %2998 = vmatprep.mubr.bf16.mxu0 %v11094_v11  ;;  %v7668_v0 = vld [vmem:[#allocation8 + $0xf0] ss:$36 sps:$4 sm:$0xff]  }
 0x2de   : > { %11197 = vst [vmem:[#allocation30_spill] sm:$0xff] %v9820_v52  ;;  %3531 = vmatprep.subr.bf16.mxu0 %v7625_v14  ;;  %3384 = vmatprep.mubr.bf16.mxu1 %v11094_v11  ;;  %v7631_v52 = vld [vmem:[#allocation8 + $0x17c] ss:$36 sps:$4 sm:$0xff]  }
 0x2df   : > { %3915 = vmatprep.subr.bf16.mxu1 %v7661_v58  ;;  %v7679_v58 = vld [vmem:[#allocation8 + $0x13c] ss:$36 sps:$4 sm:$0xff]  }
 0x2e0   : > { %3916 = vmatpush1.bf16.msra.mxu1 %v7659_v42  ;;  %v7629_v42 = vld [vmem:[#allocation8 + $0x178] ss:$36 sps:$4 sm:$0xff]  }
 0x2e1   : > { %3532 = vmatpush1.bf16.msra.mxu0 %v7623_v31  ;;  %3917 = vmatprep.subr.bf16.mxu1 %v7670_v28  ;;  %v7634_v31 = vld [vmem:[#allocation8 + $0x1c4] ss:$36 sps:$4 sm:$0xff]   ;;  %v7677_v28 = vld [vmem:[#allocation8 + $0x138] ss:$36 sps:$4 sm:$0xff]  }
 0x2e2   : > { %v9824_v29 = vpop.f32.mrb[16].mxu1  ;;  %3533 = vmatprep.subr.bf16.mxu0 %v7628_v15 }
 0x2e3   : > { %v9826_v44 = vpop.f32.mrb[17].mxu1 }
 0x2e4   : > { %11198 = vst [vmem:[#allocation27_spill] sm:$0xff] %v9826_v44  ;;  %v9828_v23 = vpop.f32.mrb[18].mxu1  ;;  %2999 = vmatmul.mubr.bf16.gmra.mrb[8].mxu0 %v9680_v18  ;;  %3385 = vmatmul.mubr.bf16.gmra.mrb[40].mxu1 %v9680_v18  ;;  %v7637_v18 = vld [vmem:[#allocation8 + $0x20c] ss:$36 sps:$4 sm:$0xff]  }
 0x2e5   : > { %11199 = vst [vmem:[#allocation29_spill] sm:$0xff] %v9828_v23  ;;  %v9832_v14 = vpop.f32.mrb[19].mxu1  ;;  %3534 = vmatpush1.bf16.msra.mxu0 %v7626_v57  ;;  %3008 = vmatprep.mubr.bf16.mxu0 %v11094_v11  ;;  %v7632_v23 = vld [vmem:[#allocation8 + $0x1c0] ss:$36 sps:$4 sm:$0xff]  }
 0x2e6   : > { %11200 = vst [vmem:[#allocation34_spill] sm:$0xff] %v9832_v14  ;;  %3535 = vmatprep.subr.bf16.mxu0 %v7631_v52  ;;  %3394 = vmatprep.mubr.bf16.mxu1 %v11094_v11  ;;  %v7682_v57 = vld [vmem:[#allocation8 + $0x184] ss:$36 sps:$4 sm:$0xff]  }
 0x2e7   : > { %3918 = vmatpush1.bf16.msra.mxu1 %v7668_v0  ;;  %v7680_v0 = vld [vmem:[#allocation8 + $0x180] ss:$36 sps:$4 sm:$0xff]  }
 0x2e8   : > { %3919 = vmatprep.subr.bf16.mxu1 %v7679_v58  ;;  %v7635_v58 = vld [vmem:[#allocation8 + $0x208] ss:$36 sps:$4 sm:$0xff]  }
 0x2e9   : > { %3536 = vmatpush1.bf16.msra.mxu0 %v7629_v42  ;;  %v7688_v42 = vld [vmem:[#allocation8 + $0x1cc] ss:$36 sps:$4 sm:$0xff]  }
 0x2ea   : > { %3537 = vmatprep.subr.bf16.mxu0 %v7634_v31  ;;  %v7640_v31 = vld [vmem:[#allocation8 + $0x254] ss:$36 sps:$4 sm:$0xff]  }
 0x2eb   : > { %3920 = vmatpush1.bf16.msra.mxu1 %v7677_v28 }
 0x2ec   : > { %v9836_v15 = vpop.f32.mrb[20].mxu1  ;;  %3009 = vmatmul.mubr.bf16.gmra.mrb[12].mxu0 %v9692_v35  ;;  %3395 = vmatmul.mubr.bf16.gmra.mrb[44].mxu1 %v9692_v35 }
 0x2ed   : > { %v9838_v44 = vpop.f32.mrb[21].mxu1  ;;  %3538 = vmatpush1.bf16.msra.mxu0 %v7632_v23  ;;  %3018 = vmatprep.mubr.bf16.mxu0 %v11094_v11 }
 0x2ee   : > { %11201 = vst [vmem:[#allocation37_spill] sm:$0xff] %v9838_v44  ;;  %v9840_v14 = vpop.f32.mrb[22].mxu1  ;;  %3539 = vmatprep.subr.bf16.mxu0 %v7637_v18  ;;  %3404 = vmatprep.mubr.bf16.mxu1 %v11094_v11  ;;  %v7686_v44 = vld [vmem:[#allocation8 + $0x1c8] ss:$36 sps:$4 sm:$0xff]  }
 0x2ef   : > { %11202 = vst [vmem:[#allocation33_spill] sm:$0xff] %v9840_v14  ;;  %v9844_v52 = vpop.f32.mrb[23].mxu1  ;;  %3921 = vmatprep.subr.bf16.mxu1 %v7682_v57  ;;  %v7638_v14 = vld [vmem:[#allocation8 + $0x250] ss:$36 sps:$4 sm:$0xff]  }
 0x2f0   : > { %11203 = vst [vmem:[#allocation36_spill] sm:$0xff] %v9844_v52  ;;  %3922 = vmatpush1.bf16.msra.mxu1 %v7680_v0  ;;  %v7646_v52 = vld [vmem:[#allocation8 + $0x29c] ss:$36 sps:$4 sm:$0xff]   ;;  %v7691_v57 = vld [vmem:[#allocation8 + $0x214] ss:$36 sps:$4 sm:$0xff]  }
 0x2f1   : > { %3540 = vmatpush1.bf16.msra.mxu0 %v7635_v58  ;;  %3923 = vmatprep.subr.bf16.mxu1 %v7688_v42  ;;  %v7644_v0 = vld [vmem:[#allocation8 + $0x298] ss:$36 sps:$4 sm:$0xff]   ;;  %v7649_v58 = vld [vmem:[#allocation8 + $0x2e4] ss:$36 sps:$4 sm:$0xff]   ;;  %v7689_v42 = vld [vmem:[#allocation8 + $0x210] ss:$36 sps:$4 sm:$0xff]  }
 0x2f2   : > { %3541 = vmatprep.subr.bf16.mxu0 %v7640_v31 }
 0x2f4   : > { %3019 = vmatmul.mubr.bf16.gmra.mrb[16].mxu0 %v9696_v40  ;;  %3405 = vmatmul.mubr.bf16.gmra.mrb[48].mxu1 %v9696_v40  ;;  %v7655_v40 = vld [vmem:[#allocation8 + $0x32c] ss:$36 sps:$4 sm:$0xff]  }
 0x2f5   : > { %3542 = vmatpush1.bf16.msra.mxu0 %v7638_v14  ;;  %3028 = vmatprep.mubr.bf16.mxu0 %v11094_v11  ;;  %v7697_v14 = vld [vmem:[#allocation8 + $0x25c] ss:$36 sps:$4 sm:$0xff]  }
 0x2f6   : > { %v9848_v28 = vpop.f32.mrb[24].mxu1  ;;  %3543 = vmatprep.subr.bf16.mxu0 %v7646_v52  ;;  %3414 = vmatprep.mubr.bf16.mxu1 %v11094_v11 }
 0x2f7   : > { %v9850_v35 = vpop.f32.mrb[25].mxu1  ;;  %3924 = vmatpush1.bf16.msra.mxu1 %v7686_v44  ;;  %v7695_v44 = vld [vmem:[#allocation8 + $0x258] ss:$36 sps:$4 sm:$0xff]  }
 0x2f8   : > { %11204 = vst [vmem:[#allocation40_spill] sm:$0xff] %v9850_v35  ;;  %v9852_v23 = vpop.f32.mrb[26].mxu1  ;;  %3925 = vmatprep.subr.bf16.mxu1 %v7691_v57  ;;  %v7653_v57 = vld [vmem:[#allocation8 + $0x328] ss:$36 sps:$4 sm:$0xff]  }
 0x2f9   : > { %11205 = vst [vmem:[#allocation42_spill] sm:$0xff] %v9852_v23  ;;  %v9856_v18 = vpop.f32.mrb[27].mxu1  ;;  %3544 = vmatpush1.bf16.msra.mxu0 %v7644_v0  ;;  %v7647_v23 = vld [vmem:[#allocation8 + $0x2e0] ss:$36 sps:$4 sm:$0xff]  }
 0x2fa   : > { %11206 = vst [vmem:[#allocation39_spill] sm:$0xff] %v9856_v18  ;;  %3545 = vmatprep.subr.bf16.mxu0 %v7649_v58  ;;  %v7700_v0 = vld [vmem:[#allocation8 + $0x2a4] ss:$36 sps:$4 sm:$0xff]   ;;  %v7658_v58 = vld [vmem:[#allocation8 + $0x374] ss:$36 sps:$4 sm:$0xff]  }
 0x2fb   : > { %3926 = vmatpush1.bf16.msra.mxu1 %v7689_v42  ;;  %v7656_v42 = vld [vmem:[#allocation8 + $0x370] ss:$36 sps:$4 sm:$0xff]  }
 0x2fc   : > { %3029 = vmatmul.mubr.bf16.gmra.mrb[20].mxu0 %v9701_v6  ;;  %3415 = vmatmul.mubr.bf16.gmra.mrb[52].mxu1 %v9701_v6  ;;  %v7698_v6 = vld [vmem:[#allocation8 + $0x2a0] ss:$36 sps:$4 sm:$0xff]  }
 0x2fd   : > { %3546 = vmatpush1.bf16.msra.mxu0 %v7647_v23  ;;  %3038 = vmatprep.mubr.bf16.mxu0 %v11094_v11  ;;  %v7703_v23 = vld [vmem:[#allocation8 + $0x2ec] ss:$36 sps:$4 sm:$0xff]  }
 0x2fe   : > { %v9860_v31 = vpop.f32.mrb[28].mxu1  ;;  %3547 = vmatprep.subr.bf16.mxu0 %v7655_v40  ;;  %3424 = vmatprep.mubr.bf16.mxu1 %v11094_v11  ;;  %v7667_v40 = vld [vmem:[#allocation8 + $0x404] ss:$36 sps:$4 sm:$0xff]  }
 0x2ff   : > { %v9862_v35 = vpop.f32.mrb[29].mxu1  ;;  %3927 = vmatprep.subr.bf16.mxu1 %v7697_v14  ;;  %v7701_v14 = vld [vmem:[#allocation8 + $0x2e8] ss:$36 sps:$4 sm:$0xff]  }
 0x300   : > { %v9864_v18 = vpop.f32.mrb[30].mxu1  ;;  %3928 = vmatpush1.bf16.msra.mxu1 %v7695_v44  ;;  %v7665_v44 = vld [vmem:[#allocation8 + $0x400] ss:$36 sps:$4 sm:$0xff]  }
 0x301   : > { %11207 = vst [vmem:[#allocation41_spill] sm:$0xff] %v9864_v18  ;;  %v9868_v52 = vpop.f32.mrb[31].mxu1  ;;  %3548 = vmatpush1.bf16.msra.mxu0 %v7653_v57  ;;  %3929 = vmatprep.subr.bf16.mxu1 %v7700_v0  ;;  %v7664_v18 = vld [vmem:[#allocation8 + $0x3bc] ss:$36 sps:$4 sm:$0xff]   ;;  %v7673_v57 = vld [vmem:[#allocation8 + $0x44c] ss:$36 sps:$4 sm:$0xff]  }
 0x302   : > { %11208 = vst [vmem:[#allocation51_spill] sm:$0xff] %v9868_v52  ;;  %3549 = vmatprep.subr.bf16.mxu0 %v7658_v58  ;;  %v7662_v52 = vld [vmem:[#allocation8 + $0x3b8] ss:$36 sps:$4 sm:$0xff]   ;;  %v7704_v58 = vld [vmem:[#allocation8 + $0x330] ss:$36 sps:$4 sm:$0xff]  }
 0x303   : > { %v7706_v0 = vld [vmem:[#allocation8 + $0x334] ss:$36 sps:$4 sm:$0xff]  }
 0x304   : > { %3039 = vmatmul.mubr.bf16.gmra.mrb[24].mxu0 %v9705_v5  ;;  %3425 = vmatmul.mubr.bf16.gmra.mrb[56].mxu1 %v9705_v5 }
 0x305   : > { %3550 = vmatpush1.bf16.msra.mxu0 %v7656_v42  ;;  %3048 = vmatprep.mubr.bf16.mxu0 %v11094_v11  ;;  %v7712_v42 = vld [vmem:[#allocation8 + $0x37c] ss:$36 sps:$4 sm:$0xff]  }
 0x306   : > { %3551 = vmatprep.subr.bf16.mxu0 %v7664_v18  ;;  %3434 = vmatprep.mubr.bf16.mxu1 %v11094_v11  ;;  %v7671_v18 = vld [vmem:[#allocation8 + $0x448] ss:$36 sps:$4 sm:$0xff]  }
 0x307   : > { %3930 = vmatpush1.bf16.msra.mxu1 %v7698_v6  ;;  %v7676_v6 = vld [vmem:[#allocation8 + $0x494] ss:$36 sps:$4 sm:$0xff]  }
 0x308   : > { %3931 = vmatprep.subr.bf16.mxu1 %v7703_v23  ;;  %v7685_v23 = vld [vmem:[#allocation8 + $0x4dc] ss:$36 sps:$4 sm:$0xff]  }
 0x309   : > { %3552 = vmatpush1.bf16.msra.mxu0 %v7662_v52  ;;  %v7674_v52 = vld [vmem:[#allocation8 + $0x490] ss:$36 sps:$4 sm:$0xff]  }
 0x30a   : > { %3553 = vmatprep.subr.bf16.mxu0 %v7667_v40  ;;  %v7710_v40 = vld [vmem:[#allocation8 + $0x378] ss:$36 sps:$4 sm:$0xff]  }
 0x30b   : > { %3932 = vmatpush1.bf16.msra.mxu1 %v7701_v14  ;;  %v11209_v14 = vld [vmem:[#allocation83_spill] sm:$0xff] }
 0x30c   : > { %3049 = vmatmul.mubr.bf16.gmra.mrb[28].mxu0 %v9734_v41  ;;  %3435 = vmatmul.mubr.bf16.gmra.mrb[60].mxu1 %v9734_v41  ;;  %v11210_v41 = vld [vmem:[#allocation86_spill] sm:$0xff] }
 0x30d   : > { %3554 = vmatpush1.bf16.msra.mxu0 %v7665_v44  ;;  %3557 = vmatprep.mubr.bf16.mxu0 %v9301_v13  ;;  %v7715_v44 = vld [vmem:[#allocation8 + $0x3c4] ss:$36 sps:$4 sm:$0xff]  }
 0x30e   : > { %3555 = vmatprep.subr.bf16.mxu0 %v7673_v57  ;;  %3444 = vmatprep.mubr.bf16.mxu1 %v11094_v11  ;;  %v7683_v57 = vld [vmem:[#allocation8 + $0x4d8] ss:$36 sps:$4 sm:$0xff]  }
 0x30f   : > { %3933 = vmatprep.subr.bf16.mxu1 %v7706_v0  ;;  %v7694_v0 = vld [vmem:[#allocation8 + $0x524] ss:$36 sps:$4 sm:$0xff]  }
 0x310   : > { %3934 = vmatpush1.bf16.msra.mxu1 %v7704_v58  ;;  %v7713_v58 = vld [vmem:[#allocation8 + $0x3c0] ss:$36 sps:$4 sm:$0xff]  }
 0x311   : > { %3556 = vmatpush1.bf16.msra.mxu0 %v7671_v18  ;;  %3935 = vmatprep.subr.bf16.mxu1 %v7712_v42  ;;  %v7692_v18 = vld [vmem:[#allocation8 + $0x520] ss:$36 sps:$4 sm:$0xff]   ;;  %v7718_v42 = vld [vmem:[#allocation8 + $0x40c] ss:$36 sps:$4 sm:$0xff]  }
 0x312   : > { %3718 = vmatprep.subr.bf16.mxu0 %v7676_v6  ;;  %v7709_v6 = vld [vmem:[#allocation8 + $0x56c] ss:$36 sps:$4 sm:$0xff]  }
 0x314   : > { %3445 = vmatmul.mubr.bf16.gmra.mrb[64].mxu1 %v11209_v14  ;;  %3558 = vmatmul.mubr.bf16.vlgmr.msra.gmra.mrb[64].mxu0 %v9309_v45  ;;  %v7716_v14 = vld [vmem:[#allocation8 + $0x408] ss:$36 sps:$4 sm:$0xff]  }
 0x315   : > { %3719 = vmatpush1.bf16.msra.mxu0 %v7674_v52  ;;  %3567 = vmatprep.mubr.bf16.mxu0 %v9342_v24  ;;  %v7721_v52 = vld [vmem:[#allocation8 + $0x454] ss:$36 sps:$4 sm:$0xff]  }
 0x316   : > { %3454 = vmatprep.mubr.bf16.mxu1 %v11094_v11  ;;  %3720 = vmatprep.subr.bf16.mxu0 %v7685_v23  ;;  %v7707_v23 = vld [vmem:[#allocation8 + $0x568] ss:$36 sps:$4 sm:$0xff]  }
 0x317   : > { %3936 = vmatpush1.bf16.msra.mxu1 %v7710_v40  ;;  %v7719_v40 = vld [vmem:[#allocation8 + $0x450] ss:$36 sps:$4 sm:$0xff]  }
 0x318   : > { %3937 = vmatprep.subr.bf16.mxu1 %v7715_v44  ;;  %v7724_v44 = vld [vmem:[#allocation8 + $0x5b4] ss:$36 sps:$4 sm:$0xff]  }
 0x319   : > { %3721 = vmatpush1.bf16.msra.mxu0 %v7683_v57  ;;  %v7722_v57 = vld [vmem:[#allocation8 + $0x5b0] ss:$36 sps:$4 sm:$0xff]  }
 0x31a   : > { %3722 = vmatprep.subr.bf16.mxu0 %v7694_v0  ;;  %v7733_v0 = vld [vmem:[#allocation8 + $0x49c] ss:$36 sps:$4 sm:$0xff]  }
 0x31b   : > { %3938 = vmatpush1.bf16.msra.mxu1 %v7713_v58  ;;  %v7727_v58 = vld [vmem:[#allocation8 + $0x5fc] ss:$36 sps:$4 sm:$0xff]  }
 0x31c   : > { %3455 = vmatmul.mubr.bf16.gmra.mrb[68].mxu1 %v11210_v41  ;;  %3568 = vmatmul.mubr.bf16.gmra.mrb[68].mxu0 %v9344_v27  ;;  %v11211_v41 = vld [vmem:[#allocation89_spill] sm:$0xff] }
 0x31d   : > { %3577 = vmatprep.mubr.bf16.mxu0 %v9386_v30  ;;  %3464 = vmatprep.mubr.bf16.mxu1 %v11094_v11 }
 0x31e   : > { %3723 = vmatpush1.bf16.msra.mxu0 %v7692_v18  ;;  %3939 = vmatprep.subr.bf16.mxu1 %v7718_v42  ;;  %v7725_v18 = vld [vmem:[#allocation8 + $0x5f8] ss:$36 sps:$4 sm:$0xff]   ;;  %v7728_v42 = vld [vmem:[#allocation8 + $0x640] ss:$36 sps:$4 sm:$0xff]  }
 0x31f   : > { %3724 = vmatprep.subr.bf16.mxu0 %v7709_v6  ;;  %3940 = vmatpush1.bf16.msra.mxu1 %v7716_v14  ;;  %v7730_v14 = vld [vmem:[#allocation8 + $0x644] ss:$36 sps:$4 sm:$0xff]   ;;  %v7736_v6 = vld [vmem:[#allocation8 + $0x68c] ss:$36 sps:$4 sm:$0xff]  }
 0x320   : > { %3941 = vmatprep.subr.bf16.mxu1 %v7721_v52  ;;  %v11212_v52 = vld [vmem:[#allocation92_spill] sm:$0xff] }
 0x322   : > { %3725 = vmatpush1.bf16.msra.mxu0 %v7707_v23  ;;  %v7734_v23 = vld [vmem:[#allocation8 + $0x688] ss:$36 sps:$4 sm:$0xff]  }
 0x323   : > { %3942 = vmatpush1.bf16.msra.mxu1 %v7719_v40  ;;  %3726 = vmatprep.subr.bf16.mxu0 %v7724_v44  ;;  %v7743_v40 = vld [vmem:[#allocation8 + $0x260] ss:$36 sps:$4 sm:$0xff]  }
 0x324   : > { %3465 = vmatmul.mubr.bf16.gmra.mrb[72].mxu1 %v11211_v41  ;;  %3578 = vmatmul.mubr.bf16.gmra.mrb[72].mxu0 %v9388_v10  ;;  %v11213_v44 = vld [vmem:[#allocation38_spill] sm:$0xff] }
 0x325   : > { %3587 = vmatprep.mubr.bf16.mxu0 %v9432_v19  ;;  %3474 = vmatprep.mubr.bf16.mxu1 %v11094_v11 }
 0x326   : > { %3727 = vmatpush1.bf16.msra.mxu0 %v7722_v57  ;;  %4104 = vmatprep.subr.bf16.mxu1 %v7733_v0  ;;  %v11214_v57 = vld [vmem:[#allocation44_spill] sm:$0xff]  ;;  %v7731_v0 = vld [vmem:[#allocation8 + $0x498] ss:$36 sps:$4 sm:$0xff]  }
 0x327   : > { %3728 = vmatprep.subr.bf16.mxu0 %v7727_v58  ;;  %v7739_v58 = vld [vmem:[#allocation8 + $0x4e4] ss:$36 sps:$4 sm:$0xff]  }
 0x32a   : > { %3729 = vmatpush1.bf16.msra.mxu0 %v7725_v18  ;;  %v7737_v18 = vld [vmem:[#allocation8 + $0x4e0] ss:$36 sps:$4 sm:$0xff]  }
 0x32b   : > { %3730 = vmatprep.subr.bf16.mxu0 %v7730_v14  ;;  %v7742_v14 = vld [vmem:[#allocation8 + $0x52c] ss:$36 sps:$4 sm:$0xff]  }
 0x32c   : > { %3475 = vmatmul.mubr.bf16.gmra.mrb[76].mxu1 %v11212_v52  ;;  %3588 = vmatmul.mubr.bf16.gmra.mrb[76].mxu0 %v9437_v54 }
 0x32d   : > { %3597 = vmatprep.mubr.bf16.mxu0 %v9492_v50  ;;  %3484 = vmatprep.mubr.bf16.mxu1 %v11094_v11 }
 0x32e   : > { %3731 = vmatpush1.bf16.msra.mxu0 %v7728_v42  ;;  %v7740_v42 = vld [vmem:[#allocation8 + $0x528] ss:$36 sps:$4 sm:$0xff]  }
 0x32f   : > { %3732 = vmatprep.subr.bf16.mxu0 %v7736_v6  ;;  %v7747_v6 = vld [vmem:[#allocation8 + $0x574] ss:$36 sps:$4 sm:$0xff]  }
 0x332   : > { %3733 = vmatpush1.bf16.msra.mxu0 %v7734_v23  ;;  %v7745_v23 = vld [vmem:[#allocation8 + $0x570] ss:$36 sps:$4 sm:$0xff]  }
 0x333   : > { %6627 = vmatprep.subr.bf16.mxu0 %v7743_v40  ;;  %v7752_v40 = vld [vmem:[#allocation8 + $0x5bc] ss:$36 sps:$4 sm:$0xff]  }
 0x334   : > { %3485 = vmatmul.mubr.bf16.gmra.mrb[80].mxu1 %v11213_v44  ;;  %3598 = vmatmul.mubr.bf16.gmra.mrb[80].mxu0 %v9494_v51 }
 0x335   : > { %3607 = vmatprep.mubr.bf16.mxu0 %v9518_v3  ;;  %3494 = vmatprep.mubr.bf16.mxu1 %v11094_v11 }
 0x33c   : > { %3495 = vmatmul.mubr.bf16.gmra.mrb[84].mxu1 %v9380_v1  ;;  %3608 = vmatmul.mubr.bf16.gmra.mrb[84].mxu0 %v9521_v43 }
 0x33d   : > { %3617 = vmatprep.mubr.bf16.mxu0 %v9544_v12  ;;  %3504 = vmatprep.mubr.bf16.mxu1 %v11094_v11 }
 0x344   : > { %3505 = vmatmul.mubr.bf16.gmra.mrb[88].mxu1 %v11214_v57  ;;  %3618 = vmatmul.mubr.bf16.gmra.mrb[88].mxu0 %v9549_v59 }
 0x345   : > { %3627 = vmatprep.mubr.bf16.mxu0 %v9730_v61  ;;  %3514 = vmatprep.mubr.bf16.mxu1 %v11094_v11 }
 0x34c   : > { %3515 = vmatmul.mubr.bf16.gmra.mrb[92].mxu1 %v9476_v17  ;;  %3628 = vmatmul.mubr.bf16.gmra.mrb[92].mxu0 %v9732_v36 }
 0x34d   : > { %3637 = vmatprep.mubr.bf16.mxu0 %v11187_v56  ;;  %3943 = vmatprep.mubr.bf16.mxu1 %v9301_v13 }
 0x354   : > { %3638 = vmatmul.mubr.bf16.gmra.mrb[96].mxu0 %v11188_v7  ;;  %3944 = vmatmul.mubr.bf16.vlgmr.msra.gmra.mrb[96].mxu1 %v9309_v45 }
 0x355   : > { %3647 = vmatprep.mubr.bf16.mxu0 %v11189_v62  ;;  %3953 = vmatprep.mubr.bf16.mxu1 %v9342_v24 }
 0x356   : > { %4105 = vmatpush1.bf16.msra.mxu1 %v7731_v0  ;;  %v9920_v0 = vld [vmem:[#allocation10] sm:$0xff] }
 0x357   : > { %4106 = vmatprep.subr.bf16.mxu1 %v7739_v58  ;;  %v7750_v58 = vld [vmem:[#allocation8 + $0x5b8] ss:$36 sps:$4 sm:$0xff]  }
 0x35a   : > { %4107 = vmatpush1.bf16.msra.mxu1 %v7737_v18  ;;  %v7757_v18 = vld [vmem:[#allocation8 + $0x604] ss:$36 sps:$4 sm:$0xff]  }
 0x35b   : > { %4108 = vmatprep.subr.bf16.mxu1 %v7742_v14  ;;  %v11215_v14 = vld [vmem:[#allocation79_spill] sm:$0xff] }
 0x35c   : > { %3648 = vmatmul.mubr.bf16.gmra.mrb[100].mxu0 %v11190_v9  ;;  %3954 = vmatmul.mubr.bf16.gmra.mrb[100].mxu1 %v9344_v27  ;;  %v9926_v27 = vrot.slane %v9920_v0, %v11215_v14 }
 0x35d   : > { %3657 = vmatprep.mubr.bf16.mxu0 %v9448_v32  ;;  %3963 = vmatprep.mubr.bf16.mxu1 %v9386_v30  ;;  %v7762_v30 = vld [vmem:[#allocation8 + $0x64c] ss:$36 sps:$4 sm:$0xff]  }
 0x35e   : > { %4109 = vmatpush1.bf16.msra.mxu1 %v7740_v42  ;;  %v11216_v42 = vld [vmem:[#allocation78_spill] sm:$0xff] }
 0x35f   : > { %4110 = vmatprep.subr.bf16.mxu1 %v7747_v6  ;;  %v9932_v6 = vrot.slane %v9920_v0, %v11216_v42  ;;  %v7760_v42 = vld [vmem:[#allocation8 + $0x648] ss:$36 sps:$4 sm:$0xff]  }
 0x362   : > { %4111 = vmatpush1.bf16.msra.mxu1 %v7745_v23  ;;  %v7755_v23 = vld [vmem:[#allocation8 + $0x600] ss:$36 sps:$4 sm:$0xff]  }
 0x363   : > { %4112 = vmatprep.subr.bf16.mxu1 %v7752_v40 }
 0x364   : > { %3658 = vmatmul.mubr.bf16.gmra.mrb[104].mxu0 %v9527_v16  ;;  %3964 = vmatmul.mubr.bf16.gmra.mrb[104].mxu1 %v9388_v10 }
 0x365   : > { %3667 = vmatprep.mubr.bf16.mxu0 %v9566_v2  ;;  %3973 = vmatprep.mubr.bf16.mxu1 %v9432_v19 }
 0x366   : > { %4113 = vmatpush1.bf16.msra.mxu1 %v7750_v58 }
 0x367   : > { %v2867_v40 = vpop.f32.mrb[32].mxu0  ;;  %4114 = vmatprep.subr.bf16.mxu1 %v7757_v18  ;;  %v7765_v18 = vld [vmem:[#allocation8 + $0x694] ss:$36 sps:$4 sm:$0xff]  }
 0x368   : > { %v2868_v24 = vadd.f32 %v2867_v40, %v9926_v27  ;;  %v2869_v10 = vpop.f32.mrb[33].mxu0 }
 0x369   : > { %v2870_v45 = vadd.f32 %v2869_v10, %v9932_v6  ;;  %v2871_v14 = vpop.f32.mrb[34].mxu0 }
 0x36a   : > { %v3061_v13 = vadd.f32 %v9766_v47, %v2868_v24  ;;  %v2872_v19 = vadd.f32 %v2871_v14, %v9926_v27  ;;  %v2873_v17 = vpop.f32.mrb[35].mxu0  ;;  %4115 = vmatpush1.bf16.msra.mxu1 %v7755_v23 }
 0x36b   : > { %v3063_v58 = vadd.f32 %v9768_v22, %v2870_v45  ;;  %v2874_v57 = vadd.f32 %v2873_v17, %v9932_v6  ;;  %4116 = vmatprep.subr.bf16.mxu1 %v7762_v30  ;;  %v7763_v45 = vld [vmem:[#allocation8 + $0x690] ss:$36 sps:$4 sm:$0xff]  }
 0x36c   : > { %v4667_v1 = vmul.f32 0.125, %v3061_v13  ;;  %v3065_v40 = vadd.f32 %v9770_v33, %v2872_v19  ;;  %3668 = vmatmul.mubr.bf16.gmra.mrb[108].mxu0 %v9571_v25  ;;  %3974 = vmatmul.mubr.bf16.gmra.mrb[108].mxu1 %v9437_v54 }
 0x36d   : > { %v4668_v24 = vmul.f32 0.125, %v3063_v58  ;;  %v3067_v10 = vadd.f32 %v9774_v53, %v2874_v57  ;;  %3677 = vmatprep.mubr.bf16.mxu0 %v9573_v55  ;;  %3983 = vmatprep.mubr.bf16.mxu1 %v9492_v50 }
 0x36e   : > { %v4670_v47 = vmul.f32 0.125, %v3065_v40  ;;  %4117 = vmatpush1.bf16.msra.mxu1 %v7760_v42 }
 0x36f   : > { %v6467_v17 = vpack.c.bf16 %v4668_v24, %v4667_v1  ;;  %v4671_v30 = vmul.f32 0.125, %v3067_v10  ;;  %v2877_v22 = vpop.f32.mrb[36].mxu0  ;;  %4118 = vmatprep.subr.bf16.mxu1 %v7765_v18 }
 0x370   : > { %v2878_v13 = vadd.f32 %v2877_v22, %v9926_v27  ;;  %v2879_v19 = vpop.f32.mrb[37].mxu0 }
 0x371   : > { %5067 = vst [vmem:[%s9948_s28 + $0x240] sm:$0xff] %v6467_v17  ;;  %v6469_v33 = vpack.c.bf16 %v4671_v30, %v4670_v47  ;;  %v2880_v53 = vadd.f32 %v2879_v19, %v9932_v6  ;;  %v2881_v57 = vpop.f32.mrb[38].mxu0 }
 0x372   : > { %v3071_v23 = vadd.f32 %v9782_v34, %v2878_v13  ;;  %v2882_v14 = vadd.f32 %v2881_v57, %v9926_v27  ;;  %v2883_v1 = vpop.f32.mrb[39].mxu0  ;;  %4119 = vmatpush1.bf16.msra.mxu1 %v7763_v45 }
 0x373   : > { %5069 = vst [vmem:[%s9948_s28 + $0x264] sm:$0xff] %v6469_v33  ;;  %v3073_v42 = vadd.f32 %v9784_v21, %v2880_v53  ;;  %v2884_v58 = vadd.f32 %v2883_v1, %v9932_v6 }
 0x374   : > { %v4673_v18 = vmul.f32 0.125, %v3071_v23  ;;  %v3075_v40 = vadd.f32 %v9787_v60, %v2882_v14  ;;  %3678 = vmatmul.mubr.bf16.gmra.mrb[112].mxu0 %v9600_v49  ;;  %3984 = vmatmul.mubr.bf16.gmra.mrb[112].mxu1 %v9494_v51  ;;  %v9964_v60 = vld [vmem:[#allocation8 + $0x4a0] ss:$36 sps:$4 sm:$0xff]  }
 0x375   : > { %v4674_v24 = vmul.f32 0.125, %v3073_v42  ;;  %v3077_v34 = vadd.f32 %v9791_v48, %v2884_v58  ;;  %3687 = vmatprep.mubr.bf16.mxu0 %v9608_v46  ;;  %3993 = vmatprep.mubr.bf16.mxu1 %v9518_v3 }
 0x376   : > { %v4676_v10 = vmul.f32 0.125, %v3075_v40  ;;  %6827 = vmatprep.subr.bf16.mxu1 %v9964_v60 }
 0x377   : > { %v6471_v21 = vpack.c.bf16 %v4674_v24, %v4673_v18  ;;  %v4677_v47 = vmul.f32 0.125, %v3077_v34  ;;  %v2887_v45 = vpop.f32.mrb[40].mxu0 }
 0x378   : > { %v2888_v17 = vadd.f32 %v2887_v45, %v9926_v27  ;;  %v2889_v30 = vpop.f32.mrb[41].mxu0 }
 0x379   : > { %5071 = vst [vmem:[%s9948_s28 + $0x288] sm:$0xff] %v6471_v21  ;;  %v6473_v22 = vpack.c.bf16 %v4677_v47, %v4676_v10  ;;  %v2890_v13 = vadd.f32 %v2889_v30, %v9932_v6  ;;  %v2891_v19 = vpop.f32.mrb[42].mxu0 }
 0x37a   : > { %v3081_v48 = vadd.f32 %v9798_v39, %v2888_v17  ;;  %v2892_v33 = vadd.f32 %v2891_v19, %v9926_v27  ;;  %v2893_v53 = vpop.f32.mrb[43].mxu0 }
 0x37b   : > { %5073 = vst [vmem:[%s9948_s28 + $0x2ac] sm:$0xff] %v6473_v22  ;;  %v3083_v57 = vadd.f32 %v9800_v37, %v2890_v13  ;;  %v2894_v23 = vadd.f32 %v2893_v53, %v9932_v6  ;;  %v11217_v13 = vld [vmem:[#allocation28_spill] sm:$0xff]  ;;  %v11219_v53 = vld [vmem:[#allocation30_spill] sm:$0xff] }
 0x37c   : > { %v4679_v14 = vmul.f32 0.125, %v3081_v48  ;;  %v3085_v1 = vadd.f32 %v9804_v20, %v2892_v33  ;;  %3688 = vmatmul.mubr.bf16.gmra.mrb[116].mxu0 %v9613_v4  ;;  %3994 = vmatmul.mubr.bf16.gmra.mrb[116].mxu1 %v9521_v43  ;;  %v11218_v48 = vld [vmem:[#allocation47_spill] sm:$0xff] }
 0x37d   : > { %v4680_v42 = vmul.f32 0.125, %v3083_v57  ;;  %v3087_v39 = vadd.f32 %v9808_v26, %v2894_v23  ;;  %3697 = vmatprep.mubr.bf16.mxu0 %v9619_v38  ;;  %4003 = vmatprep.mubr.bf16.mxu1 %v9544_v12 }
 0x37e   : > { %v4682_v58 = vmul.f32 0.125, %v3085_v1 }
 0x37f   : > { %v6475_v37 = vpack.c.bf16 %v4680_v42, %v4679_v14  ;;  %v4683_v18 = vmul.f32 0.125, %v3087_v39  ;;  %v2897_v40 = vpop.f32.mrb[44].mxu0 }
 0x380   : > { %v2898_v24 = vadd.f32 %v2897_v40, %v9926_v27  ;;  %v2899_v34 = vpop.f32.mrb[45].mxu0 }
 0x381   : > { %5075 = vst [vmem:[%s9948_s28 + $0x2d0] sm:$0xff] %v6475_v37  ;;  %v6477_v20 = vpack.c.bf16 %v4683_v18, %v4682_v58  ;;  %v2900_v10 = vadd.f32 %v2899_v34, %v9932_v6  ;;  %v2901_v21 = vpop.f32.mrb[46].mxu0 }
 0x382   : > { %v3091_v47 = vadd.f32 %v9812_v8, %v2898_v24  ;;  %v2902_v26 = vadd.f32 %v2901_v21, %v9926_v27  ;;  %v2903_v45 = vpop.f32.mrb[47].mxu0  ;;  %v11220_v8 = vld [vmem:[#allocation52_spill] sm:$0xff] }
 0x383   : > { %5077 = vst [vmem:[%s9948_s28 + $0x2f4] sm:$0xff] %v6477_v20  ;;  %v3093_v17 = vadd.f32 %v9814_v63, %v2900_v10  ;;  %v2904_v30 = vadd.f32 %v2903_v45, %v9932_v6  ;;  %v11221_v20 = vld [vmem:[#allocation27_spill] sm:$0xff] }
 0x384   : > { %v4685_v22 = vmul.f32 0.125, %v3091_v47  ;;  %v3095_v19 = vadd.f32 %v11217_v13, %v2902_v26  ;;  %3698 = vmatmul.mubr.bf16.gmra.mrb[120].mxu0 %v11218_v48  ;;  %4004 = vmatmul.mubr.bf16.gmra.mrb[120].mxu1 %v9549_v59  ;;  %v11222_v26 = vld [vmem:[#allocation29_spill] sm:$0xff] }
 0x385   : > { %v4686_v33 = vmul.f32 0.125, %v3093_v17  ;;  %v3097_v57 = vadd.f32 %v11219_v53, %v2904_v30  ;;  %3707 = vmatprep.mubr.bf16.mxu0 %v11220_v8  ;;  %4013 = vmatprep.mubr.bf16.mxu1 %v9730_v61  ;;  %v11223_v17 = vld [vmem:[#allocation55_spill] sm:$0xff] }
 0x386   : > { %v4688_v23 = vmul.f32 0.125, %v3095_v19 }
 0x387   : > { %v6479_v63 = vpack.c.bf16 %v4686_v33, %v4685_v22  ;;  %v4689_v14 = vmul.f32 0.125, %v3097_v57  ;;  %v2907_v1 = vpop.f32.mrb[48].mxu0  ;;  %v11224_v22 = vld [vmem:[#allocation34_spill] sm:$0xff] }
 0x388   : > { %v2908_v42 = vadd.f32 %v2907_v1, %v9926_v27  ;;  %v2909_v39 = vpop.f32.mrb[49].mxu0 }
 0x389   : > { %5079 = vst [vmem:[%s9948_s28 + $0x318] sm:$0xff] %v6479_v63  ;;  %v6481_v58 = vpack.c.bf16 %v4689_v14, %v4688_v23  ;;  %v2910_v37 = vadd.f32 %v2909_v39, %v9932_v6  ;;  %v2911_v18 = vpop.f32.mrb[50].mxu0 }
 0x38a   : > { %v3101_v40 = vadd.f32 %v9824_v29, %v2908_v42  ;;  %v2912_v24 = vadd.f32 %v2911_v18, %v9926_v27  ;;  %v2913_v34 = vpop.f32.mrb[51].mxu0  ;;  %v7744_v42 = vld [vmem:[#allocation8 + $0x20] ss:$36 sps:$4 sm:$0xff]   ;;  %v7748_v18 = vld [vmem:[#allocation8 + $0x2a8] ss:$36 sps:$4 sm:$0xff]  }
 0x38b   : > { %5081 = vst [vmem:[%s9948_s28 + $0x33c] sm:$0xff] %v6481_v58  ;;  %v3103_v10 = vadd.f32 %v11221_v20, %v2910_v37  ;;  %v2914_v21 = vadd.f32 %v2913_v34, %v9932_v6 }
 0x38c   : > { %v4691_v47 = vmul.f32 0.125, %v3101_v40  ;;  %v3105_v45 = vadd.f32 %v11222_v26, %v2912_v24  ;;  %3708 = vmatmul.mubr.bf16.gmra.mrb[124].mxu0 %v11223_v17  ;;  %4014 = vmatmul.mubr.bf16.gmra.mrb[124].mxu1 %v9732_v36  ;;  %v11225_v40 = vld [vmem:[#allocation37_spill] sm:$0xff] }
 0x38d   : > { %v4692_v30 = vmul.f32 0.125, %v3103_v10  ;;  %v3107_v13 = vadd.f32 %v11224_v22, %v2914_v21  ;;  %4023 = vmatprep.mubr.bf16.mxu1 %v11187_v56  ;;  %3750 = vmatprep.mubr.bf16.mxu0 %v11094_v11  ;;  %v11226_v10 = vld [vmem:[#allocation33_spill] sm:$0xff] }
 0x38e   : > { %v4694_v29 = vmul.f32 0.125, %v3105_v45  ;;  %v11228_v45 = vld [vmem:[#allocation36_spill] sm:$0xff] }
 0x38f   : > { %v6483_v19 = vpack.c.bf16 %v4692_v30, %v4691_v47  ;;  %v4695_v33 = vmul.f32 0.125, %v3107_v13  ;;  %v2917_v53 = vpop.f32.mrb[52].mxu0  ;;  %v11227_v47 = vld [vmem:[#allocation25_spill] sm:$0xff]  ;;  %v7749_v30 = vld [vmem:[#allocation8 + $0x68] ss:$36 sps:$4 sm:$0xff]  }
 0x390   : > { %v2918_v57 = vadd.f32 %v2917_v53, %v9926_v27  ;;  %v2919_v23 = vpop.f32.mrb[53].mxu0  ;;  %v7753_v13 = vld [vmem:[#allocation8 + $0x2f0] ss:$36 sps:$4 sm:$0xff]  }
 0x391   : > { %5083 = vst [vmem:[%s9948_s28 + $0x360] sm:$0xff] %v6483_v19  ;;  %v6485_v63 = vpack.c.bf16 %v4695_v33, %v4694_v29  ;;  %v2920_v14 = vadd.f32 %v2919_v23, %v9932_v6  ;;  %v2921_v1 = vpop.f32.mrb[54].mxu0 }
 0x392   : > { %v3111_v39 = vadd.f32 %v9836_v15, %v2918_v57  ;;  %v2922_v58 = vadd.f32 %v2921_v1, %v9926_v27  ;;  %v2923_v37 = vpop.f32.mrb[55].mxu0 }
 0x393   : > { %5085 = vst [vmem:[%s9948_s28 + $0x384] sm:$0xff] %v6485_v63  ;;  %v3113_v24 = vadd.f32 %v11225_v40, %v2920_v14  ;;  %v2924_v34 = vadd.f32 %v2923_v37, %v9932_v6  ;;  %v11229_v37 = vld [vmem:[#allocation40_spill] sm:$0xff] }
 0x394   : > { %v4697_v20 = vmul.f32 0.125, %v3111_v39  ;;  %v3115_v21 = vadd.f32 %v11226_v10, %v2922_v58  ;;  %3751 = vmatmul.mubr.bf16.vlgmr.msra.gmra.mrb[64].mxu0 %v11227_v47  ;;  %4024 = vmatmul.mubr.bf16.gmra.mrb[128].mxu1 %v11188_v7  ;;  %v7754_v58 = vld [vmem:[#allocation8 + $0xb0] ss:$36 sps:$4 sm:$0xff]  }
 0x395   : > { %v4698_v26 = vmul.f32 0.125, %v3113_v24  ;;  %v3117_v15 = vadd.f32 %v11228_v45, %v2924_v34  ;;  %6628 = vmatpush3.bf16.msra.mxu0 %v7744_v42  ;;  %4033 = vmatprep.mubr.bf16.mxu1 %v11189_v62  ;;  %v7758_v24 = vld [vmem:[#allocation8 + $0x338] ss:$36 sps:$4 sm:$0xff]  }
 0x396   : > { %v4700_v22 = vmul.f32 0.125, %v3115_v21  ;;  %3760 = vmatprep.mubr.bf16.mxu0 %v11094_v11  ;;  %6629 = vmatprep.subr.bf16.mxu0 %v7748_v18  ;;  %v11231_v21 = vld [vmem:[#allocation57_spill] sm:$0xff] }
 0x397   : > { %v6487_v29 = vpack.c.bf16 %v4698_v26, %v4697_v20  ;;  %v4701_v19 = vmul.f32 0.125, %v3117_v15  ;;  %v2927_v33 = vpop.f32.mrb[56].mxu0  ;;  %v11230_v20 = vld [vmem:[#allocation42_spill] sm:$0xff]  ;;  %v11232_v26 = vld [vmem:[#allocation39_spill] sm:$0xff] }
 0x398   : > { %v2928_v53 = vadd.f32 %v2927_v33, %v9926_v27  ;;  %v2929_v57 = vpop.f32.mrb[57].mxu0 }
 0x399   : > { %5087 = vst [vmem:[%s9948_s28 + $0x3a8] sm:$0xff] %v6487_v29  ;;  %v6489_v23 = vpack.c.bf16 %v4701_v19, %v4700_v22  ;;  %v2930_v63 = vadd.f32 %v2929_v57, %v9932_v6  ;;  %v2931_v14 = vpop.f32.mrb[58].mxu0  ;;  %6630 = vmatpush3.bf16.msra.mxu0 %v7749_v30  ;;  %v7759_v30 = vld [vmem:[#allocation8 + $0xf8] ss:$36 sps:$4 sm:$0xff]   ;;  %v7766_v19 = vld [vmem:[#allocation8 + $0x380] ss:$36 sps:$4 sm:$0xff]  }
 0x39a   : > { %v3121_v1 = vadd.f32 %v9848_v28, %v2928_v53  ;;  %v2932_v42 = vadd.f32 %v2931_v14, %v9926_v27  ;;  %v2933_v39 = vpop.f32.mrb[59].mxu0  ;;  %6631 = vmatprep.subr.bf16.mxu0 %v7753_v13 }
 0x39b   : > { %5089 = vst [vmem:[%s9948_s28 + $0x3cc] sm:$0xff] %v6489_v23  ;;  %v3123_v18 = vadd.f32 %v11229_v37, %v2930_v63  ;;  %v2934_v40 = vadd.f32 %v2933_v39, %v9932_v6  ;;  %v7767_v39 = vld [vmem:[#allocation8 + $0x140] ss:$36 sps:$4 sm:$0xff]  }
 0x39c   : > { %v4703_v34 = vmul.f32 0.125, %v3121_v1  ;;  %v3125_v10 = vadd.f32 %v11230_v20, %v2932_v42  ;;  %3761 = vmatmul.mubr.bf16.gmra.mrb[68].mxu0 %v11231_v21  ;;  %4034 = vmatmul.mubr.bf16.gmra.mrb[132].mxu1 %v11190_v9  ;;  %v11234_v20 = vld [vmem:[#allocation56_spill] sm:$0xff] }
 0x39d   : > { %v4704_v28 = vmul.f32 0.125, %v3123_v18  ;;  %v3127_v45 = vadd.f32 %v11232_v26, %v2934_v40  ;;  %4043 = vmatprep.mubr.bf16.mxu1 %v9448_v32  ;;  %3770 = vmatprep.mubr.bf16.mxu0 %v11094_v11  ;;  %v7768_v18 = vld [vmem:[#allocation8 + $0x3c8] ss:$36 sps:$4 sm:$0xff]  }
 0x39e   : > { %v4706_v15 = vmul.f32 0.125, %v3125_v10  ;;  %6632 = vmatpush3.bf16.msra.mxu0 %v7754_v58  ;;  %v11236_v26 = vld [vmem:[#allocation51_spill] sm:$0xff] }
 0x39f   : > { %v6491_v22 = vpack.c.bf16 %v4704_v28, %v4703_v34  ;;  %v4707_v13 = vmul.f32 0.125, %v3127_v45  ;;  %v2937_v29 = vpop.f32.mrb[60].mxu0  ;;  %6633 = vmatprep.subr.bf16.mxu0 %v7758_v24  ;;  %v11233_v24 = vld [vmem:[#allocation41_spill] sm:$0xff] }
 0x3a0   : > { %v2938_v33 = vadd.f32 %v2937_v29, %v9926_v27  ;;  %v2939_v53 = vpop.f32.mrb[61].mxu0 }
 0x3a1   : > { %5091 = vst [vmem:[%s9948_s28 + $0x3f0] sm:$0xff] %v6491_v22  ;;  %v6493_v57 = vpack.c.bf16 %v4707_v13, %v4706_v15  ;;  %v2940_v23 = vadd.f32 %v2939_v53, %v9932_v6  ;;  %v2941_v63 = vpop.f32.mrb[62].mxu0  ;;  %v7769_v15 = vld [vmem:[#allocation8 + $0x188] ss:$36 sps:$4 sm:$0xff]  }
 0x3a2   : > { %v3131_v14 = vadd.f32 %v9860_v31, %v2938_v33  ;;  %v2942_v1 = vadd.f32 %v2941_v63, %v9926_v27  ;;  %v2943_v42 = vpop.f32.mrb[63].mxu0  ;;  %6634 = vmatpush3.bf16.msra.mxu0 %v7759_v30  ;;  %v11235_v31 = vld [vmem:[#allocation77_spill] sm:$0xff] }
 0x3a3   : > { %5093 = vst [vmem:[%s9948_s28 + $0x414] sm:$0xff] %v6493_v57  ;;  %v3133_v58 = vadd.f32 %v9862_v35, %v2940_v23  ;;  %v2944_v37 = vadd.f32 %v2943_v42, %v9932_v6  ;;  %6635 = vmatprep.subr.bf16.mxu0 %v7766_v19  ;;  %v10049_v10 = vrot.slane %v9920_v0, %v11235_v31  ;;  %v7770_v19 = vld [vmem:[#allocation8 + $0x410] ss:$36 sps:$4 sm:$0xff]  }
 0x3a4   : > { %v4709_v40 = vmul.f32 0.125, %v3131_v14  ;;  %v3135_v34 = vadd.f32 %v11233_v24, %v2942_v1  ;;  %3771 = vmatmul.mubr.bf16.gmra.mrb[72].mxu0 %v11234_v20  ;;  %4044 = vmatmul.mubr.bf16.gmra.mrb[136].mxu1 %v9527_v16  ;;  %v7772_v24 = vld [vmem:[#allocation8 + $0x1d0] ss:$36 sps:$4 sm:$0xff]  }
 0x3a5   : > { %v4710_v28 = vmul.f32 0.125, %v3133_v58  ;;  %v3137_v45 = vadd.f32 %v11236_v26, %v2944_v37  ;;  %4053 = vmatprep.mubr.bf16.mxu1 %v9566_v2  ;;  %3780 = vmatprep.mubr.bf16.mxu0 %v11094_v11 }
 0x3a6   : > { %v4712_v35 = vmul.f32 0.125, %v3135_v34  ;;  %6636 = vmatpush3.bf16.msra.mxu0 %v7767_v39 }
 0x3a7   : > { %v6495_v30 = vpack.c.bf16 %v4710_v28, %v4709_v40  ;;  %v4713_v22 = vmul.f32 0.125, %v3137_v45  ;;  %v2980_v13 = vpop.f32.mrb[0].mxu0  ;;  %v3366_v29 = vpop.f32.mrb[32].mxu1  ;;  %6637 = vmatprep.subr.bf16.mxu0 %v7768_v18  ;;  %v7773_v28 = vld [vmem:[#allocation8 + $0x458] ss:$36 sps:$4 sm:$0xff]  }
 0x3a8   : > { %v6843_v0 = vadd.f32 %v2980_v13, %v9926_v27  ;;  %v6939_v33 = vadd.f32 %v3366_v29, %v10049_v10  ;;  %v2982_v53 = vpop.f32.mrb[1].mxu0  ;;  %v10056_v57 = vpop.f32.mrb[33].mxu1  ;;  %v7775_v29 = vld [vmem:[#allocation8 + $0x218] ss:$36 sps:$4 sm:$0xff]  }
 0x3a9   : > { %5095 = vst [vmem:[%s9948_s28 + $0x438] sm:$0xff] %v6495_v30  ;;  %v6497_v23 = vpack.c.bf16 %v4713_v22, %v4712_v35  ;;  %v6844_v63 = vadd.f32 %v2982_v53, %v9932_v6  ;;  %v2984_v14 = vpop.f32.mrb[2].mxu0  ;;  %v3370_v1 = vpop.f32.mrb[34].mxu1  ;;  %v11237_v30 = vld [vmem:[#allocation60_spill] sm:$0xff] }
 0x3aa   : > { %v4619_v42 = vmul.f32 0.125, %v6843_v0  ;;  %v4621_v39 = vmul.f32 0.125, %v6939_v33  ;;  %v6845_v58 = vadd.f32 %v2984_v14, %v9926_v27  ;;  %v6941_v37 = vadd.f32 %v3370_v1, %v10049_v10  ;;  %v2986_v18 = vpop.f32.mrb[3].mxu0  ;;  %v10062_v40 = vpop.f32.mrb[35].mxu1  ;;  %6638 = vmatpush3.bf16.msra.mxu0 %v7769_v15 }
 0x3ab   : > { %5097 = vst [vmem:[%s9948_s28 + $0x45c] sm:$0xff] %v6497_v23  ;;  %v4620_v34 = vmul.f32 0.125, %v6844_v63  ;;  %v6846_v31 = vadd.f32 %v2986_v18, %v9932_v6  ;;  %6639 = vmatprep.subr.bf16.mxu0 %v7770_v19 }
 0x3ac   : > { %v6436_v26 = vpack.c.bf16 %v4621_v39, %v4621_v39  ;;  %v4622_v45 = vmul.f32 0.125, %v6845_v58  ;;  %v4624_v35 = vmul.f32 0.125, %v6941_v37  ;;  %3781 = vmatmul.mubr.bf16.gmra.mrb[76].mxu0 %v11237_v30  ;;  %4054 = vmatmul.mubr.bf16.gmra.mrb[140].mxu1 %v9571_v25 }
 0x3ad   : > { %v6435_v22 = vpack.c.bf16 %v4620_v34, %v4619_v42  ;;  %v4623_v13 = vmul.f32 0.125, %v6846_v31  ;;  %4063 = vmatprep.mubr.bf16.mxu1 %v9573_v55  ;;  %3790 = vmatprep.mubr.bf16.mxu0 %v11094_v11 }
 0x3ae   : > { %5036 = vst [vmem:[%s9948_s28 + $0x8] sm:$0xf] %v6436_v26  ;;  %v6438_v15 = vpack.c.bf16 %v4624_v35, %v4624_v35  ;;  %6640 = vmatpush3.bf16.msra.mxu0 %v7772_v24 }
 0x3af   : > { %5035 = vst [vmem:[%s9948_s28] sm:$0xff] %v6435_v22  ;;  %v6437_v19 = vpack.c.bf16 %v4623_v13, %v4622_v45  ;;  %v2990_v0 = vpop.f32.mrb[4].mxu0  ;;  %v3376_v33 = vpop.f32.mrb[36].mxu1  ;;  %6641 = vmatprep.subr.bf16.mxu0 %v7773_v28  ;;  %v11238_v13 = vld [vmem:[#allocation59_spill] sm:$0xff] }
 0x3b0   : > { %5038 = vst [vmem:[%s9948_s28 + $0x2c] sm:$0xf] %v6438_v15  ;;  %v6847_v53 = vadd.f32 %v2990_v0, %v9926_v27  ;;  %v6943_v23 = vadd.f32 %v3376_v33, %v10049_v10  ;;  %v2992_v63 = vpop.f32.mrb[5].mxu0  ;;  %v10075_v14 = vpop.f32.mrb[37].mxu1 }
 0x3b1   : > { %5037 = vst [vmem:[%s9948_s28 + $0x24] sm:$0xff] %v6437_v19  ;;  %v6848_v1 = vadd.f32 %v2992_v63, %v9932_v6  ;;  %v2994_v42 = vpop.f32.mrb[6].mxu0  ;;  %v3380_v39 = vpop.f32.mrb[38].mxu1 }
 0x3b2   : > { %v4625_v58 = vmul.f32 0.125, %v6847_v53  ;;  %v4627_v37 = vmul.f32 0.125, %v6943_v23  ;;  %v6849_v18 = vadd.f32 %v2994_v42, %v9926_v27  ;;  %v6945_v24 = vadd.f32 %v3380_v39, %v10049_v10  ;;  %v2996_v34 = vpop.f32.mrb[7].mxu0  ;;  %v10081_v31 = vpop.f32.mrb[39].mxu1  ;;  %6642 = vmatpush3.bf16.msra.mxu0 %v7775_v29 }
 0x3b3   : > { %v4626_v28 = vmul.f32 0.125, %v6848_v1  ;;  %v6850_v26 = vadd.f32 %v2996_v34, %v9932_v6  ;;  %6763 = vmatprep.subr.bf16.mxu0 %v9964_v60 }
 0x3b4   : > { %v6440_v45 = vpack.c.bf16 %v4627_v37, %v4627_v37  ;;  %v4628_v35 = vmul.f32 0.125, %v6849_v18  ;;  %v4630_v22 = vmul.f32 0.125, %v6945_v24  ;;  %3791 = vmatmul.mubr.bf16.gmra.mrb[80].mxu0 %v11238_v13  ;;  %4064 = vmatmul.mubr.bf16.gmra.mrb[144].mxu1 %v9600_v49 }
 0x3b5   : > { %v6439_v15 = vpack.c.bf16 %v4626_v28, %v4625_v58  ;;  %v4629_v19 = vmul.f32 0.125, %v6850_v26  ;;  %4073 = vmatprep.mubr.bf16.mxu1 %v9608_v46  ;;  %3800 = vmatprep.mubr.bf16.mxu0 %v11094_v11 }
 0x3b6   : > { %5040 = vst [vmem:[%s9948_s28 + $0x50] sm:$0xf] %v6440_v45  ;;  %v6442_v29 = vpack.c.bf16 %v4630_v22, %v4630_v22 }
 0x3b7   : > { %5039 = vst [vmem:[%s9948_s28 + $0x48] sm:$0xff] %v6439_v15  ;;  %v6441_v0 = vpack.c.bf16 %v4629_v19, %v4628_v35  ;;  %v3000_v33 = vpop.f32.mrb[8].mxu0  ;;  %v3386_v53 = vpop.f32.mrb[40].mxu1 }
 0x3b8   : > { %5042 = vst [vmem:[%s9948_s28 + $0x74] sm:$0xf] %v6442_v29  ;;  %v6851_v23 = vadd.f32 %v3000_v33, %v9926_v27  ;;  %v6947_v63 = vadd.f32 %v3386_v53, %v10049_v10  ;;  %v3002_v1 = vpop.f32.mrb[9].mxu0  ;;  %v10094_v42 = vpop.f32.mrb[41].mxu1 }
 0x3b9   : > { %5041 = vst [vmem:[%s9948_s28 + $0x6c] sm:$0xff] %v6441_v0  ;;  %v6852_v39 = vadd.f32 %v3002_v1, %v9932_v6  ;;  %v3004_v58 = vpop.f32.mrb[10].mxu0  ;;  %v3390_v37 = vpop.f32.mrb[42].mxu1  ;;  %v11239_v0 = vld [vmem:[#allocation23_spill] sm:$0xff] }
 0x3ba   : > { %v4631_v18 = vmul.f32 0.125, %v6851_v23  ;;  %v4633_v24 = vmul.f32 0.125, %v6947_v63  ;;  %v6853_v34 = vadd.f32 %v3004_v58, %v9926_v27  ;;  %v6949_v28 = vadd.f32 %v3390_v37, %v10049_v10  ;;  %v3006_v26 = vpop.f32.mrb[11].mxu0  ;;  %v10100_v45 = vpop.f32.mrb[43].mxu1 }
 0x3bb   : > { %v4632_v35 = vmul.f32 0.125, %v6852_v39  ;;  %v6854_v22 = vadd.f32 %v3006_v26, %v9932_v6 }
 0x3bc   : > { %v6444_v15 = vpack.c.bf16 %v4633_v24, %v4633_v24  ;;  %v4634_v19 = vmul.f32 0.125, %v6853_v34  ;;  %v4636_v29 = vmul.f32 0.125, %v6949_v28  ;;  %3801 = vmatmul.mubr.bf16.gmra.mrb[84].mxu0 %v11239_v0  ;;  %4074 = vmatmul.mubr.bf16.gmra.mrb[148].mxu1 %v9613_v4 }
 0x3bd   : > { %v6443_v33 = vpack.c.bf16 %v4632_v35, %v4631_v18  ;;  %v4635_v53 = vmul.f32 0.125, %v6854_v22  ;;  %4083 = vmatprep.mubr.bf16.mxu1 %v9619_v38  ;;  %3810 = vmatprep.mubr.bf16.mxu0 %v11094_v11 }
 0x3be   : > { %5044 = vst [vmem:[%s9948_s28 + $0x98] sm:$0xf] %v6444_v15  ;;  %v6446_v23 = vpack.c.bf16 %v4636_v29, %v4636_v29 }
 0x3bf   : > { %5043 = vst [vmem:[%s9948_s28 + $0x90] sm:$0xff] %v6443_v33  ;;  %v6445_v63 = vpack.c.bf16 %v4635_v53, %v4634_v19  ;;  %v3010_v1 = vpop.f32.mrb[12].mxu0  ;;  %v3396_v39 = vpop.f32.mrb[44].mxu1 }
 0x3c0   : > { %5046 = vst [vmem:[%s9948_s28 + $0xbc] sm:$0xf] %v6446_v23  ;;  %v6855_v58 = vadd.f32 %v3010_v1, %v9926_v27  ;;  %v6951_v37 = vadd.f32 %v3396_v39, %v10049_v10  ;;  %v3012_v24 = vpop.f32.mrb[13].mxu0  ;;  %v10112_v34 = vpop.f32.mrb[45].mxu1 }
 0x3c1   : > { %5045 = vst [vmem:[%s9948_s28 + $0xb4] sm:$0xff] %v6445_v63  ;;  %v6856_v18 = vadd.f32 %v3012_v24, %v9932_v6  ;;  %v3014_v28 = vpop.f32.mrb[14].mxu0  ;;  %v3400_v26 = vpop.f32.mrb[46].mxu1 }
 0x3c2   : > { %v4637_v35 = vmul.f32 0.125, %v6855_v58  ;;  %v4639_v22 = vmul.f32 0.125, %v6951_v37  ;;  %v6857_v15 = vadd.f32 %v3014_v28, %v9926_v27  ;;  %v6953_v19 = vadd.f32 %v3400_v26, %v10049_v10  ;;  %v3016_v29 = vpop.f32.mrb[15].mxu0  ;;  %v10118_v33 = vpop.f32.mrb[47].mxu1 }
 0x3c3   : > { %11240 = vst [vmem:[#allocation54_spill] sm:$0xff] %v10118_v33  ;;  %v4638_v53 = vmul.f32 0.125, %v6856_v18  ;;  %v6858_v23 = vadd.f32 %v3016_v29, %v9932_v6 }
 0x3c4   : > { %v6448_v63 = vpack.c.bf16 %v4639_v22, %v4639_v22  ;;  %v4640_v1 = vmul.f32 0.125, %v6857_v15  ;;  %v4642_v39 = vmul.f32 0.125, %v6953_v19  ;;  %3811 = vmatmul.mubr.bf16.gmra.mrb[88].mxu0 %v9705_v5  ;;  %4084 = vmatmul.mubr.bf16.gmra.mrb[152].mxu1 %v11218_v48  ;;  %v11246_v48 = vld [vmem:[#allocation83_spill] sm:$0xff] }
 0x3c5   : > { %v6447_v58 = vpack.c.bf16 %v4638_v53, %v4637_v35  ;;  %v4641_v37 = vmul.f32 0.125, %v6858_v23  ;;  %4093 = vmatprep.mubr.bf16.mxu1 %v11220_v8  ;;  %3820 = vmatprep.mubr.bf16.mxu0 %v11094_v11 }
 0x3c6   : > { %5048 = vst [vmem:[%s9948_s28 + $0xe0] sm:$0xf] %v6448_v63  ;;  %v6450_v24 = vpack.c.bf16 %v4642_v39, %v4642_v39 }
 0x3c7   : > { %5047 = vst [vmem:[%s9948_s28 + $0xd8] sm:$0xff] %v6447_v58  ;;  %v6449_v18 = vpack.c.bf16 %v4641_v37, %v4640_v1  ;;  %v3020_v28 = vpop.f32.mrb[16].mxu0  ;;  %v3406_v26 = vpop.f32.mrb[48].mxu1 }
 0x3c8   : > { %5050 = vst [vmem:[%s9948_s28 + $0x104] sm:$0xf] %v6450_v24  ;;  %v6859_v22 = vadd.f32 %v3020_v28, %v9926_v27  ;;  %v6955_v15 = vadd.f32 %v3406_v26, %v10049_v10  ;;  %v3022_v19 = vpop.f32.mrb[17].mxu0  ;;  %v10130_v29 = vpop.f32.mrb[49].mxu1 }
 0x3c9   : > { %11241 = vst [vmem:[#allocation50_spill] sm:$0xff] %v10130_v29  ;;  %5049 = vst [vmem:[%s9948_s28 + $0xfc] sm:$0xff] %v6449_v18  ;;  %v6860_v35 = vadd.f32 %v3022_v19, %v9932_v6  ;;  %v3024_v53 = vpop.f32.mrb[18].mxu0  ;;  %v3410_v23 = vpop.f32.mrb[50].mxu1  ;;  %v11243_v29 = vld [vmem:[#allocation67_spill] sm:$0xff] }
 0x3ca   : > { %v4643_v8 = vmul.f32 0.125, %v6859_v22  ;;  %v4645_v63 = vmul.f32 0.125, %v6955_v15  ;;  %v6861_v1 = vadd.f32 %v3024_v53, %v9926_v27  ;;  %v6957_v39 = vadd.f32 %v3410_v23, %v10049_v10  ;;  %v3026_v58 = vpop.f32.mrb[19].mxu0  ;;  %v10136_v37 = vpop.f32.mrb[51].mxu1 }
 0x3cb   : > { %11242 = vst [vmem:[#allocation53_spill] sm:$0xff] %v10136_v37  ;;  %v4644_v24 = vmul.f32 0.125, %v6860_v35  ;;  %v6862_v28 = vadd.f32 %v3026_v58, %v9932_v6 }
 0x3cc   : > { %v6452_v18 = vpack.c.bf16 %v4645_v63, %v4645_v63  ;;  %v4646_v26 = vmul.f32 0.125, %v6861_v1  ;;  %v4648_v19 = vmul.f32 0.125, %v6957_v39  ;;  %3821 = vmatmul.mubr.bf16.gmra.mrb[92].mxu0 %v11243_v29  ;;  %4094 = vmatmul.mubr.bf16.gmra.mrb[156].mxu1 %v11223_v17 }
 0x3cd   : > { %v6451_v22 = vpack.c.bf16 %v4644_v24, %v4643_v8  ;;  %v4647_v15 = vmul.f32 0.125, %v6862_v28  ;;  %3830 = vmatprep.mubr.bf16.mxu0 %v11094_v11  ;;  %4136 = vmatprep.mubr.bf16.mxu1 %v11094_v11 }
 0x3ce   : > { %5052 = vst [vmem:[%s9948_s28 + $0x128] sm:$0xf] %v6452_v18  ;;  %v6454_v53 = vpack.c.bf16 %v4648_v19, %v4648_v19 }
 0x3cf   : > { %5051 = vst [vmem:[%s9948_s28 + $0x120] sm:$0xff] %v6451_v22  ;;  %v6453_v35 = vpack.c.bf16 %v4647_v15, %v4646_v26  ;;  %v3030_v23 = vpop.f32.mrb[20].mxu0  ;;  %v3416_v58 = vpop.f32.mrb[52].mxu1 }
 0x3d0   : > { %5054 = vst [vmem:[%s9948_s28 + $0x14c] sm:$0xf] %v6454_v53  ;;  %v6863_v63 = vadd.f32 %v3030_v23, %v9926_v27  ;;  %v6959_v1 = vadd.f32 %v3416_v58, %v10049_v10  ;;  %v3032_v39 = vpop.f32.mrb[21].mxu0  ;;  %v10148_v17 = vpop.f32.mrb[53].mxu1  ;;  %v10157_v58 = vld [vmem:[#allocation8 + $0x4e8] ss:$36 sps:$4 sm:$0xff]  }
 0x3d1   : > { %11244 = vst [vmem:[#allocation63_spill] sm:$0xff] %v10148_v17  ;;  %5053 = vst [vmem:[%s9948_s28 + $0x144] sm:$0xff] %v6453_v35  ;;  %v6864_v8 = vadd.f32 %v3032_v39, %v9932_v6  ;;  %v3034_v24 = vpop.f32.mrb[22].mxu0  ;;  %v3420_v28 = vpop.f32.mrb[54].mxu1 }
 0x3d2   : > { %v4649_v37 = vmul.f32 0.125, %v6863_v63  ;;  %v4651_v18 = vmul.f32 0.125, %v6959_v1  ;;  %v6865_v19 = vadd.f32 %v3034_v24, %v9926_v27  ;;  %v6961_v26 = vadd.f32 %v3420_v28, %v10049_v10  ;;  %v3036_v22 = vpop.f32.mrb[23].mxu0  ;;  %v10154_v15 = vpop.f32.mrb[55].mxu1 }
 0x3d3   : > { %11245 = vst [vmem:[#allocation65_spill] sm:$0xff] %v10154_v15  ;;  %v4650_v53 = vmul.f32 0.125, %v6864_v8  ;;  %v6866_v23 = vadd.f32 %v3036_v22, %v9932_v6 }
 0x3d4   : > { %v6456_v35 = vpack.c.bf16 %v4651_v18, %v4651_v18  ;;  %v4652_v39 = vmul.f32 0.125, %v6865_v19  ;;  %v4654_v17 = vmul.f32 0.125, %v6961_v26  ;;  %3831 = vmatmul.mubr.bf16.gmra.mrb[96].mxu0 %v11246_v48  ;;  %4137 = vmatmul.mubr.bf16.vlgmr.msra.gmra.mrb[96].mxu1 %v11227_v47  ;;  %v10167_v19 = vld [vmem:[#allocation8 + $0x530] ss:$36 sps:$4 sm:$0xff]  }
 0x3d5   : > { %v6455_v63 = vpack.c.bf16 %v4650_v53, %v4649_v37  ;;  %v4653_v1 = vmul.f32 0.125, %v6866_v23  ;;  %3840 = vmatprep.mubr.bf16.mxu0 %v11094_v11  ;;  %4146 = vmatprep.mubr.bf16.mxu1 %v11094_v11 }
 0x3d6   : > { %5056 = vst [vmem:[%s9948_s28 + $0x170] sm:$0xf] %v6456_v35  ;;  %v6458_v8 = vpack.c.bf16 %v4654_v17, %v4654_v17  ;;  %6835 = vmatpush3.bf16.msra.mxu1 %v9964_v60 }
 0x3d7   : > { %5055 = vst [vmem:[%s9948_s28 + $0x168] sm:$0xff] %v6455_v63  ;;  %v6457_v24 = vpack.c.bf16 %v4653_v1, %v4652_v39  ;;  %v3040_v28 = vpop.f32.mrb[24].mxu0  ;;  %v3426_v18 = vpop.f32.mrb[56].mxu1  ;;  %6828 = vmatprep.subr.bf16.mxu1 %v10157_v58 }
 0x3d8   : > { %5058 = vst [vmem:[%s9948_s28 + $0x194] sm:$0xf] %v6458_v8  ;;  %v6867_v37 = vadd.f32 %v3040_v28, %v9926_v27  ;;  %v6963_v26 = vadd.f32 %v3426_v18, %v10049_v10  ;;  %v3042_v22 = vpop.f32.mrb[25].mxu0  ;;  %v10172_v53 = vpop.f32.mrb[57].mxu1  ;;  %v10183_v18 = vld [vmem:[#allocation8 + $0x578] ss:$36 sps:$4 sm:$0xff]  }
 0x3d9   : > { %11247 = vst [vmem:[#allocation62_spill] sm:$0xff] %v10172_v53  ;;  %5057 = vst [vmem:[%s9948_s28 + $0x18c] sm:$0xff] %v6457_v24  ;;  %v6868_v17 = vadd.f32 %v3042_v22, %v9932_v6  ;;  %v3044_v60 = vpop.f32.mrb[26].mxu0  ;;  %v3430_v23 = vpop.f32.mrb[58].mxu1 }
 0x3da   : > { %v4655_v35 = vmul.f32 0.125, %v6867_v37  ;;  %v4657_v39 = vmul.f32 0.125, %v6963_v26  ;;  %v6869_v63 = vadd.f32 %v3044_v60, %v9926_v27  ;;  %v6965_v1 = vadd.f32 %v3430_v23, %v10049_v10  ;;  %v3046_v15 = vpop.f32.mrb[27].mxu0  ;;  %v10178_v8 = vpop.f32.mrb[59].mxu1  ;;  %6836 = vmatpush3.bf16.msra.mxu1 %v10157_v58  ;;  %v11249_v60 = vld [vmem:[#allocation86_spill] sm:$0xff] }
 0x3db   : > { %11248 = vst [vmem:[#allocation64_spill] sm:$0xff] %v10178_v8  ;;  %v4656_v28 = vmul.f32 0.125, %v6868_v17  ;;  %v6870_v24 = vadd.f32 %v3046_v15, %v9932_v6  ;;  %6829 = vmatprep.subr.bf16.mxu1 %v10167_v19 }
 0x3dc   : > { %v6460_v37 = vpack.c.bf16 %v4657_v39, %v4657_v39  ;;  %v4658_v26 = vmul.f32 0.125, %v6869_v63  ;;  %v4660_v22 = vmul.f32 0.125, %v6965_v1  ;;  %3841 = vmatmul.mubr.bf16.gmra.mrb[100].mxu0 %v11249_v60  ;;  %4147 = vmatmul.mubr.bf16.gmra.mrb[100].mxu1 %v11231_v21  ;;  %v10193_v1 = vld [vmem:[#allocation8 + $0x5c0] ss:$36 sps:$4 sm:$0xff]  }
 0x3dd   : > { %v6459_v23 = vpack.c.bf16 %v4656_v28, %v4655_v35  ;;  %v4659_v8 = vmul.f32 0.125, %v6870_v24  ;;  %3850 = vmatprep.mubr.bf16.mxu0 %v11094_v11  ;;  %4156 = vmatprep.mubr.bf16.mxu1 %v11094_v11 }
 0x3de   : > { %5060 = vst [vmem:[%s9948_s28 + $0x1b8] sm:$0xf] %v6460_v37  ;;  %v6462_v15 = vpack.c.bf16 %v4660_v22, %v4660_v22  ;;  %6837 = vmatpush3.bf16.msra.mxu1 %v10167_v19 }
 0x3df   : > { %5059 = vst [vmem:[%s9948_s28 + $0x1b0] sm:$0xff] %v6459_v23  ;;  %v6461_v17 = vpack.c.bf16 %v4659_v8, %v4658_v26  ;;  %v3050_v39 = vpop.f32.mrb[28].mxu0  ;;  %v3436_v63 = vpop.f32.mrb[60].mxu1  ;;  %6830 = vmatprep.subr.bf16.mxu1 %v10183_v18 }
 0x3e0   : > { %5062 = vst [vmem:[%s9948_s28 + $0x1dc] sm:$0xf] %v6462_v15  ;;  %v6871_v35 = vadd.f32 %v3050_v39, %v9926_v27  ;;  %v6967_v28 = vadd.f32 %v3436_v63, %v10049_v10  ;;  %v3052_v24 = vpop.f32.mrb[29].mxu0  ;;  %v10198_v53 = vpop.f32.mrb[61].mxu1  ;;  %v10209_v63 = vld [vmem:[#allocation8 + $0x608] ss:$36 sps:$4 sm:$0xff]  }
 0x3e1   : > { %11250 = vst [vmem:[#allocation20_spill] sm:$0xff] %v10198_v53  ;;  %5061 = vst [vmem:[%s9948_s28 + $0x1d4] sm:$0xff] %v6461_v17  ;;  %v6872_v37 = vadd.f32 %v3052_v24, %v9932_v6  ;;  %v3054_v22 = vpop.f32.mrb[30].mxu0  ;;  %v3440_v23 = vpop.f32.mrb[62].mxu1  ;;  %v11264_v53 = vld [vmem:[#allocation48_spill] sm:$0xff] }
 0x3e2   : > { %v4661_v8 = vmul.f32 0.125, %v6871_v35  ;;  %v4663_v26 = vmul.f32 0.125, %v6967_v28  ;;  %v6873_v21 = vadd.f32 %v3054_v22, %v9926_v27  ;;  %v6969_v47 = vadd.f32 %v3440_v23, %v10049_v10  ;;  %v3056_v33 = vpop.f32.mrb[31].mxu0  ;;  %v10204_v15 = vpop.f32.mrb[63].mxu1  ;;  %6838 = vmatpush3.bf16.msra.mxu1 %v10183_v18 }
 0x3e3   : > { %11251 = vst [vmem:[#allocation21_spill] sm:$0xff] %v10204_v15  ;;  %v4662_v39 = vmul.f32 0.125, %v6872_v37  ;;  %v6874_v17 = vadd.f32 %v3056_v33, %v9932_v6  ;;  %6831 = vmatprep.subr.bf16.mxu1 %v10193_v1  ;;  %v11261_v15 = vld [vmem:[#allocation44_spill] sm:$0xff] }
 0x3e4   : > { %v6464_v35 = vpack.c.bf16 %v4663_v26, %v4663_v26  ;;  %v4664_v28 = vmul.f32 0.125, %v6873_v21  ;;  %v4666_v27 = vmul.f32 0.125, %v6969_v47  ;;  %3851 = vmatmul.mubr.bf16.gmra.mrb[104].mxu0 %v11211_v41  ;;  %4157 = vmatmul.mubr.bf16.gmra.mrb[104].mxu1 %v11234_v20  ;;  %v10219_v47 = vld [vmem:[#allocation8 + $0x650] ss:$36 sps:$4 sm:$0xff]  }
 0x3e5   : > { %v6463_v24 = vpack.c.bf16 %v4662_v39, %v4661_v8  ;;  %v4665_v22 = vmul.f32 0.125, %v6874_v17  ;;  %3860 = vmatprep.mubr.bf16.mxu0 %v11094_v11  ;;  %4166 = vmatprep.mubr.bf16.mxu1 %v11094_v11 }
 0x3e6   : > { %5064 = vst [vmem:[%s9948_s28 + $0x200] sm:$0xf] %v6464_v35  ;;  %v6466_v6 = vpack.c.bf16 %v4666_v27, %v4666_v27  ;;  %6839 = vmatpush3.bf16.msra.mxu1 %v10193_v1  ;;  %v10231_v35 = vld [vmem:[#allocation8 + $0x698] ss:$36 sps:$4 sm:$0xff]  }
 0x3e7   : > { %5063 = vst [vmem:[%s9948_s28 + $0x1f8] sm:$0xff] %v6463_v24  ;;  %v6465_v33 = vpack.c.bf16 %v4665_v22, %v4664_v28  ;;  %v3446_v21 = vpop.f32.mrb[64].mxu1  ;;  %6832 = vmatprep.subr.bf16.mxu1 %v10209_v63 }
 0x3e8   : > { %5066 = vst [vmem:[%s9948_s28 + $0x224] sm:$0xf] %v6466_v6  ;;  %v6971_v37 = vadd.f32 %v3446_v21, %v10049_v10  ;;  %v10223_v23 = vpop.f32.mrb[65].mxu1 }
 0x3e9   : > { %11252 = vst [vmem:[#allocation46_spill] sm:$0xff] %v10223_v23  ;;  %5065 = vst [vmem:[%s9948_s28 + $0x21c] sm:$0xff] %v6465_v33  ;;  %v3450_v8 = vpop.f32.mrb[66].mxu1  ;;  %v11258_v23 = vld [vmem:[#allocation19_spill] sm:$0xff] }
 0x3ea   : > { %v4669_v26 = vmul.f32 0.125, %v6971_v37  ;;  %v6973_v39 = vadd.f32 %v3450_v8, %v10049_v10  ;;  %v10227_v17 = vpop.f32.mrb[67].mxu1  ;;  %6840 = vmatpush3.bf16.msra.mxu1 %v10209_v63 }
 0x3eb   : > { %11253 = vst [vmem:[#allocation49_spill] sm:$0xff] %v10227_v17  ;;  %6833 = vmatprep.subr.bf16.mxu1 %v10219_v47 }
 0x3ec   : > { %v6468_v28 = vpack.c.bf16 %v4669_v26, %v4669_v26  ;;  %v4672_v27 = vmul.f32 0.125, %v6973_v39  ;;  %3861 = vmatmul.mubr.bf16.gmra.mrb[108].mxu0 %v11212_v52  ;;  %4167 = vmatmul.mubr.bf16.gmra.mrb[108].mxu1 %v11237_v30 }
 0x3ed   : > { %3870 = vmatprep.mubr.bf16.mxu0 %v11094_v11  ;;  %4176 = vmatprep.mubr.bf16.mxu1 %v11094_v11 }
 0x3ee   : > { %5068 = vst [vmem:[%s9948_s28 + $0x248] sm:$0xf] %v6468_v28  ;;  %v6470_v24 = vpack.c.bf16 %v4672_v27, %v4672_v27  ;;  %6841 = vmatpush3.bf16.msra.mxu1 %v10219_v47 }
 0x3ef   : > { %v3456_v22 = vpop.f32.mrb[68].mxu1  ;;  %6834 = vmatprep.subr.bf16.mxu1 %v10231_v35 }
 0x3f0   : > { %5070 = vst [vmem:[%s9948_s28 + $0x26c] sm:$0xf] %v6470_v24  ;;  %v6975_v6 = vadd.f32 %v3456_v22, %v10049_v10  ;;  %v10242_v33 = vpop.f32.mrb[69].mxu1 }
 0x3f1   : > { %11254 = vst [vmem:[#allocation16_spill] sm:$0xff] %v10242_v33  ;;  %v3460_v21 = vpop.f32.mrb[70].mxu1 }
 0x3f2   : > { %v4675_v37 = vmul.f32 0.125, %v6975_v6  ;;  %v6977_v8 = vadd.f32 %v3460_v21, %v10049_v10  ;;  %v10245_v26 = vpop.f32.mrb[71].mxu1  ;;  %6842 = vmatpush3.bf16.msra.mxu1 %v10231_v35 }
 0x3f3   : > { %11255 = vst [vmem:[#allocation58_spill] sm:$0xff] %v10245_v26 }
 0x3f4   : > { %v6472_v39 = vpack.c.bf16 %v4675_v37, %v4675_v37  ;;  %v4678_v28 = vmul.f32 0.125, %v6977_v8  ;;  %3871 = vmatmul.mubr.bf16.gmra.mrb[112].mxu0 %v11213_v44  ;;  %4177 = vmatmul.mubr.bf16.gmra.mrb[112].mxu1 %v11238_v13 }
 0x3f5   : > { %3880 = vmatprep.mubr.bf16.mxu0 %v11094_v11  ;;  %4186 = vmatprep.mubr.bf16.mxu1 %v11094_v11 }
 0x3f6   : > { %5072 = vst [vmem:[%s9948_s28 + $0x290] sm:$0xf] %v6472_v39  ;;  %v6474_v27 = vpack.c.bf16 %v4678_v28, %v4678_v28 }
 0x3f7   : > { %v3466_v24 = vpop.f32.mrb[72].mxu1 }
 0x3f8   : > { %5074 = vst [vmem:[%s9948_s28 + $0x2b4] sm:$0xf] %v6474_v27  ;;  %v6979_v22 = vadd.f32 %v3466_v24, %v10049_v10  ;;  %v10255_v6 = vpop.f32.mrb[73].mxu1 }
 0x3f9   : > { %11256 = vst [vmem:[#allocation18_spill] sm:$0xff] %v10255_v6  ;;  %v3470_v21 = vpop.f32.mrb[74].mxu1 }
 0x3fa   : > { %v4681_v37 = vmul.f32 0.125, %v6979_v22  ;;  %v6981_v8 = vadd.f32 %v3470_v21, %v10049_v10  ;;  %v10258_v26 = vpop.f32.mrb[75].mxu1 }
 0x3fb   : > { %11257 = vst [vmem:[#allocation61_spill] sm:$0xff] %v10258_v26 }
 0x3fc   : > { %v6476_v33 = vpack.c.bf16 %v4681_v37, %v4681_v37  ;;  %v4684_v17 = vmul.f32 0.125, %v6981_v8  ;;  %3881 = vmatmul.mubr.bf16.gmra.mrb[116].mxu0 %v11258_v23  ;;  %4187 = vmatmul.mubr.bf16.gmra.mrb[116].mxu1 %v11239_v0 }
 0x3fd   : > { %3890 = vmatprep.mubr.bf16.mxu0 %v11094_v11  ;;  %4196 = vmatprep.mubr.bf16.mxu1 %v11094_v11 }
 0x3fe   : > { %5076 = vst [vmem:[%s9948_s28 + $0x2d8] sm:$0xf] %v6476_v33  ;;  %v6478_v39 = vpack.c.bf16 %v4684_v17, %v4684_v17 }
 0x3ff   : > { %v3476_v28 = vpop.f32.mrb[76].mxu1 }
 0x400   : > { %5078 = vst [vmem:[%s9948_s28 + $0x2fc] sm:$0xf] %v6478_v39  ;;  %v6983_v27 = vadd.f32 %v3476_v28, %v10049_v10  ;;  %v10267_v24 = vpop.f32.mrb[77].mxu1 }
 0x401   : > { %11259 = vst [vmem:[#allocation66_spill] sm:$0xff] %v10267_v24  ;;  %v3480_v22 = vpop.f32.mrb[78].mxu1 }
 0x402   : > { %v4687_v21 = vmul.f32 0.125, %v6983_v27  ;;  %v6985_v37 = vadd.f32 %v3480_v22, %v10049_v10  ;;  %v10270_v8 = vpop.f32.mrb[79].mxu1 }
 0x403   : > { %11260 = vst [vmem:[#allocation68_spill] sm:$0xff] %v10270_v8 }
 0x404   : > { %v6480_v26 = vpack.c.bf16 %v4687_v21, %v4687_v21  ;;  %v4690_v6 = vmul.f32 0.125, %v6985_v37  ;;  %3891 = vmatmul.mubr.bf16.gmra.mrb[120].mxu0 %v11261_v15  ;;  %4197 = vmatmul.mubr.bf16.gmra.mrb[120].mxu1 %v9705_v5 }
 0x405   : > { %3900 = vmatprep.mubr.bf16.mxu0 %v11094_v11  ;;  %4206 = vmatprep.mubr.bf16.mxu1 %v11094_v11 }
 0x406   : > { %5080 = vst [vmem:[%s9948_s28 + $0x320] sm:$0xf] %v6480_v26  ;;  %v6482_v17 = vpack.c.bf16 %v4690_v6, %v4690_v6  ;;  %v11265_v26 = vld [vmem:[#allocation35_spill] sm:$0xff] }
 0x407   : > { %v3486_v33 = vpop.f32.mrb[80].mxu1 }
 0x408   : > { %5082 = vst [vmem:[%s9948_s28 + $0x344] sm:$0xf] %v6482_v17  ;;  %v6987_v39 = vadd.f32 %v3486_v33, %v10049_v10  ;;  %v10279_v28 = vpop.f32.mrb[81].mxu1 }
 0x409   : > { %11262 = vst [vmem:[#allocation69_spill] sm:$0xff] %v10279_v28  ;;  %v3490_v27 = vpop.f32.mrb[82].mxu1 }
 0x40a   : > { %v4693_v22 = vmul.f32 0.125, %v6987_v39  ;;  %v6989_v21 = vadd.f32 %v3490_v27, %v10049_v10  ;;  %v10282_v37 = vpop.f32.mrb[83].mxu1 }
 0x40b   : > { %11263 = vst [vmem:[#allocation70_spill] sm:$0xff] %v10282_v37 }
 0x40c   : > { %v6484_v8 = vpack.c.bf16 %v4693_v22, %v4693_v22  ;;  %v4696_v24 = vmul.f32 0.125, %v6989_v21  ;;  %3901 = vmatmul.mubr.bf16.gmra.mrb[124].mxu0 %v11264_v53  ;;  %4207 = vmatmul.mubr.bf16.gmra.mrb[124].mxu1 %v11243_v29 }
 0x40d   : > { %4329 = vmatprep.mubr.bf16.mxu0 %v11265_v26  ;;  %4216 = vmatprep.mubr.bf16.mxu1 %v11094_v11 }
 0x40e   : > { %5084 = vst [vmem:[%s9948_s28 + $0x368] sm:$0xf] %v6484_v8  ;;  %v6486_v6 = vpack.c.bf16 %v4696_v24, %v4696_v24  ;;  %v11266_v8 = vld [vmem:[#allocation24_spill] sm:$0xff]  ;;  %v7908_v24 = vld [vmem:[#allocation8 + $0x4a0] ss:$36 sps:$4 sm:$0xff]  }
 0x40f   : > { %v3496_v17 = vpop.f32.mrb[84].mxu1 }
 0x410   : > { %5086 = vst [vmem:[%s9948_s28 + $0x38c] sm:$0xf] %v6486_v6  ;;  %v6991_v33 = vadd.f32 %v3496_v17, %v10049_v10  ;;  %v10291_v39 = vpop.f32.mrb[85].mxu1  ;;  %v11267_v6 = vld [vmem:[#allocation26_spill] sm:$0xff] }
 0x411   : > { %v3500_v27 = vpop.f32.mrb[86].mxu1 }
 0x412   : > { %v4699_v22 = vmul.f32 0.125, %v6991_v33  ;;  %v6993_v21 = vadd.f32 %v3500_v27, %v10049_v10  ;;  %v10294_v37 = vpop.f32.mrb[87].mxu1 }
 0x414   : > { %v6488_v28 = vpack.c.bf16 %v4699_v22, %v4699_v22  ;;  %v4702_v26 = vmul.f32 0.125, %v6993_v21  ;;  %4217 = vmatmul.mubr.bf16.gmra.mrb[128].mxu1 %v11246_v48  ;;  %4330 = vmatmul.mubr.bf16.vlgmr.msra.gmra.mrb[128].mxu0 %v11266_v8 }
 0x415   : > { %6764 = vmatpush3.bf16.msra.mxu0 %v7908_v24  ;;  %4337 = vmatprep.mubr.bf16.mxu0 %v11267_v6 }
 0x416   : > { %5088 = vst [vmem:[%s9948_s28 + $0x3b0] sm:$0xf] %v6488_v28  ;;  %v6490_v17 = vpack.c.bf16 %v4702_v26, %v4702_v26  ;;  %4226 = vmatprep.mubr.bf16.mxu1 %v11094_v11  ;;  %6765 = vmatprep.subr.bf16.mxu0 %v10157_v58 }
 0x417   : > { %v3506_v33 = vpop.f32.mrb[88].mxu1 }
 0x418   : > { %5090 = vst [vmem:[%s9948_s28 + $0x3d4] sm:$0xf] %v6490_v17  ;;  %v6995_v27 = vadd.f32 %v3506_v33, %v10049_v10  ;;  %v10304_v22 = vpop.f32.mrb[89].mxu1  ;;  %v11269_v17 = vld [vmem:[#allocation17_spill] sm:$0xff]  ;;  %v11270_v33 = vld [vmem:[#allocation22_spill] sm:$0xff] }
 0x419   : > { %v3510_v21 = vpop.f32.mrb[90].mxu1  ;;  %6766 = vmatpush3.bf16.msra.mxu0 %v10157_v58 }
 0x41a   : > { %v4705_v8 = vmul.f32 0.125, %v6995_v27  ;;  %v6997_v24 = vadd.f32 %v3510_v21, %v10049_v10  ;;  %v10308_v28 = vpop.f32.mrb[91].mxu1  ;;  %6767 = vmatprep.subr.bf16.mxu0 %v10167_v19 }
 0x41b   : > { %11268 = vst [vmem:[#allocation71_spill] sm:$0xff] %v10308_v28 }
 0x41c   : > { %v6492_v26 = vpack.c.bf16 %v4705_v8, %v4705_v8  ;;  %v4708_v6 = vmul.f32 0.125, %v6997_v24  ;;  %4227 = vmatmul.mubr.bf16.gmra.mrb[132].mxu1 %v11249_v60  ;;  %4338 = vmatmul.mubr.bf16.gmra.mrb[132].mxu0 %v11269_v17 }
 0x41d   : > { %4345 = vmatprep.mubr.bf16.mxu0 %v11270_v33  ;;  %4236 = vmatprep.mubr.bf16.mxu1 %v11094_v11 }
 0x41e   : > { %5092 = vst [vmem:[%s9948_s28 + $0x3f8] sm:$0xf] %v6492_v26  ;;  %v6494_v58 = vpack.c.bf16 %v4708_v6, %v4708_v6  ;;  %6768 = vmatpush3.bf16.msra.mxu0 %v10167_v19  ;;  %v11271_v6 = vld [vmem:[#allocation43_spill] sm:$0xff] }
 0x41f   : > { %v3516_v27 = vpop.f32.mrb[92].mxu1  ;;  %6769 = vmatprep.subr.bf16.mxu0 %v10183_v18 }
 0x420   : > { %5094 = vst [vmem:[%s9948_s28 + $0x41c] sm:$0xf] %v6494_v58  ;;  %v6999_v21 = vadd.f32 %v3516_v27, %v10049_v10  ;;  %v10320_v8 = vpop.f32.mrb[93].mxu1  ;;  %v11272_v58 = vld [vmem:[#allocation45_spill] sm:$0xff] }
 0x421   : > { %v3520_v24 = vpop.f32.mrb[94].mxu1 }
 0x422   : > { %v4711_v17 = vmul.f32 0.125, %v6999_v21  ;;  %v7001_v33 = vadd.f32 %v3520_v24, %v10049_v10  ;;  %v10323_v28 = vpop.f32.mrb[95].mxu1  ;;  %6770 = vmatpush3.bf16.msra.mxu0 %v10183_v18 }
 0x423   : > { %6771 = vmatprep.subr.bf16.mxu0 %v10193_v1 }
 0x424   : > { %v6496_v19 = vpack.c.bf16 %v4711_v17, %v4711_v17  ;;  %v4714_v26 = vmul.f32 0.125, %v7001_v33  ;;  %4237 = vmatmul.mubr.bf16.gmra.mrb[136].mxu1 %v11211_v41  ;;  %4346 = vmatmul.mubr.bf16.gmra.mrb[136].mxu0 %v11271_v6 }
 0x425   : > { %4353 = vmatprep.mubr.bf16.mxu0 %v11272_v58  ;;  %4246 = vmatprep.mubr.bf16.mxu1 %v11094_v11 }
 0x426   : > { %5096 = vst [vmem:[%s9948_s28 + $0x440] sm:$0xf] %v6496_v19  ;;  %v6498_v27 = vpack.c.bf16 %v4714_v26, %v4714_v26  ;;  %6772 = vmatpush3.bf16.msra.mxu0 %v10193_v1 }
 0x427   : > { %6773 = vmatprep.subr.bf16.mxu0 %v10209_v63 }
 0x428   : > { %5098 = vst [vmem:[%s9948_s28 + $0x464] sm:$0xf] %v6498_v27 }
 0x42a   : > { %6774 = vmatpush3.bf16.msra.mxu0 %v10209_v63 }
 0x42b   : > { %6775 = vmatprep.subr.bf16.mxu0 %v10219_v47 }
 0x42c   : > { %4247 = vmatmul.mubr.bf16.gmra.mrb[140].mxu1 %v11212_v52  ;;  %4354 = vmatmul.mubr.bf16.gmra.mrb[140].mxu0 %v9437_v54 }
 0x42d   : > { %4361 = vmatprep.mubr.bf16.mxu0 %v9492_v50  ;;  %4256 = vmatprep.mubr.bf16.mxu1 %v11094_v11 }
 0x42e   : > { %6776 = vmatpush3.bf16.msra.mxu0 %v10219_v47 }
 0x42f   : > { %6777 = vmatprep.subr.bf16.mxu0 %v10231_v35 }
 0x432   : > { %6778 = vmatpush3.bf16.msra.mxu0 %v10231_v35 }
 0x434   : > { %4257 = vmatmul.mubr.bf16.gmra.mrb[144].mxu1 %v11213_v44  ;;  %4362 = vmatmul.mubr.bf16.gmra.mrb[144].mxu0 %v9494_v51 }
 0x435   : > { %4369 = vmatprep.mubr.bf16.mxu0 %v9518_v3  ;;  %4266 = vmatprep.mubr.bf16.mxu1 %v11094_v11  ;;  %v10371_v3 = vld [vmem:[#allocation10] sm:$0xff] }
 0x43c   : > { %4267 = vmatmul.mubr.bf16.gmra.mrb[148].mxu1 %v11258_v23  ;;  %4370 = vmatmul.mubr.bf16.gmra.mrb[148].mxu0 %v9521_v43 }
 0x43d   : > { %4377 = vmatprep.mubr.bf16.mxu0 %v9544_v12  ;;  %4276 = vmatprep.mubr.bf16.mxu1 %v11094_v11 }
 0x444   : > { %4277 = vmatmul.mubr.bf16.gmra.mrb[152].mxu1 %v11261_v15  ;;  %4378 = vmatmul.mubr.bf16.gmra.mrb[152].mxu0 %v9549_v59 }
 0x445   : > { %4385 = vmatprep.mubr.bf16.mxu0 %v9730_v61  ;;  %4286 = vmatprep.mubr.bf16.mxu1 %v11094_v11  ;;  %v11273_v11 = vld [vmem:[#allocation73_spill] sm:$0xff] }
 0x446   : > { %v1618_v54 = vsub.s32 3, %v11273_v11  ;;  %v1622_v50 = vsub.s32 4, %v11273_v11  ;;  %v1626_v51 = vsub.s32 5, %v11273_v11 }
 0x448   : > { %v10374_v43 = vrot.slane %v10371_v3, %v1618_v54  ;;  %v10379_v12 = vrot.slane %v10371_v3, %v1622_v50  ;;  %v11274_v50 = vld [vmem:[#allocation54_spill] sm:$0xff] }
 0x44a   : > { %v6948_v35 = vadd.f32 %v10094_v42, %v10374_v43  ;;  %v6952_v58 = vadd.f32 %v10112_v34, %v10374_v43 }
 0x44c   : > { %4287 = vmatmul.mubr.bf16.gmra.mrb[156].mxu1 %v11264_v53  ;;  %4386 = vmatmul.mubr.bf16.gmra.mrb[156].mxu0 %v9732_v36 }
 0x44d   : > { %4393 = vmatprep.mubr.bf16.mxu0 %v11187_v56  ;;  %6787 = vmatprep.mubr.bf16.mxu1 %v11238_v13  ;;  %v6944_v13 = vadd.f32 %v10075_v14, %v10374_v43 }
 0x454   : > { %4394 = vmatmul.mubr.bf16.gmra.mrb[160].mxu0 %v11188_v7  ;;  %6788 = vmatmul.mubr.bf16.vlgmr.msra.gmra.mrb[160].mxu1 %v11239_v0 }
 0x455   : > { %4401 = vmatprep.mubr.bf16.mxu0 %v11189_v62  ;;  %6791 = vmatprep.mubr.bf16.mxu1 %v9705_v5  ;;  %v6940_v5 = vadd.f32 %v10056_v57, %v10374_v43 }
 0x45c   : > { %4402 = vmatmul.mubr.bf16.gmra.mrb[164].mxu0 %v11190_v9  ;;  %6792 = vmatmul.mubr.bf16.gmra.mrb[164].mxu1 %v11243_v29 }
 0x45d   : > { %4409 = vmatprep.mubr.bf16.mxu0 %v9448_v32  ;;  %6795 = vmatprep.mubr.bf16.mxu1 %v11246_v48  ;;  %v10384_v32 = vrot.slane %v10371_v3, %v1626_v51  ;;  %v6954_v51 = vadd.f32 %v11274_v50, %v10374_v43 }
 0x464   : > { %4410 = vmatmul.mubr.bf16.gmra.mrb[168].mxu0 %v9527_v16  ;;  %6796 = vmatmul.mubr.bf16.gmra.mrb[168].mxu1 %v11249_v60 }
 0x465   : > { %4417 = vmatprep.mubr.bf16.mxu0 %v9566_v2  ;;  %6799 = vmatprep.mubr.bf16.mxu1 %v11211_v41  ;;  %v6942_v2 = vadd.f32 %v10062_v40, %v10374_v43 }
 0x467   : > { %v3752_v59 = vpop.f32.mrb[64].mxu0 }
 0x468   : > { %v7003_v16 = vadd.f32 %v3752_v59, %v10379_v12  ;;  %v3754_v61 = vpop.f32.mrb[65].mxu0 }
 0x469   : > { %v7004_v36 = vadd.f32 %v3754_v61, %v10384_v32  ;;  %v3756_v56 = vpop.f32.mrb[66].mxu0 }
 0x46a   : > { %v6499_v41 = vpack.c.bf16 %v7003_v16, %v6940_v5  ;;  %v7005_v7 = vadd.f32 %v3756_v56, %v10379_v12  ;;  %v3758_v62 = vpop.f32.mrb[67].mxu0 }
 0x46b   : > { %v6500_v9 = vpack.c.bf16 %v7004_v36, %v7004_v36  ;;  %v7006_v48 = vadd.f32 %v3758_v62, %v10384_v32  ;;  %v11275_v36 = vld [vmem:[#allocation47_spill] sm:$0xff] }
 0x46c   : > { %5419 = vst [vmem:[%s9948_s28 + $0xc] sm:$0xff] %v6499_v41  ;;  %v6501_v10 = vpack.c.bf16 %v7005_v7, %v6942_v2  ;;  %4418 = vmatmul.mubr.bf16.gmra.mrb[172].mxu0 %v9571_v25  ;;  %6800 = vmatmul.mubr.bf16.gmra.mrb[172].mxu1 %v11212_v52  ;;  %v11276_v2 = vld [vmem:[#allocation52_spill] sm:$0xff]  ;;  %v11277_v7 = vld [vmem:[#allocation50_spill] sm:$0xff] }
 0x46d   : > { %5420 = vst [vmem:[%s9948_s28 + $0x14] sm:$0xf] %v6500_v9  ;;  %v6502_v57 = vpack.c.bf16 %v7006_v48, %v7006_v48  ;;  %4425 = vmatprep.mubr.bf16.mxu0 %v9573_v55  ;;  %6803 = vmatprep.mubr.bf16.mxu1 %v11213_v44  ;;  %v6946_v55 = vadd.f32 %v10081_v31, %v10374_v43 }
 0x46e   : > { %5421 = vst [vmem:[%s9948_s28 + $0x30] sm:$0xff] %v6501_v10  ;;  %v6956_v62 = vadd.f32 %v11277_v7, %v10374_v43 }
 0x46f   : > { %5422 = vst [vmem:[%s9948_s28 + $0x38] sm:$0xf] %v6502_v57  ;;  %v3762_v40 = vpop.f32.mrb[68].mxu0 }
 0x470   : > { %v7007_v0 = vadd.f32 %v3762_v40, %v10379_v12  ;;  %v3764_v29 = vpop.f32.mrb[69].mxu0  ;;  %v11278_v40 = vld [vmem:[#allocation53_spill] sm:$0xff] }
 0x471   : > { %v7008_v25 = vadd.f32 %v3764_v29, %v10384_v32  ;;  %v3766_v52 = vpop.f32.mrb[70].mxu0 }
 0x472   : > { %v6503_v18 = vpack.c.bf16 %v7007_v0, %v6944_v13  ;;  %v7009_v44 = vadd.f32 %v3766_v52, %v10379_v12  ;;  %v3768_v60 = vpop.f32.mrb[71].mxu0  ;;  %v6958_v13 = vadd.f32 %v11278_v40, %v10374_v43 }
 0x473   : > { %v6504_v1 = vpack.c.bf16 %v7008_v25, %v7008_v25  ;;  %v7010_v63 = vadd.f32 %v3768_v60, %v10384_v32 }
 0x474   : > { %5423 = vst [vmem:[%s9948_s28 + $0x54] sm:$0xff] %v6503_v18  ;;  %v6505_v14 = vpack.c.bf16 %v7009_v44, %v6946_v55  ;;  %4426 = vmatmul.mubr.bf16.gmra.mrb[176].mxu0 %v9600_v49  ;;  %6804 = vmatmul.mubr.bf16.gmra.mrb[176].mxu1 %v11258_v23  ;;  %v11279_v44 = vld [vmem:[#allocation55_spill] sm:$0xff] }
 0x475   : > { %5424 = vst [vmem:[%s9948_s28 + $0x5c] sm:$0xf] %v6504_v1  ;;  %v6506_v47 = vpack.c.bf16 %v7010_v63, %v7010_v63  ;;  %4433 = vmatprep.mubr.bf16.mxu0 %v9608_v46  ;;  %6807 = vmatprep.mubr.bf16.mxu1 %v11261_v15  ;;  %v6950_v46 = vadd.f32 %v10100_v45, %v10374_v43  ;;  %v11280_v1 = vld [vmem:[#allocation25_spill] sm:$0xff] }
 0x476   : > { %5425 = vst [vmem:[%s9948_s28 + $0x78] sm:$0xff] %v6505_v14  ;;  %v11281_v14 = vld [vmem:[#allocation63_spill] sm:$0xff] }
 0x477   : > { %5426 = vst [vmem:[%s9948_s28 + $0x80] sm:$0xf] %v6506_v47  ;;  %v3772_v31 = vpop.f32.mrb[72].mxu0  ;;  %v6960_v47 = vadd.f32 %v11281_v14, %v10374_v43 }
 0x478   : > { %v7011_v21 = vadd.f32 %v3772_v31, %v10379_v12  ;;  %v3774_v24 = vpop.f32.mrb[73].mxu0 }
 0x479   : > { %v7012_v49 = vadd.f32 %v3774_v24, %v10384_v32  ;;  %v3776_v23 = vpop.f32.mrb[74].mxu0 }
 0x47a   : > { %v6507_v17 = vpack.c.bf16 %v7011_v21, %v6948_v35  ;;  %v7013_v15 = vadd.f32 %v3776_v23, %v10379_v12  ;;  %v3778_v33 = vpop.f32.mrb[75].mxu0 }
 0x47b   : > { %v6508_v19 = vpack.c.bf16 %v7012_v49, %v7012_v49  ;;  %v7014_v26 = vadd.f32 %v3778_v33, %v10384_v32  ;;  %v11282_v49 = vld [vmem:[#allocation65_spill] sm:$0xff] }
 0x47c   : > { %5427 = vst [vmem:[%s9948_s28 + $0x9c] sm:$0xff] %v6507_v17  ;;  %v6509_v42 = vpack.c.bf16 %v7013_v15, %v6950_v46  ;;  %4434 = vmatmul.mubr.bf16.gmra.mrb[180].mxu0 %v9613_v4  ;;  %6808 = vmatmul.mubr.bf16.gmra.mrb[180].mxu1 %v11264_v53  ;;  %v6962_v23 = vadd.f32 %v11282_v49, %v10374_v43 }
 0x47d   : > { %5428 = vst [vmem:[%s9948_s28 + $0xa4] sm:$0xf] %v6508_v19  ;;  %v6510_v6 = vpack.c.bf16 %v7014_v26, %v7014_v26  ;;  %4441 = vmatprep.mubr.bf16.mxu0 %v9619_v38 }
 0x47e   : > { %5429 = vst [vmem:[%s9948_s28 + $0xc0] sm:$0xff] %v6509_v42  ;;  %v11283_v42 = vld [vmem:[#allocation57_spill] sm:$0xff] }
 0x47f   : > { %5430 = vst [vmem:[%s9948_s28 + $0xc8] sm:$0xf] %v6510_v6  ;;  %v3782_v45 = vpop.f32.mrb[76].mxu0 }
 0x480   : > { %v7015_v27 = vadd.f32 %v3782_v45, %v10379_v12  ;;  %v3784_v54 = vpop.f32.mrb[77].mxu0 }
 0x481   : > { %v7016_v4 = vadd.f32 %v3784_v54, %v10384_v32  ;;  %v3786_v53 = vpop.f32.mrb[78].mxu0 }
 0x482   : > { %v6511_v59 = vpack.c.bf16 %v7015_v27, %v6952_v58  ;;  %v7017_v38 = vadd.f32 %v3786_v53, %v10379_v12  ;;  %v3788_v5 = vpop.f32.mrb[79].mxu0  ;;  %v11284_v58 = vld [vmem:[#allocation62_spill] sm:$0xff] }
 0x483   : > { %v6512_v16 = vpack.c.bf16 %v7016_v4, %v7016_v4  ;;  %v7018_v61 = vadd.f32 %v3788_v5, %v10384_v32  ;;  %v6964_v27 = vadd.f32 %v11284_v58, %v10374_v43 }
 0x484   : > { %5431 = vst [vmem:[%s9948_s28 + $0xe4] sm:$0xff] %v6511_v59  ;;  %v6513_v34 = vpack.c.bf16 %v7017_v38, %v6954_v51  ;;  %4442 = vmatmul.mubr.bf16.gmra.mrb[184].mxu0 %v11275_v36  ;;  %v11285_v51 = vld [vmem:[#allocation64_spill] sm:$0xff] }
 0x485   : > { %5432 = vst [vmem:[%s9948_s28 + $0xec] sm:$0xf] %v6512_v16  ;;  %v6514_v56 = vpack.c.bf16 %v7018_v61, %v7018_v61  ;;  %4449 = vmatprep.mubr.bf16.mxu0 %v11276_v2  ;;  %v6966_v59 = vadd.f32 %v11285_v51, %v10374_v43  ;;  %v1630_v2 = vsub.s32 6, %v11273_v11 }
 0x486   : > { %5433 = vst [vmem:[%s9948_s28 + $0x108] sm:$0xff] %v6513_v34 }
 0x487   : > { %5434 = vst [vmem:[%s9948_s28 + $0x110] sm:$0xf] %v6514_v56  ;;  %v3792_v41 = vpop.f32.mrb[80].mxu0 }
 0x488   : > { %v7019_v9 = vadd.f32 %v3792_v41, %v10379_v12  ;;  %v3794_v48 = vpop.f32.mrb[81].mxu0  ;;  %v11286_v41 = vld [vmem:[#allocation20_spill] sm:$0xff] }
 0x489   : > { %v7020_v10 = vadd.f32 %v3794_v48, %v10384_v32  ;;  %v3796_v57 = vpop.f32.mrb[82].mxu0  ;;  %v6968_v7 = vadd.f32 %v11286_v41, %v10374_v43  ;;  %v1634_v48 = vsub.s32 7, %v11273_v11  ;;  %v11291_v41 = vld [vmem:[#allocation58_spill] sm:$0xff] }
 0x48a   : > { %v6515_v0 = vpack.c.bf16 %v7019_v9, %v6956_v62  ;;  %v7021_v29 = vadd.f32 %v3796_v57, %v10379_v12  ;;  %v3798_v25 = vpop.f32.mrb[83].mxu0  ;;  %v11287_v57 = vld [vmem:[#allocation21_spill] sm:$0xff] }
 0x48b   : > { %v6516_v52 = vpack.c.bf16 %v7020_v10, %v7020_v10  ;;  %v7022_v55 = vadd.f32 %v3798_v25, %v10384_v32  ;;  %v6970_v40 = vadd.f32 %v11287_v57, %v10374_v43 }
 0x48c   : > { %5435 = vst [vmem:[%s9948_s28 + $0x12c] sm:$0xff] %v6515_v0  ;;  %v6517_v18 = vpack.c.bf16 %v7021_v29, %v6958_v13  ;;  %4450 = vmatmul.mubr.bf16.gmra.mrb[188].mxu0 %v11279_v44  ;;  %v10504_v44 = vrot.slane %v10371_v3, %v1634_v48 }
 0x48d   : > { %5436 = vst [vmem:[%s9948_s28 + $0x134] sm:$0xf] %v6516_v52  ;;  %v6518_v60 = vpack.c.bf16 %v7022_v55, %v7022_v55  ;;  %6779 = vmatprep.mubr.bf16.mxu0 %v11280_v1 }
 0x48e   : > { %5437 = vst [vmem:[%s9948_s28 + $0x150] sm:$0xff] %v6517_v18  ;;  %v10500_v18 = vrot.slane %v10371_v3, %v1630_v2 }
 0x48f   : > { %5438 = vst [vmem:[%s9948_s28 + $0x158] sm:$0xf] %v6518_v60  ;;  %v3802_v63 = vpop.f32.mrb[84].mxu0 }
 0x490   : > { %v7023_v31 = vadd.f32 %v3802_v63, %v10379_v12  ;;  %v3804_v35 = vpop.f32.mrb[85].mxu0  ;;  %v11288_v63 = vld [vmem:[#allocation46_spill] sm:$0xff] }
 0x491   : > { %v7024_v21 = vadd.f32 %v3804_v35, %v10384_v32  ;;  %v3806_v24 = vpop.f32.mrb[86].mxu0  ;;  %v6972_v14 = vadd.f32 %v11288_v63, %v10374_v43 }
 0x492   : > { %v6519_v46 = vpack.c.bf16 %v7023_v31, %v6960_v47  ;;  %v7025_v17 = vadd.f32 %v3806_v24, %v10379_v12  ;;  %v3808_v15 = vpop.f32.mrb[87].mxu0 }
 0x493   : > { %v6520_v33 = vpack.c.bf16 %v7024_v21, %v7024_v21  ;;  %v7026_v19 = vadd.f32 %v3808_v15, %v10384_v32 }
 0x494   : > { %5439 = vst [vmem:[%s9948_s28 + $0x174] sm:$0xff] %v6519_v46  ;;  %v6521_v26 = vpack.c.bf16 %v7025_v17, %v6962_v23  ;;  %6780 = vmatmul.mubr.bf16.vlgmr.msra.gmra.mrb[192].mxu0 %v11283_v42  ;;  %v11289_v46 = vld [vmem:[#allocation49_spill] sm:$0xff] }
 0x495   : > { %5440 = vst [vmem:[%s9948_s28 + $0x17c] sm:$0xf] %v6520_v33  ;;  %v6522_v6 = vpack.c.bf16 %v7026_v19, %v7026_v19  ;;  %6783 = vmatprep.mubr.bf16.mxu0 %v11234_v20  ;;  %v6974_v17 = vadd.f32 %v11289_v46, %v10374_v43 }
 0x496   : > { %5441 = vst [vmem:[%s9948_s28 + $0x198] sm:$0xff] %v6521_v26 }
 0x497   : > { %5442 = vst [vmem:[%s9948_s28 + $0x1a0] sm:$0xf] %v6522_v6  ;;  %v3812_v45 = vpop.f32.mrb[88].mxu0 }
 0x498   : > { %v7027_v54 = vadd.f32 %v3812_v45, %v10379_v12  ;;  %v3814_v4 = vpop.f32.mrb[89].mxu0 }
 0x499   : > { %v7028_v53 = vadd.f32 %v3814_v4, %v10384_v32  ;;  %v3816_v50 = vpop.f32.mrb[90].mxu0 }
 0x49a   : > { %v6523_v38 = vpack.c.bf16 %v7027_v54, %v6964_v27  ;;  %v7029_v20 = vadd.f32 %v3816_v50, %v10379_v12  ;;  %v3818_v5 = vpop.f32.mrb[91].mxu0 }
 0x49b   : > { %v6524_v16 = vpack.c.bf16 %v7028_v53, %v7028_v53  ;;  %v7030_v61 = vadd.f32 %v3818_v5, %v10384_v32 }
 0x49c   : > { %5443 = vst [vmem:[%s9948_s28 + $0x1bc] sm:$0xff] %v6523_v38  ;;  %v6525_v34 = vpack.c.bf16 %v7029_v20, %v6966_v59  ;;  %6784 = vmatmul.mubr.bf16.gmra.mrb[196].mxu0 %v11237_v30  ;;  %v11290_v59 = vld [vmem:[#allocation16_spill] sm:$0xff] }
 0x49d   : > { %5444 = vst [vmem:[%s9948_s28 + $0x1c4] sm:$0xf] %v6524_v16  ;;  %v6526_v36 = vpack.c.bf16 %v7030_v61, %v7030_v61  ;;  %v6976_v38 = vadd.f32 %v11290_v59, %v10374_v43 }
 0x49e   : > { %5445 = vst [vmem:[%s9948_s28 + $0x1e0] sm:$0xff] %v6525_v34 }
 0x49f   : > { %5446 = vst [vmem:[%s9948_s28 + $0x1e8] sm:$0xf] %v6526_v36  ;;  %v3822_v56 = vpop.f32.mrb[92].mxu0 }
 0x4a0   : > { %v7031_v62 = vadd.f32 %v3822_v56, %v10379_v12  ;;  %v3824_v9 = vpop.f32.mrb[93].mxu0 }
 0x4a1   : > { %v7032_v30 = vadd.f32 %v3824_v9, %v10384_v32  ;;  %v3826_v10 = vpop.f32.mrb[94].mxu0 }
 0x4a2   : > { %v6527_v13 = vpack.c.bf16 %v7031_v62, %v6968_v7  ;;  %v7033_v0 = vadd.f32 %v3826_v10, %v10379_v12  ;;  %v3828_v29 = vpop.f32.mrb[95].mxu0  ;;  %v6978_v7 = vadd.f32 %v11291_v41, %v10374_v43 }
 0x4a3   : > { %v6528_v25 = vpack.c.bf16 %v7032_v30, %v7032_v30  ;;  %v7034_v52 = vadd.f32 %v3828_v29, %v10384_v32 }
 0x4a4   : > { %5447 = vst [vmem:[%s9948_s28 + $0x204] sm:$0xff] %v6527_v13  ;;  %v6529_v55 = vpack.c.bf16 %v7033_v0, %v6970_v40 }
 0x4a5   : > { %5448 = vst [vmem:[%s9948_s28 + $0x20c] sm:$0xf] %v6528_v25  ;;  %v6530_v11 = vpack.c.bf16 %v7034_v52, %v7034_v52 }
 0x4a6   : > { %5449 = vst [vmem:[%s9948_s28 + $0x228] sm:$0xff] %v6529_v55 }
 0x4a7   : > { %5450 = vst [vmem:[%s9948_s28 + $0x230] sm:$0xf] %v6530_v11  ;;  %v3832_v60 = vpop.f32.mrb[96].mxu0  ;;  %v4138_v1 = vpop.f32.mrb[96].mxu1 }
 0x4a8   : > { %v7035_v47 = vadd.f32 %v3832_v60, %v10379_v12  ;;  %v7067_v31 = vadd.f32 %v4138_v1, %v10500_v18  ;;  %v3834_v35 = vpop.f32.mrb[97].mxu0  ;;  %v4140_v21 = vpop.f32.mrb[97].mxu1  ;;  %v11292_v60 = vld [vmem:[#allocation18_spill] sm:$0xff] }
 0x4a9   : > { %v7036_v24 = vadd.f32 %v3834_v35, %v10384_v32  ;;  %v7068_v3 = vadd.f32 %v4140_v21, %v10504_v44  ;;  %v3836_v49 = vpop.f32.mrb[98].mxu0  ;;  %v4142_v23 = vpop.f32.mrb[98].mxu1  ;;  %v6980_v1 = vadd.f32 %v11292_v60, %v10374_v43 }
 0x4aa   : > { %v6531_v15 = vpack.c.bf16 %v7035_v47, %v6972_v14  ;;  %v7037_v33 = vadd.f32 %v3836_v49, %v10379_v12  ;;  %v7069_v19 = vadd.f32 %v4142_v23, %v10500_v18  ;;  %v3838_v26 = vpop.f32.mrb[99].mxu0  ;;  %v4144_v42 = vpop.f32.mrb[99].mxu1  ;;  %v11293_v49 = vld [vmem:[#allocation61_spill] sm:$0xff] }
 0x4ab   : > { %v6532_v6 = vpack.c.bf16 %v7036_v24, %v7036_v24  ;;  %v6563_v45 = vpack.c.bf16 %v7068_v3, %v7067_v31  ;;  %v7038_v58 = vadd.f32 %v3838_v26, %v10384_v32  ;;  %v7070_v27 = vadd.f32 %v4144_v42, %v10504_v44 }
 0x4ac   : > { %5451 = vst [vmem:[%s9948_s28 + $0x24c] sm:$0xff] %v6531_v15  ;;  %v6533_v54 = vpack.c.bf16 %v7037_v33, %v6974_v17  ;;  %v6982_v23 = vadd.f32 %v11293_v49, %v10374_v43 }
 0x4ad   : > { %5452 = vst [vmem:[%s9948_s28 + $0x254] sm:$0xf] %v6532_v6  ;;  %5803 = vst [vmem:[%s9948_s28 + $0x18] sm:$0xff] %v6563_v45  ;;  %v6534_v4 = vpack.c.bf16 %v7038_v58, %v7038_v58  ;;  %v6565_v53 = vpack.c.bf16 %v7070_v27, %v7069_v19 }
 0x4ae   : > { %5453 = vst [vmem:[%s9948_s28 + $0x270] sm:$0xff] %v6533_v54 }
 0x4af   : > { %5454 = vst [vmem:[%s9948_s28 + $0x278] sm:$0xf] %v6534_v4  ;;  %5805 = vst [vmem:[%s9948_s28 + $0x3c] sm:$0xff] %v6565_v53  ;;  %v3842_v50 = vpop.f32.mrb[100].mxu0  ;;  %v4148_v51 = vpop.f32.mrb[100].mxu1 }
 0x4b0   : > { %v7039_v20 = vadd.f32 %v3842_v50, %v10379_v12  ;;  %v7071_v5 = vadd.f32 %v4148_v51, %v10500_v18  ;;  %v3844_v16 = vpop.f32.mrb[101].mxu0  ;;  %v4150_v61 = vpop.f32.mrb[101].mxu1  ;;  %v11294_v50 = vld [vmem:[#allocation66_spill] sm:$0xff] }
 0x4b1   : > { %v7040_v34 = vadd.f32 %v3844_v16, %v10384_v32  ;;  %v7072_v36 = vadd.f32 %v4150_v61, %v10504_v44  ;;  %v3846_v56 = vpop.f32.mrb[102].mxu0  ;;  %v4152_v2 = vpop.f32.mrb[102].mxu1  ;;  %v6984_v51 = vadd.f32 %v11294_v50, %v10374_v43 }
 0x4b2   : > { %v6535_v62 = vpack.c.bf16 %v7039_v20, %v6976_v38  ;;  %v7041_v9 = vadd.f32 %v3846_v56, %v10379_v12  ;;  %v7073_v48 = vadd.f32 %v4152_v2, %v10500_v18  ;;  %v3848_v30 = vpop.f32.mrb[103].mxu0  ;;  %v4154_v10 = vpop.f32.mrb[103].mxu1  ;;  %v11295_v56 = vld [vmem:[#allocation68_spill] sm:$0xff] }
 0x4b3   : > { %v6536_v57 = vpack.c.bf16 %v7040_v34, %v7040_v34  ;;  %v6567_v40 = vpack.c.bf16 %v7072_v36, %v7071_v5  ;;  %v7042_v13 = vadd.f32 %v3848_v30, %v10384_v32  ;;  %v7074_v0 = vadd.f32 %v4154_v10, %v10504_v44 }
 0x4b4   : > { %5455 = vst [vmem:[%s9948_s28 + $0x294] sm:$0xff] %v6535_v62  ;;  %v6537_v29 = vpack.c.bf16 %v7041_v9, %v6978_v7  ;;  %v6986_v2 = vadd.f32 %v11295_v56, %v10374_v43 }
 0x4b5   : > { %5456 = vst [vmem:[%s9948_s28 + $0x29c] sm:$0xf] %v6536_v57  ;;  %5807 = vst [vmem:[%s9948_s28 + $0x60] sm:$0xff] %v6567_v40  ;;  %v6538_v25 = vpack.c.bf16 %v7042_v13, %v7042_v13  ;;  %v6569_v52 = vpack.c.bf16 %v7074_v0, %v7073_v48 }
 0x4b6   : > { %5457 = vst [vmem:[%s9948_s28 + $0x2b8] sm:$0xff] %v6537_v29 }
 0x4b7   : > { %5458 = vst [vmem:[%s9948_s28 + $0x2c0] sm:$0xf] %v6538_v25  ;;  %5809 = vst [vmem:[%s9948_s28 + $0x84] sm:$0xff] %v6569_v52  ;;  %v3852_v55 = vpop.f32.mrb[104].mxu0  ;;  %v4158_v11 = vpop.f32.mrb[104].mxu1 }
 0x4b8   : > { %v7043_v63 = vadd.f32 %v3852_v55, %v10379_v12  ;;  %v7075_v14 = vadd.f32 %v4158_v11, %v10500_v18  ;;  %v3854_v47 = vpop.f32.mrb[105].mxu0  ;;  %v4160_v31 = vpop.f32.mrb[105].mxu1  ;;  %v11296_v55 = vld [vmem:[#allocation69_spill] sm:$0xff] }
 0x4b9   : > { %v7044_v35 = vadd.f32 %v3854_v47, %v10384_v32  ;;  %v7076_v21 = vadd.f32 %v4160_v31, %v10504_v44  ;;  %v3856_v24 = vpop.f32.mrb[106].mxu0  ;;  %v4162_v3 = vpop.f32.mrb[106].mxu1  ;;  %v6988_v11 = vadd.f32 %v11296_v55, %v10374_v43 }
 0x4ba   : > { %v6539_v46 = vpack.c.bf16 %v7043_v63, %v6980_v1  ;;  %v7045_v17 = vadd.f32 %v3856_v24, %v10379_v12  ;;  %v7077_v15 = vadd.f32 %v4162_v3, %v10500_v18  ;;  %v3858_v33 = vpop.f32.mrb[107].mxu0  ;;  %v4164_v19 = vpop.f32.mrb[107].mxu1  ;;  %v11297_v24 = vld [vmem:[#allocation70_spill] sm:$0xff] }
 0x4bb   : > { %v6540_v26 = vpack.c.bf16 %v7044_v35, %v7044_v35  ;;  %v6571_v42 = vpack.c.bf16 %v7076_v21, %v7075_v14  ;;  %v7046_v6 = vadd.f32 %v3858_v33, %v10384_v32  ;;  %v7078_v45 = vadd.f32 %v4164_v19, %v10504_v44 }
 0x4bc   : > { %5459 = vst [vmem:[%s9948_s28 + $0x2dc] sm:$0xff] %v6539_v46  ;;  %v6541_v58 = vpack.c.bf16 %v7045_v17, %v6982_v23  ;;  %v6990_v3 = vadd.f32 %v11297_v24, %v10374_v43 }
 0x4bd   : > { %5460 = vst [vmem:[%s9948_s28 + $0x2e4] sm:$0xf] %v6540_v26  ;;  %5811 = vst [vmem:[%s9948_s28 + $0xa8] sm:$0xff] %v6571_v42  ;;  %v6542_v27 = vpack.c.bf16 %v7046_v6, %v7046_v6  ;;  %v6573_v54 = vpack.c.bf16 %v7078_v45, %v7077_v15 }
 0x4be   : > { %5461 = vst [vmem:[%s9948_s28 + $0x300] sm:$0xff] %v6541_v58 }
 0x4bf   : > { %5462 = vst [vmem:[%s9948_s28 + $0x308] sm:$0xf] %v6542_v27  ;;  %5813 = vst [vmem:[%s9948_s28 + $0xcc] sm:$0xff] %v6573_v54  ;;  %v3862_v4 = vpop.f32.mrb[108].mxu0  ;;  %v4168_v53 = vpop.f32.mrb[108].mxu1 }
 0x4c0   : > { %v7047_v59 = vadd.f32 %v3862_v4, %v10379_v12  ;;  %v7079_v38 = vadd.f32 %v4168_v53, %v10500_v18  ;;  %v3864_v20 = vpop.f32.mrb[109].mxu0  ;;  %v4170_v5 = vpop.f32.mrb[109].mxu1  ;;  %v6992_v4 = vadd.f32 %v10291_v39, %v10374_v43 }
 0x4c1   : > { %v7048_v16 = vadd.f32 %v3864_v20, %v10384_v32  ;;  %v7080_v61 = vadd.f32 %v4170_v5, %v10504_v44  ;;  %v3866_v34 = vpop.f32.mrb[110].mxu0  ;;  %v4172_v36 = vpop.f32.mrb[110].mxu1 }
 0x4c2   : > { %v6543_v41 = vpack.c.bf16 %v7047_v59, %v6984_v51  ;;  %v7049_v7 = vadd.f32 %v3866_v34, %v10379_v12  ;;  %v7081_v62 = vadd.f32 %v4172_v36, %v10500_v18  ;;  %v3868_v9 = vpop.f32.mrb[111].mxu0  ;;  %v4174_v48 = vpop.f32.mrb[111].mxu1 }
 0x4c3   : > { %v6544_v30 = vpack.c.bf16 %v7048_v16, %v7048_v16  ;;  %v6575_v10 = vpack.c.bf16 %v7080_v61, %v7079_v38  ;;  %v7050_v57 = vadd.f32 %v3868_v9, %v10384_v32  ;;  %v7082_v40 = vadd.f32 %v4174_v48, %v10504_v44 }
 0x4c4   : > { %5463 = vst [vmem:[%s9948_s28 + $0x324] sm:$0xff] %v6543_v41  ;;  %v6545_v13 = vpack.c.bf16 %v7049_v7, %v6986_v2  ;;  %v6994_v61 = vadd.f32 %v10294_v37, %v10374_v43 }
 0x4c5   : > { %5464 = vst [vmem:[%s9948_s28 + $0x32c] sm:$0xf] %v6544_v30  ;;  %5815 = vst [vmem:[%s9948_s28 + $0xf0] sm:$0xff] %v6575_v10  ;;  %v6546_v0 = vpack.c.bf16 %v7050_v57, %v7050_v57  ;;  %v6577_v29 = vpack.c.bf16 %v7082_v40, %v7081_v62  ;;  %v6996_v40 = vadd.f32 %v10304_v22, %v10374_v43 }
 0x4c6   : > { %5465 = vst [vmem:[%s9948_s28 + $0x348] sm:$0xff] %v6545_v13 }
 0x4c7   : > { %5466 = vst [vmem:[%s9948_s28 + $0x350] sm:$0xf] %v6546_v0  ;;  %5817 = vst [vmem:[%s9948_s28 + $0x114] sm:$0xff] %v6577_v29  ;;  %v3872_v25 = vpop.f32.mrb[112].mxu0  ;;  %v4178_v52 = vpop.f32.mrb[112].mxu1 }
 0x4c8   : > { %v7051_v60 = vadd.f32 %v3872_v25, %v10379_v12  ;;  %v7083_v1 = vadd.f32 %v4178_v52, %v10500_v18  ;;  %v3874_v63 = vpop.f32.mrb[113].mxu0  ;;  %v4180_v14 = vpop.f32.mrb[113].mxu1 }
 0x4c9   : > { %v7052_v47 = vadd.f32 %v3874_v63, %v10384_v32  ;;  %v7084_v31 = vadd.f32 %v4180_v14, %v10504_v44  ;;  %v3876_v35 = vpop.f32.mrb[114].mxu0  ;;  %v4182_v21 = vpop.f32.mrb[114].mxu1 }
 0x4ca   : > { %v6547_v49 = vpack.c.bf16 %v7051_v60, %v6988_v11  ;;  %v7053_v23 = vadd.f32 %v3876_v35, %v10379_v12  ;;  %v7085_v46 = vadd.f32 %v4182_v21, %v10500_v18  ;;  %v3878_v17 = vpop.f32.mrb[115].mxu0  ;;  %v4184_v15 = vpop.f32.mrb[115].mxu1 }
 0x4cb   : > { %v6548_v33 = vpack.c.bf16 %v7052_v47, %v7052_v47  ;;  %v6579_v19 = vpack.c.bf16 %v7084_v31, %v7083_v1  ;;  %v7054_v26 = vadd.f32 %v3878_v17, %v10384_v32  ;;  %v7086_v42 = vadd.f32 %v4184_v15, %v10504_v44  ;;  %v11298_v1 = vld [vmem:[#allocation71_spill] sm:$0xff] }
 0x4cc   : > { %5467 = vst [vmem:[%s9948_s28 + $0x36c] sm:$0xff] %v6547_v49  ;;  %v6549_v6 = vpack.c.bf16 %v7053_v23, %v6990_v3  ;;  %v6998_v63 = vadd.f32 %v11298_v1, %v10374_v43 }
 0x4cd   : > { %5468 = vst [vmem:[%s9948_s28 + $0x374] sm:$0xf] %v6548_v33  ;;  %5819 = vst [vmem:[%s9948_s28 + $0x138] sm:$0xff] %v6579_v19  ;;  %v6550_v45 = vpack.c.bf16 %v7054_v26, %v7054_v26  ;;  %v6581_v58 = vpack.c.bf16 %v7086_v42, %v7085_v46  ;;  %v7000_v19 = vadd.f32 %v10320_v8, %v10374_v43 }
 0x4ce   : > { %5469 = vst [vmem:[%s9948_s28 + $0x390] sm:$0xff] %v6549_v6 }
 0x4cf   : > { %5470 = vst [vmem:[%s9948_s28 + $0x398] sm:$0xf] %v6550_v45  ;;  %5821 = vst [vmem:[%s9948_s28 + $0x15c] sm:$0xff] %v6581_v58  ;;  %v3882_v27 = vpop.f32.mrb[116].mxu0  ;;  %v4188_v54 = vpop.f32.mrb[116].mxu1 }
 0x4d0   : > { %v7055_v53 = vadd.f32 %v3882_v27, %v10379_v12  ;;  %v7087_v50 = vadd.f32 %v4188_v54, %v10500_v18  ;;  %v3884_v51 = vpop.f32.mrb[117].mxu0  ;;  %v4190_v59 = vpop.f32.mrb[117].mxu1 }
 0x4d1   : > { %v7056_v38 = vadd.f32 %v3884_v51, %v10384_v32  ;;  %v7088_v20 = vadd.f32 %v4190_v59, %v10504_v44  ;;  %v3886_v5 = vpop.f32.mrb[118].mxu0  ;;  %v4192_v16 = vpop.f32.mrb[118].mxu1 }
 0x4d2   : > { %v6551_v39 = vpack.c.bf16 %v7055_v53, %v6992_v4  ;;  %v7057_v34 = vadd.f32 %v3886_v5, %v10379_v12  ;;  %v7089_v36 = vadd.f32 %v4192_v16, %v10500_v18  ;;  %v3888_v56 = vpop.f32.mrb[119].mxu0  ;;  %v4194_v2 = vpop.f32.mrb[119].mxu1  ;;  %v7002_v53 = vadd.f32 %v10323_v28, %v10374_v43 }
 0x4d3   : > { %v6552_v41 = vpack.c.bf16 %v7056_v38, %v7056_v38  ;;  %v6583_v7 = vpack.c.bf16 %v7088_v20, %v7087_v50  ;;  %v7058_v62 = vadd.f32 %v3888_v56, %v10384_v32  ;;  %v7090_v9 = vadd.f32 %v4194_v2, %v10504_v44 }
 0x4d4   : > { %5471 = vst [vmem:[%s9948_s28 + $0x3b4] sm:$0xff] %v6551_v39  ;;  %v6553_v48 = vpack.c.bf16 %v7057_v34, %v6994_v61 }
 0x4d5   : > { %5472 = vst [vmem:[%s9948_s28 + $0x3bc] sm:$0xf] %v6552_v41  ;;  %5823 = vst [vmem:[%s9948_s28 + $0x180] sm:$0xff] %v6583_v7  ;;  %v6554_v37 = vpack.c.bf16 %v7058_v62, %v7058_v62  ;;  %v6585_v30 = vpack.c.bf16 %v7090_v9, %v7089_v36 }
 0x4d6   : > { %5473 = vst [vmem:[%s9948_s28 + $0x3d8] sm:$0xff] %v6553_v48 }
 0x4d7   : > { %5474 = vst [vmem:[%s9948_s28 + $0x3e0] sm:$0xf] %v6554_v37  ;;  %5825 = vst [vmem:[%s9948_s28 + $0x1a4] sm:$0xff] %v6585_v30  ;;  %v3892_v10 = vpop.f32.mrb[120].mxu0  ;;  %v4198_v57 = vpop.f32.mrb[120].mxu1 }
 0x4d8   : > { %v7059_v13 = vadd.f32 %v3892_v10, %v10379_v12  ;;  %v7091_v0 = vadd.f32 %v4198_v57, %v10500_v18  ;;  %v3894_v29 = vpop.f32.mrb[121].mxu0  ;;  %v4200_v25 = vpop.f32.mrb[121].mxu1 }
 0x4d9   : > { %v7060_v52 = vadd.f32 %v3894_v29, %v10384_v32  ;;  %v7092_v55 = vadd.f32 %v4200_v25, %v10504_v44  ;;  %v3896_v11 = vpop.f32.mrb[122].mxu0  ;;  %v4202_v60 = vpop.f32.mrb[122].mxu1 }
 0x4da   : > { %v6555_v22 = vpack.c.bf16 %v7059_v13, %v6996_v40  ;;  %v7061_v14 = vadd.f32 %v3896_v11, %v10379_v12  ;;  %v7093_v47 = vadd.f32 %v4202_v60, %v10500_v18  ;;  %v3898_v31 = vpop.f32.mrb[123].mxu0  ;;  %v4204_v35 = vpop.f32.mrb[123].mxu1 }
 0x4db   : > { %v6556_v21 = vpack.c.bf16 %v7060_v52, %v7060_v52  ;;  %v6587_v24 = vpack.c.bf16 %v7092_v55, %v7091_v0  ;;  %v7062_v3 = vadd.f32 %v3898_v31, %v10384_v32  ;;  %v7094_v49 = vadd.f32 %v4204_v35, %v10504_v44 }
 0x4dc   : > { %5475 = vst [vmem:[%s9948_s28 + $0x3fc] sm:$0xff] %v6555_v22  ;;  %v6557_v23 = vpack.c.bf16 %v7061_v14, %v6998_v63 }
 0x4dd   : > { %5476 = vst [vmem:[%s9948_s28 + $0x404] sm:$0xf] %v6556_v21  ;;  %5827 = vst [vmem:[%s9948_s28 + $0x1c8] sm:$0xff] %v6587_v24  ;;  %v6558_v46 = vpack.c.bf16 %v7062_v3, %v7062_v3  ;;  %v6589_v17 = vpack.c.bf16 %v7094_v49, %v7093_v47 }
 0x4de   : > { %5477 = vst [vmem:[%s9948_s28 + $0x420] sm:$0xff] %v6557_v23 }
 0x4df   : > { %5478 = vst [vmem:[%s9948_s28 + $0x428] sm:$0xf] %v6558_v46  ;;  %5829 = vst [vmem:[%s9948_s28 + $0x1ec] sm:$0xff] %v6589_v17  ;;  %v3902_v15 = vpop.f32.mrb[124].mxu0  ;;  %v4208_v33 = vpop.f32.mrb[124].mxu1 }
 0x4e0   : > { %v7063_v26 = vadd.f32 %v3902_v15, %v10379_v12  ;;  %v7095_v42 = vadd.f32 %v4208_v33, %v10500_v18  ;;  %v3904_v6 = vpop.f32.mrb[125].mxu0  ;;  %v4210_v45 = vpop.f32.mrb[125].mxu1 }
 0x4e1   : > { %v7064_v58 = vadd.f32 %v3904_v6, %v10384_v32  ;;  %v7096_v27 = vadd.f32 %v4210_v45, %v10504_v44  ;;  %v3906_v54 = vpop.f32.mrb[126].mxu0  ;;  %v4212_v4 = vpop.f32.mrb[126].mxu1 }
 0x4e2   : > { %v6559_v8 = vpack.c.bf16 %v7063_v26, %v7000_v19  ;;  %v7065_v50 = vadd.f32 %v3906_v54, %v10379_v12  ;;  %v7097_v51 = vadd.f32 %v4212_v4, %v10500_v18  ;;  %v3908_v59 = vpop.f32.mrb[127].mxu0  ;;  %v4214_v38 = vpop.f32.mrb[127].mxu1 }
 0x4e3   : > { %v6560_v20 = vpack.c.bf16 %v7064_v58, %v7064_v58  ;;  %v6591_v5 = vpack.c.bf16 %v7096_v27, %v7095_v42  ;;  %v7066_v16 = vadd.f32 %v3908_v59, %v10384_v32  ;;  %v7098_v61 = vadd.f32 %v4214_v38, %v10504_v44 }
 0x4e4   : > { %5479 = vst [vmem:[%s9948_s28 + $0x444] sm:$0xff] %v6559_v8  ;;  %v6561_v39 = vpack.c.bf16 %v7065_v50, %v7002_v53 }
 0x4e5   : > { %5480 = vst [vmem:[%s9948_s28 + $0x44c] sm:$0xf] %v6560_v20  ;;  %5831 = vst [vmem:[%s9948_s28 + $0x210] sm:$0xff] %v6591_v5  ;;  %v6562_v28 = vpack.c.bf16 %v7066_v16, %v7066_v16  ;;  %v6593_v43 = vpack.c.bf16 %v7098_v61, %v7097_v51 }
 0x4e6   : > { %5481 = vst [vmem:[%s9948_s28 + $0x468] sm:$0xff] %v6561_v39 }
 0x4e7   : > { %5482 = vst [vmem:[%s9948_s28 + $0x470] sm:$0xf] %v6562_v28  ;;  %5833 = vst [vmem:[%s9948_s28 + $0x234] sm:$0xff] %v6593_v43  ;;  %v4218_v12 = vpop.f32.mrb[128].mxu1  ;;  %v6643_v34 = vpop.f32.mrb[128].mxu0 }
 0x4e8   : > { %v7099_v36 = vadd.f32 %v4218_v12, %v10500_v18  ;;  %v4220_v56 = vpop.f32.mrb[129].mxu1  ;;  %v6644_v2 = vpop.f32.mrb[129].mxu0 }
 0x4e9   : > { %v7100_v32 = vadd.f32 %v4220_v56, %v10504_v44  ;;  %v10654_v41 = vadd.f32 %v6644_v2, %v6643_v34  ;;  %v4222_v7 = vpop.f32.mrb[130].mxu1  ;;  %v6646_v62 = vpop.f32.mrb[130].mxu0 }
 0x4ea   : > { %v7101_v9 = vadd.f32 %v4222_v7, %v10500_v18  ;;  %v4224_v48 = vpop.f32.mrb[131].mxu1  ;;  %v6647_v37 = vpop.f32.mrb[131].mxu0 }
 0x4eb   : > { %v6595_v30 = vpack.c.bf16 %v7100_v32, %v7099_v36  ;;  %v7102_v10 = vadd.f32 %v4224_v48, %v10504_v44  ;;  %v10658_v57 = vadd.f32 %v6647_v37, %v6646_v62 }
 0x4ed   : > { %5835 = vst [vmem:[%s9948_s28 + $0x258] sm:$0xff] %v6595_v30  ;;  %v6597_v40 = vpack.c.bf16 %v7102_v10, %v7101_v9 }
 0x4ef   : > { %5837 = vst [vmem:[%s9948_s28 + $0x27c] sm:$0xff] %v6597_v40  ;;  %v4228_v13 = vpop.f32.mrb[132].mxu1  ;;  %v6649_v0 = vpop.f32.mrb[132].mxu0 }
 0x4f0   : > { %v7103_v29 = vadd.f32 %v4228_v13, %v10500_v18  ;;  %v4230_v25 = vpop.f32.mrb[133].mxu1  ;;  %v6650_v52 = vpop.f32.mrb[133].mxu0 }
 0x4f1   : > { %v7104_v55 = vadd.f32 %v4230_v25, %v10504_v44  ;;  %v10664_v11 = vadd.f32 %v6650_v52, %v6649_v0  ;;  %v4232_v60 = vpop.f32.mrb[134].mxu1  ;;  %v6652_v1 = vpop.f32.mrb[134].mxu0 }
 0x4f2   : > { %v7105_v63 = vadd.f32 %v4232_v60, %v10500_v18  ;;  %v4234_v22 = vpop.f32.mrb[135].mxu1  ;;  %v6653_v14 = vpop.f32.mrb[135].mxu0 }
 0x4f3   : > { %v6599_v47 = vpack.c.bf16 %v7104_v55, %v7103_v29  ;;  %v7106_v31 = vadd.f32 %v4234_v22, %v10504_v44  ;;  %v10668_v35 = vadd.f32 %v6653_v14, %v6652_v1 }
 0x4f5   : > { %5839 = vst [vmem:[%s9948_s28 + $0x2a0] sm:$0xff] %v6599_v47  ;;  %v6601_v21 = vpack.c.bf16 %v7106_v31, %v7105_v63 }
 0x4f7   : > { %5841 = vst [vmem:[%s9948_s28 + $0x2c4] sm:$0xff] %v6601_v21  ;;  %v4238_v24 = vpop.f32.mrb[136].mxu1  ;;  %v6655_v3 = vpop.f32.mrb[136].mxu0 }
 0x4f8   : > { %v7107_v49 = vadd.f32 %v4238_v24, %v10500_v18  ;;  %v4240_v23 = vpop.f32.mrb[137].mxu1  ;;  %v6656_v46 = vpop.f32.mrb[137].mxu0 }
 0x4f9   : > { %v7108_v17 = vadd.f32 %v4240_v23, %v10504_v44  ;;  %v10674_v15 = vadd.f32 %v6656_v46, %v6655_v3  ;;  %v4242_v33 = vpop.f32.mrb[138].mxu1  ;;  %v6658_v19 = vpop.f32.mrb[138].mxu0 }
 0x4fa   : > { %v7109_v26 = vadd.f32 %v4242_v33, %v10500_v18  ;;  %v4244_v42 = vpop.f32.mrb[139].mxu1  ;;  %v6659_v6 = vpop.f32.mrb[139].mxu0 }
 0x4fb   : > { %v6603_v45 = vpack.c.bf16 %v7108_v17, %v7107_v49  ;;  %v7110_v58 = vadd.f32 %v4244_v42, %v10504_v44  ;;  %v10678_v27 = vadd.f32 %v6659_v6, %v6658_v19 }
 0x4fd   : > { %5843 = vst [vmem:[%s9948_s28 + $0x2e8] sm:$0xff] %v6603_v45  ;;  %v6605_v54 = vpack.c.bf16 %v7110_v58, %v7109_v26 }
 0x4ff   : > { %5845 = vst [vmem:[%s9948_s28 + $0x30c] sm:$0xff] %v6605_v54  ;;  %v4248_v4 = vpop.f32.mrb[140].mxu1  ;;  %v6661_v53 = vpop.f32.mrb[140].mxu0 }
 0x500   : > { %v7111_v8 = vadd.f32 %v4248_v4, %v10500_v18  ;;  %v4250_v50 = vpop.f32.mrb[141].mxu1  ;;  %v6662_v51 = vpop.f32.mrb[141].mxu0 }
 0x501   : > { %v7112_v59 = vadd.f32 %v4250_v50, %v10504_v44  ;;  %v10684_v38 = vadd.f32 %v6662_v51, %v6661_v53  ;;  %v4252_v20 = vpop.f32.mrb[142].mxu1  ;;  %v6664_v5 = vpop.f32.mrb[142].mxu0 }
 0x502   : > { %v7113_v16 = vadd.f32 %v4252_v20, %v10500_v18  ;;  %v4254_v61 = vpop.f32.mrb[143].mxu1  ;;  %v6665_v39 = vpop.f32.mrb[143].mxu0 }
 0x503   : > { %v6607_v28 = vpack.c.bf16 %v7112_v59, %v7111_v8  ;;  %v7114_v43 = vadd.f32 %v4254_v61, %v10504_v44  ;;  %v10688_v12 = vadd.f32 %v6665_v39, %v6664_v5 }
 0x505   : > { %5847 = vst [vmem:[%s9948_s28 + $0x330] sm:$0xff] %v6607_v28  ;;  %v6609_v34 = vpack.c.bf16 %v7114_v43, %v7113_v16 }
 0x507   : > { %5849 = vst [vmem:[%s9948_s28 + $0x354] sm:$0xff] %v6609_v34  ;;  %v4258_v36 = vpop.f32.mrb[144].mxu1  ;;  %v6667_v56 = vpop.f32.mrb[144].mxu0 }
 0x508   : > { %v7115_v2 = vadd.f32 %v4258_v36, %v10500_v18  ;;  %v4260_v32 = vpop.f32.mrb[145].mxu1  ;;  %v6668_v7 = vpop.f32.mrb[145].mxu0 }
 0x509   : > { %v7116_v62 = vadd.f32 %v4260_v32, %v10504_v44  ;;  %v10694_v9 = vadd.f32 %v6668_v7, %v6667_v56  ;;  %v4262_v48 = vpop.f32.mrb[146].mxu1  ;;  %v6670_v37 = vpop.f32.mrb[146].mxu0 }
 0x50a   : > { %v7117_v30 = vadd.f32 %v4262_v48, %v10500_v18  ;;  %v4264_v10 = vpop.f32.mrb[147].mxu1  ;;  %v6671_v40 = vpop.f32.mrb[147].mxu0 }
 0x50b   : > { %v6611_v13 = vpack.c.bf16 %v7116_v62, %v7115_v2  ;;  %v7118_v0 = vadd.f32 %v4264_v10, %v10504_v44  ;;  %v10698_v29 = vadd.f32 %v6671_v40, %v6670_v37  ;;  %v10719_v40 = vld [vmem:[#allocation10 + $0x8] ss:$0 sm:$0xff] }
 0x50d   : > { %5851 = vst [vmem:[%s9948_s28 + $0x378] sm:$0xff] %v6611_v13  ;;  %v6613_v25 = vpack.c.bf16 %v7118_v0, %v7117_v30 }
 0x50f   : > { %5853 = vst [vmem:[%s9948_s28 + $0x39c] sm:$0xff] %v6613_v25  ;;  %v4268_v52 = vpop.f32.mrb[148].mxu1  ;;  %v6673_v55 = vpop.f32.mrb[148].mxu0 }
 0x510   : > { %v7119_v60 = vadd.f32 %v4268_v52, %v10500_v18  ;;  %v4270_v1 = vpop.f32.mrb[149].mxu1  ;;  %v6674_v63 = vpop.f32.mrb[149].mxu0  ;;  %v4364_v52 = vadd.f32 %v10694_v9, %v10719_v40 }
 0x511   : > { %v7120_v22 = vadd.f32 %v4270_v1, %v10504_v44  ;;  %v6675_v14 = vadd.f32 %v6674_v63, %v6673_v55  ;;  %v4272_v47 = vpop.f32.mrb[150].mxu1  ;;  %v6676_v31 = vpop.f32.mrb[150].mxu0 }
 0x512   : > { %v7121_v21 = vadd.f32 %v4272_v47, %v10500_v18  ;;  %v4274_v24 = vpop.f32.mrb[151].mxu1  ;;  %v6677_v3 = vpop.f32.mrb[151].mxu0 }
 0x513   : > { %v6615_v49 = vpack.c.bf16 %v7120_v22, %v7119_v60  ;;  %v7122_v23 = vadd.f32 %v4274_v24, %v10504_v44  ;;  %v6678_v46 = vadd.f32 %v6677_v3, %v6676_v31  ;;  %v4372_v13 = vadd.f32 %v6675_v14, %v10719_v40 }
 0x514   : > { %v4367_v14 = vadd.f32 %v10698_v29, %v10719_v40 }
 0x515   : > { %5855 = vst [vmem:[%s9948_s28 + $0x3c0] sm:$0xff] %v6615_v49  ;;  %v6617_v17 = vpack.c.bf16 %v7122_v23, %v7121_v21 }
 0x517   : > { %5857 = vst [vmem:[%s9948_s28 + $0x3e4] sm:$0xff] %v6617_v17  ;;  %v4278_v33 = vpop.f32.mrb[152].mxu1  ;;  %v6679_v19 = vpop.f32.mrb[152].mxu0 }
 0x518   : > { %v7123_v26 = vadd.f32 %v4278_v33, %v10500_v18  ;;  %v4280_v42 = vpop.f32.mrb[153].mxu1  ;;  %v6680_v6 = vpop.f32.mrb[153].mxu0 }
 0x519   : > { %v7124_v45 = vadd.f32 %v4280_v42, %v10504_v44  ;;  %v6681_v58 = vadd.f32 %v6680_v6, %v6679_v19  ;;  %v4282_v54 = vpop.f32.mrb[154].mxu1  ;;  %v6682_v4 = vpop.f32.mrb[154].mxu0 }
 0x51a   : > { %v7125_v53 = vadd.f32 %v4282_v54, %v10500_v18  ;;  %v4284_v8 = vpop.f32.mrb[155].mxu1  ;;  %v6683_v50 = vpop.f32.mrb[155].mxu0 }
 0x51b   : > { %v6619_v51 = vpack.c.bf16 %v7124_v45, %v7123_v26  ;;  %v7126_v59 = vadd.f32 %v4284_v8, %v10504_v44  ;;  %v6684_v20 = vadd.f32 %v6683_v50, %v6682_v4  ;;  %v4380_v42 = vadd.f32 %v6681_v58, %v10719_v40 }
 0x51d   : > { %5859 = vst [vmem:[%s9948_s28 + $0x408] sm:$0xff] %v6619_v51  ;;  %v6621_v5 = vpack.c.bf16 %v7126_v59, %v7125_v53  ;;  %v4383_v51 = vadd.f32 %v6684_v20, %v10719_v40 }
 0x51f   : > { %5861 = vst [vmem:[%s9948_s28 + $0x42c] sm:$0xff] %v6621_v5  ;;  %v4288_v16 = vpop.f32.mrb[156].mxu1  ;;  %v6685_v61 = vpop.f32.mrb[156].mxu0 }
 0x520   : > { %v7127_v39 = vadd.f32 %v4288_v16, %v10500_v18  ;;  %v4290_v28 = vpop.f32.mrb[157].mxu1  ;;  %v6686_v43 = vpop.f32.mrb[157].mxu0 }
 0x521   : > { %v7128_v34 = vadd.f32 %v4290_v28, %v10504_v44  ;;  %v6687_v36 = vadd.f32 %v6686_v43, %v6685_v61  ;;  %v4292_v56 = vpop.f32.mrb[158].mxu1  ;;  %v6688_v2 = vpop.f32.mrb[158].mxu0 }
 0x522   : > { %v7129_v32 = vadd.f32 %v4292_v56, %v10500_v18  ;;  %v4294_v7 = vpop.f32.mrb[159].mxu1  ;;  %v6689_v62 = vpop.f32.mrb[159].mxu0 }
 0x523   : > { %v6623_v48 = vpack.c.bf16 %v7128_v34, %v7127_v39  ;;  %v7130_v37 = vadd.f32 %v4294_v7, %v10504_v44  ;;  %v6690_v30 = vadd.f32 %v6689_v62, %v6688_v2  ;;  %v4375_v44 = vadd.f32 %v6678_v46, %v10719_v40 }
 0x524   : > { %v4388_v33 = vadd.f32 %v6687_v36, %v10719_v40 }
 0x525   : > { %5863 = vst [vmem:[%s9948_s28 + $0x450] sm:$0xff] %v6623_v48  ;;  %v6625_v10 = vpack.c.bf16 %v7130_v37, %v7129_v32  ;;  %v4391_v54 = vadd.f32 %v6690_v30, %v10719_v40 }
 0x527   : > { %5865 = vst [vmem:[%s9948_s28 + $0x474] sm:$0xff] %v6625_v10  ;;  %v6691_v0 = vpop.f32.mrb[160].mxu0  ;;  %v6789_v25 = vpop.f32.mrb[160].mxu1 }
 0x528   : > { %v4533_v55 = vadd.f32 %v6789_v25, %v4372_v13  ;;  %v6692_v18 = vpop.f32.mrb[161].mxu0  ;;  %v4524_v60 = vpop.f32.mrb[161].mxu1 }
 0x529   : > { %v6693_v1 = vadd.f32 %v6692_v18, %v6691_v0  ;;  %v4525_v63 = vadd.f32 %v4524_v60, %v4364_v52  ;;  %v6694_v22 = vpop.f32.mrb[162].mxu0  ;;  %v6790_v47 = vpop.f32.mrb[162].mxu1 }
 0x52a   : > { %v6584_v31 = vpack.c.bf16 %v4533_v55, %v4533_v55  ;;  %v4536_v21 = vadd.f32 %v6790_v47, %v4375_v44  ;;  %v6695_v24 = vpop.f32.mrb[163].mxu0  ;;  %v4527_v9 = vpop.f32.mrb[163].mxu1 }
 0x52b   : > { %v6580_v3 = vpack.c.bf16 %v4525_v63, %v4525_v63  ;;  %v6696_v49 = vadd.f32 %v6695_v24, %v6694_v22  ;;  %v4528_v23 = vadd.f32 %v4527_v9, %v4367_v14  ;;  %v4396_v32 = vadd.f32 %v6693_v1, %v10719_v40 }
 0x52c   : > { %5824 = vst [vmem:[%s9948_s28 + $0x188] sm:$0xf] %v6584_v31  ;;  %v6586_v17 = vpack.c.bf16 %v4536_v21, %v4536_v21 }
 0x52d   : > { %5820 = vst [vmem:[%s9948_s28 + $0x140] sm:$0xf] %v6580_v3  ;;  %v6582_v46 = vpack.c.bf16 %v4528_v23, %v4528_v23  ;;  %v4399_v0 = vadd.f32 %v6696_v49, %v10719_v40 }
 0x52e   : > { %5826 = vst [vmem:[%s9948_s28 + $0x1ac] sm:$0xf] %v6586_v17 }
 0x52f   : > { %5822 = vst [vmem:[%s9948_s28 + $0x164] sm:$0xf] %v6582_v46  ;;  %v6697_v19 = vpop.f32.mrb[164].mxu0  ;;  %v6793_v26 = vpop.f32.mrb[164].mxu1 }
 0x530   : > { %v4549_v29 = vadd.f32 %v6793_v26, %v4388_v33  ;;  %v6698_v6 = vpop.f32.mrb[165].mxu0  ;;  %v4540_v45 = vpop.f32.mrb[165].mxu1 }
 0x531   : > { %v6699_v4 = vadd.f32 %v6698_v6, %v6697_v19  ;;  %v4541_v53 = vadd.f32 %v4540_v45, %v4380_v42  ;;  %v6700_v8 = vpop.f32.mrb[166].mxu0  ;;  %v6794_v50 = vpop.f32.mrb[166].mxu1 }
 0x532   : > { %v6592_v59 = vpack.c.bf16 %v4549_v29, %v4549_v29  ;;  %v4552_v5 = vadd.f32 %v6794_v50, %v4391_v54  ;;  %v6701_v16 = vpop.f32.mrb[167].mxu0  ;;  %v4543_v61 = vpop.f32.mrb[167].mxu1 }
 0x533   : > { %v6588_v58 = vpack.c.bf16 %v4541_v53, %v4541_v53  ;;  %v6702_v39 = vadd.f32 %v6701_v16, %v6700_v8  ;;  %v4544_v28 = vadd.f32 %v4543_v61, %v4383_v51  ;;  %v4404_v36 = vadd.f32 %v6699_v4, %v10719_v40 }
 0x534   : > { %5832 = vst [vmem:[%s9948_s28 + $0x218] sm:$0xf] %v6592_v59  ;;  %v6594_v43 = vpack.c.bf16 %v4552_v5, %v4552_v5 }
 0x535   : > { %5828 = vst [vmem:[%s9948_s28 + $0x1d0] sm:$0xf] %v6588_v58  ;;  %v6590_v34 = vpack.c.bf16 %v4544_v28, %v4544_v28  ;;  %v4407_v48 = vadd.f32 %v6702_v39, %v10719_v40 }
 0x536   : > { %5834 = vst [vmem:[%s9948_s28 + $0x23c] sm:$0xf] %v6594_v43 }
 0x537   : > { %5830 = vst [vmem:[%s9948_s28 + $0x1f4] sm:$0xf] %v6590_v34  ;;  %v6703_v56 = vpop.f32.mrb[168].mxu0  ;;  %v6797_v2 = vpop.f32.mrb[168].mxu1 }
 0x538   : > { %v4565_v20 = vadd.f32 %v6797_v2, %v4404_v36  ;;  %v6704_v7 = vpop.f32.mrb[169].mxu0  ;;  %v4556_v62 = vpop.f32.mrb[169].mxu1 }
 0x539   : > { %v6705_v37 = vadd.f32 %v6704_v7, %v6703_v56  ;;  %v4557_v30 = vadd.f32 %v4556_v62, %v4396_v32  ;;  %v6706_v10 = vpop.f32.mrb[170].mxu0  ;;  %v6798_v13 = vpop.f32.mrb[170].mxu1 }
 0x53a   : > { %v6600_v25 = vpack.c.bf16 %v4565_v20, %v4565_v20  ;;  %v4568_v52 = vadd.f32 %v6798_v13, %v4407_v48  ;;  %v6707_v55 = vpop.f32.mrb[171].mxu0  ;;  %v4559_v18 = vpop.f32.mrb[171].mxu1 }
 0x53b   : > { %v6596_v60 = vpack.c.bf16 %v4557_v30, %v4557_v30  ;;  %v6708_v44 = vadd.f32 %v6707_v55, %v6706_v10  ;;  %v4560_v1 = vadd.f32 %v4559_v18, %v4399_v0  ;;  %v4412_v31 = vadd.f32 %v6705_v37, %v10719_v40 }
 0x53c   : > { %5840 = vst [vmem:[%s9948_s28 + $0x2a8] sm:$0xf] %v6600_v25  ;;  %v6602_v63 = vpack.c.bf16 %v4568_v52, %v4568_v52 }
 0x53d   : > { %5836 = vst [vmem:[%s9948_s28 + $0x260] sm:$0xf] %v6596_v60  ;;  %v6598_v22 = vpack.c.bf16 %v4560_v1, %v4560_v1  ;;  %v4415_v17 = vadd.f32 %v6708_v44, %v10719_v40 }
 0x53e   : > { %5842 = vst [vmem:[%s9948_s28 + $0x2cc] sm:$0xf] %v6602_v63 }
 0x53f   : > { %5838 = vst [vmem:[%s9948_s28 + $0x284] sm:$0xf] %v6598_v22  ;;  %v6709_v47 = vpop.f32.mrb[172].mxu0  ;;  %v6801_v14 = vpop.f32.mrb[172].mxu1 }
 0x540   : > { %v6710_v21 = vpop.f32.mrb[173].mxu0  ;;  %v4572_v24 = vpop.f32.mrb[173].mxu1 }
 0x541   : > { %v6711_v9 = vadd.f32 %v6710_v21, %v6709_v47  ;;  %v4573_v3 = vadd.f32 %v4572_v24, %v4412_v31  ;;  %v6712_v49 = vpop.f32.mrb[174].mxu0  ;;  %v6802_v23 = vpop.f32.mrb[174].mxu1 }
 0x542   : > { %v6713_v46 = vpop.f32.mrb[175].mxu0  ;;  %v4575_v33 = vpop.f32.mrb[175].mxu1 }
 0x543   : > { %v4420_v19 = vadd.f32 %v6711_v9, %v10719_v40  ;;  %v6604_v26 = vpack.c.bf16 %v4573_v3, %v4573_v3  ;;  %v6714_v42 = vadd.f32 %v6713_v46, %v6712_v49  ;;  %v4576_v29 = vadd.f32 %v4575_v33, %v4415_v17 }
 0x545   : > { %v4581_v6 = vadd.f32 %v6801_v14, %v4420_v19  ;;  %5844 = vst [vmem:[%s9948_s28 + $0x2f0] sm:$0xf] %v6604_v26  ;;  %v4423_v45 = vadd.f32 %v6714_v42, %v10719_v40  ;;  %v6606_v54 = vpack.c.bf16 %v4576_v29, %v4576_v29 }
 0x547   : > { %v6608_v4 = vpack.c.bf16 %v4581_v6, %v4581_v6  ;;  %v4584_v53 = vadd.f32 %v6802_v23, %v4423_v45  ;;  %5846 = vst [vmem:[%s9948_s28 + $0x314] sm:$0xf] %v6606_v54  ;;  %v6715_v8 = vpop.f32.mrb[176].mxu0  ;;  %v6805_v50 = vpop.f32.mrb[176].mxu1 }
 0x548   : > { %v6716_v51 = vpop.f32.mrb[177].mxu0  ;;  %v4588_v59 = vpop.f32.mrb[177].mxu1 }
 0x549   : > { %5848 = vst [vmem:[%s9948_s28 + $0x338] sm:$0xf] %v6608_v4  ;;  %v6610_v5 = vpack.c.bf16 %v4584_v53, %v4584_v53  ;;  %v6717_v16 = vadd.f32 %v6716_v51, %v6715_v8  ;;  %v6718_v61 = vpop.f32.mrb[178].mxu0  ;;  %v6806_v58 = vpop.f32.mrb[178].mxu1  ;;  %v4340_v53 = vadd.f32 %v10664_v11, %v10719_v40 }
 0x54a   : > { %v6719_v39 = vpop.f32.mrb[179].mxu0  ;;  %v4591_v28 = vpop.f32.mrb[179].mxu1 }
 0x54b   : > { %5850 = vst [vmem:[%s9948_s28 + $0x35c] sm:$0xf] %v6610_v5  ;;  %v4428_v43 = vadd.f32 %v6717_v16, %v10719_v40  ;;  %v6720_v34 = vadd.f32 %v6719_v39, %v6718_v61  ;;  %v4343_v61 = vadd.f32 %v10668_v35, %v10719_v40 }
 0x54d   : > { %v4589_v36 = vadd.f32 %v4588_v59, %v4428_v43  ;;  %v4431_v56 = vadd.f32 %v6720_v34, %v10719_v40  ;;  %v4332_v59 = vadd.f32 %v10654_v41, %v10719_v40 }
 0x54f   : > { %v6612_v2 = vpack.c.bf16 %v4589_v36, %v4589_v36  ;;  %v4592_v32 = vadd.f32 %v4591_v28, %v4431_v56  ;;  %v6721_v20 = vpop.f32.mrb[180].mxu0  ;;  %v6809_v7 = vpop.f32.mrb[180].mxu1  ;;  %v4335_v28 = vadd.f32 %v10658_v57, %v10719_v40  ;;  %v4348_v57 = vadd.f32 %v10674_v15, %v10719_v40 }
 0x550   : > { %v6722_v62 = vpop.f32.mrb[181].mxu0  ;;  %v4604_v48 = vpop.f32.mrb[181].mxu1 }
 0x551   : > { %5852 = vst [vmem:[%s9948_s28 + $0x380] sm:$0xf] %v6612_v2  ;;  %v6614_v37 = vpack.c.bf16 %v4592_v32, %v4592_v32  ;;  %v6723_v30 = vadd.f32 %v6722_v62, %v6721_v20  ;;  %v6724_v10 = vpop.f32.mrb[182].mxu0  ;;  %v6810_v13 = vpop.f32.mrb[182].mxu1  ;;  %v4356_v32 = vadd.f32 %v10684_v38, %v10719_v40  ;;  %v4351_v38 = vadd.f32 %v10678_v27, %v10719_v40 }
 0x552   : > { %v6725_v0 = vpop.f32.mrb[183].mxu0  ;;  %v4607_v25 = vpop.f32.mrb[183].mxu1 }
 0x553   : > { %5854 = vst [vmem:[%s9948_s28 + $0x3a4] sm:$0xf] %v6614_v37  ;;  %v4436_v52 = vadd.f32 %v6723_v30, %v10719_v40  ;;  %v6726_v55 = vadd.f32 %v6725_v0, %v6724_v10 }
 0x555   : > { %v4597_v18 = vadd.f32 %v6805_v50, %v4436_v52  ;;  %v4439_v60 = vadd.f32 %v6726_v55, %v10719_v40 }
 0x557   : > { %v6616_v44 = vpack.c.bf16 %v4597_v18, %v4597_v18  ;;  %v4600_v1 = vadd.f32 %v6806_v58, %v4439_v60  ;;  %v6727_v63 = vpop.f32.mrb[184].mxu0 }
 0x558   : > { %v6728_v22 = vpop.f32.mrb[185].mxu0 }
 0x559   : > { %5856 = vst [vmem:[%s9948_s28 + $0x3c8] sm:$0xf] %v6616_v44  ;;  %v6618_v47 = vpack.c.bf16 %v4600_v1, %v4600_v1  ;;  %v6729_v14 = vadd.f32 %v6728_v22, %v6727_v63  ;;  %v6730_v31 = vpop.f32.mrb[186].mxu0 }
 0x55a   : > { %v6731_v21 = vpop.f32.mrb[187].mxu0 }
 0x55b   : > { %5858 = vst [vmem:[%s9948_s28 + $0x3ec] sm:$0xf] %v6618_v47  ;;  %v4444_v24 = vadd.f32 %v6729_v14, %v10719_v40  ;;  %v6732_v9 = vadd.f32 %v6731_v21, %v6730_v31 }
 0x55d   : > { %v4605_v3 = vadd.f32 %v4604_v48, %v4444_v24  ;;  %v4447_v49 = vadd.f32 %v6732_v9, %v10719_v40  ;;  %v4359_v48 = vadd.f32 %v10688_v12, %v10719_v40 }
 0x55f   : > { %v6620_v23 = vpack.c.bf16 %v4605_v3, %v4605_v3  ;;  %v4608_v17 = vadd.f32 %v4607_v25, %v4447_v49  ;;  %v6733_v46 = vpop.f32.mrb[188].mxu0 }
 0x560   : > { %v6734_v33 = vpop.f32.mrb[189].mxu0 }
 0x561   : > { %5860 = vst [vmem:[%s9948_s28 + $0x410] sm:$0xf] %v6620_v23  ;;  %v6622_v19 = vpack.c.bf16 %v4608_v17, %v4608_v17  ;;  %v6735_v26 = vadd.f32 %v6734_v33, %v6733_v46  ;;  %v6736_v42 = vpop.f32.mrb[190].mxu0 }
 0x562   : > { %v6737_v29 = vpop.f32.mrb[191].mxu0 }
 0x563   : > { %5862 = vst [vmem:[%s9948_s28 + $0x434] sm:$0xf] %v6622_v19  ;;  %v4452_v6 = vadd.f32 %v6735_v26, %v10719_v40  ;;  %v6738_v45 = vadd.f32 %v6737_v29, %v6736_v42 }
 0x565   : > { %v4613_v54 = vadd.f32 %v6809_v7, %v4452_v6  ;;  %v4455_v4 = vadd.f32 %v6738_v45, %v10719_v40 }
 0x567   : > { %v6624_v8 = vpack.c.bf16 %v4613_v54, %v4613_v54  ;;  %v4616_v50 = vadd.f32 %v6810_v13, %v4455_v4  ;;  %v6781_v51 = vpop.f32.mrb[192].mxu0 }
 0x568   : > { %v4501_v5 = vadd.f32 %v6781_v51, %v4340_v53  ;;  %v4492_v16 = vpop.f32.mrb[193].mxu0 }
 0x569   : > { %5864 = vst [vmem:[%s9948_s28 + $0x458] sm:$0xf] %v6624_v8  ;;  %v6626_v58 = vpack.c.bf16 %v4616_v50, %v4616_v50  ;;  %v4493_v39 = vadd.f32 %v4492_v16, %v4332_v59  ;;  %v6782_v11 = vpop.f32.mrb[194].mxu0 }
 0x56a   : > { %v6568_v43 = vpack.c.bf16 %v4501_v5, %v4501_v5  ;;  %v4504_v34 = vadd.f32 %v6782_v11, %v4343_v61  ;;  %v4495_v36 = vpop.f32.mrb[195].mxu0 }
 0x56b   : > { %5866 = vst [vmem:[%s9948_s28 + $0x47c] sm:$0xf] %v6626_v58  ;;  %v6564_v41 = vpack.c.bf16 %v4493_v39, %v4493_v39  ;;  %v4496_v56 = vadd.f32 %v4495_v36, %v4335_v28 }
 0x56c   : > { %5808 = vst [vmem:[%s9948_s28 + $0x68] sm:$0xf] %v6568_v43  ;;  %v6570_v2 = vpack.c.bf16 %v4504_v34, %v4504_v34 }
 0x56d   : > { %5804 = vst [vmem:[%s9948_s28 + $0x20] sm:$0xf] %v6564_v41  ;;  %v6566_v35 = vpack.c.bf16 %v4496_v56, %v4496_v56 }
 0x56e   : > { %5810 = vst [vmem:[%s9948_s28 + $0x8c] sm:$0xf] %v6570_v2 }
 0x56f   : > { %5806 = vst [vmem:[%s9948_s28 + $0x44] sm:$0xf] %v6566_v35  ;;  %v6785_v20 = vpop.f32.mrb[196].mxu0 }
 0x570   : > { %v4517_v7 = vadd.f32 %v6785_v20, %v4356_v32  ;;  %v4508_v62 = vpop.f32.mrb[197].mxu0 }
 0x571   : > { %v4509_v37 = vadd.f32 %v4508_v62, %v4348_v57  ;;  %v6786_v30 = vpop.f32.mrb[198].mxu0 }
 0x572   : > { %v6576_v10 = vpack.c.bf16 %v4517_v7, %v4517_v7  ;;  %v4520_v13 = vadd.f32 %v6786_v30, %v4359_v48  ;;  %v4511_v0 = vpop.f32.mrb[199].mxu0 }
 0x573   : > { %v6572_v15 = vpack.c.bf16 %v4509_v37, %v4509_v37  ;;  %v4512_v25 = vadd.f32 %v4511_v0, %v4351_v38 }
 0x574   : > { %5816 = vst [vmem:[%s9948_s28 + $0xf8] sm:$0xf] %v6576_v10  ;;  %v6578_v52 = vpack.c.bf16 %v4520_v13, %v4520_v13 }
 0x575   : > { %5812 = vst [vmem:[%s9948_s28 + $0xb0] sm:$0xf] %v6572_v15  ;;  %v6574_v12 = vpack.c.bf16 %v4512_v25, %v4512_v25 }
 0x576   : > { %5818 = vst [vmem:[%s9948_s28 + $0x11c] sm:$0xf] %v6578_v52 }
 0x577   : > { %5814 = vst [vmem:[%s9948_s28 + $0xd4] sm:$0xf] %v6574_v12 }
 0x578   : > { %8065 = shalt.err (!%p8062_p5)
}
 0x579   : > { %s8066_s17 = scalar_lea.hbm %s10798_s21, 18432  ;;  %s8070_s25 = scalar_lea.hbm %s10857_s5, 36864 }
 0x57a   : > { %p8067_p10 = scmp.ne.s32.totalorder %s10798_s21, %s8066_s17  ;;  %p8071_p3 = scmp.lt.u32.totalorder %s10798_s21, %s10857_s5 }
 0x57b   : > { %p8072_p7 = scmp.lt.u32.totalorder %s8070_s25, %s8066_s17  ;;  %p8074_p12 = scmp.lt.u32.totalorder %s8066_s17, %s10798_s21 }
 0x57c   : > { %p8068_p13 = pnand %p8067_p10, %p8352_p6 }
 0x57d   : > { %p8073_p11 = por %p8072_p7, %p8071_p3 }
 0x57e   : > { %p8069_p9 = pneg %p8068_p13 }
 0x57f   : > { %p8075_p1 = por %p8074_p12, %p8073_p11 }
 0x581   : > { %p8076_p2 = pnand %p8075_p1, %p8069_p9 }
 0x583   : > { %8079 = shalt.err (!%p8076_p2)
}
 0x584   : > { %s8155_s30 = smov 576   ;;  %s8156_s15 = smov 36  }
 0x585   : > { %7378 = dma.vmem_to_hbm [thread:$0]  (%p8352_p6), %s10801_s6, 18432, %s10798_s21, %s5868_s13, %s8155_s30, %s8155_s30, %s8156_s15  }
 0x586 PF: > { %s5899_s9 = sand.u32 1, %s8122_s18   ;;  %p11299_p4 = scmp.ne.s32.totalorder %s10999_s29, 0 }
 0x587   : > { %p11300_p8 = scmp.ge.s32.totalorder %s8142_s23, 2  ;;  %s5900_s27 = scalar_lea.sflag [#allocation4], %s5899_s9 }
 0x589   : > { %p7398_p0 = pnand %p11300_p8, %p11299_p4 }
 0x58b   : > { %8117 = dma.done.wait (!%p7398_p0), %s5900_s27, 18432  }
 0x58c   : > { %8119 = vsyncadd (!%p7398_p0), %s5900_s27, 4294948864  ;;  %s23_s23 = sadd.s32 1, %s8142_s23   ;;  %s11301_s18 = smov %s8126_s19 }
 0x58d   : > { %p20_p5 = scmp.ge.s32.totalorder %s23_s23, 4   ;;  %s11302_s19 = smov %s8130_s20 }
 0x58e   : > { %s11303_s20 = smov %s8364_s8  ;;  %s11304_s21 = smov %s8138_s22 }
 0x58f   : > { %s11305_s22 = smov %s11307_s24  ;;  %22 = sbr.rel (!%p20_p5) target bundleno = 10 (0xa), region = 101 }
 0x596   :  { %5905 = vsyncpa [#allocation3], 1 }
 0x597   :  { %5907 = vsyncpa [#allocation3 + $0x1], 1 }
 0x598   :  { %5908 = vsyncpa [#allocation6], 1 }
 0x599   :  { %5909 = vsyncpa [#allocation9], 1 }
 0x59a   :  { %5910 = vsyncpa [#allocation4], 1 }
 0x59b   :  { %5912 = vsyncpa [#allocation4 + $0x1], 1 }

</bundles_post_ra>
